<compile_context>
chip_gen: v7x
topology: tpu7x:2x2x1
jax: 0.10.0
libtpu: 0.0.40
codegen_flags: <defaults>
</compile_context>

<pallas_src>
import jax
import jax.numpy as jnp
from jax.experimental import pallas as pl
from jax.experimental.pallas import tpu as pltpu


def _sigmoid(z):
    # Exact sigmoid via a single tanh -> one EUP op, no VPU divide.
    return 0.5 * jnp.tanh(0.5 * z) + 0.5


# --------------------------------------------------------------------------
# Fused kernel: all LSTM layers + classifier in one invocation (no grid).
# --------------------------------------------------------------------------
def _make_fused_kernel(T, B, H, n_layer):
    def kernel(x_ref, *rest):
        # rest = [wih_0, whh_0, b_0, ..., wih_{L-1}, whh_{L-1}, b_{L-1},
        #         wcls, bcls, out_ref, seq_scr, xw_scr]
        lstm_refs = rest[:3 * n_layer]
        wcls_ref = rest[3 * n_layer]
        bcls_ref = rest[3 * n_layer + 1]
        out_ref = rest[3 * n_layer + 2]
        seq_scr = rest[3 * n_layer + 3]     # (T*B, H)  layer output sequence
        xw_scr = rest[3 * n_layer + 4]      # (T*B, 4H) hoisted input projection

        h_last = None
        for l in range(n_layer):
            wih_ref = lstm_refs[3 * l + 0]  # (D_l, 4H)
            whh_ref = lstm_refs[3 * l + 1]  # (H,   4H)
            b_ref = lstm_refs[3 * l + 2]    # (1,   4H) = b_ih + b_hh
            is_last = l == n_layer - 1

            # Hoisted, time-independent projection of the whole sequence:
            #   xw[t] = x_t @ W_ih^T + (b_ih + b_hh)       (one M=T*B matmul)
            layer_in = x_ref[...] if l == 0 else seq_scr[...]
            xw_scr[...] = (
                jnp.dot(layer_in, wih_ref[...], preferred_element_type=jnp.float32)
                + b_ref[...]
            )

            # Serial recurrence over time (static, fully unrolled; T is small).
            h = jnp.zeros((B, H), jnp.float32)
            c = jnp.zeros((B, H), jnp.float32)
            for t in range(T):
                gates = xw_scr[t * B:(t + 1) * B, :] + jnp.dot(
                    h, whh_ref[...], preferred_element_type=jnp.float32
                )  # (B, 4H), PyTorch gate order: i, f, g, o
                i_g = _sigmoid(gates[:, 0 * H:1 * H])
                f_g = _sigmoid(gates[:, 1 * H:2 * H])
                g_g = jnp.tanh(gates[:, 2 * H:3 * H])
                o_g = _sigmoid(gates[:, 3 * H:4 * H])
                c = f_g * c + i_g * g_g
                h = o_g * jnp.tanh(c)
                if not is_last:
                    # Only non-final layers need the full output sequence
                    # (it feeds the next layer's hoisted projection).
                    seq_scr[t * B:(t + 1) * B, :] = h
            h_last = h

        # Classifier on the last timestep of the top layer: out[:, -1, :] @ W^T + b.
        out_ref[...] = (
            jnp.dot(h_last, wcls_ref[...], preferred_element_type=jnp.float32)
            + bcls_ref[...]
        ).astype(out_ref.dtype)

    return kernel


# --------------------------------------------------------------------------
# Forward pass: single fused pallas_call (jnp glue only for layout).
# --------------------------------------------------------------------------
@jax.jit
def lstm_behind_forward(x, params):
    B, T, D = x.shape
    lstm = params["lstm"]                       # [(wih_t, whh_t, b), ...]
    wcls_t, bcls = params["cls"]                # (H, C), (1, C)
    H = lstm[0][1].shape[0]
    C = wcls_t.shape[1]
    n_layer = len(lstm)

    # batch_first -> time-major, flattened to (T*B, D) for the hoisted matmul.
    x2d = jnp.transpose(x, (1, 0, 2)).reshape(T * B, D)

    inputs = [x2d]
    in_specs = [pl.BlockSpec((T * B, D), lambda: (0, 0))]
    for (wih_t, whh_t, b) in lstm:
        inputs += [wih_t, whh_t, b]
        in_specs += [
            pl.BlockSpec(wih_t.shape, lambda: (0, 0)),   # (D_l, 4H) resident
            pl.BlockSpec(whh_t.shape, lambda: (0, 0)),   # (H,   4H) resident
            pl.BlockSpec(b.shape, lambda: (0, 0)),       # (1,   4H) resident
        ]
    inputs += [wcls_t, bcls]
    in_specs += [
        pl.BlockSpec(wcls_t.shape, lambda: (0, 0)),
        pl.BlockSpec(bcls.shape, lambda: (0, 0)),
    ]

    kernel = _make_fused_kernel(T, B, H, n_layer)

    return pl.pallas_call(
        kernel,
        out_shape=jax.ShapeDtypeStruct((B, C), x.dtype),
        in_specs=in_specs,
        out_specs=pl.BlockSpec((B, C), lambda: (0, 0)),
        scratch_shapes=[
            pltpu.VMEM((T * B, H), jnp.float32),       # layer output sequence
            pltpu.VMEM((T * B, 4 * H), jnp.float32),   # hoisted input projection
        ],
    )(*inputs)


class LSTMBehind:
    """Mirror of the PyTorch nn.Module.

    Weights are initialized in PyTorch layout and pre-transposed ONCE here
    to kernel layout: W_ih^T (D,4H), W_hh^T (H,4H), summed bias (1,4H),
    W_cls^T (H,C), b_cls (1,C).
    """

    def __init__(self, in_dim, hidden_dim, n_layer, n_class, key):
        k = 1.0 / jnp.sqrt(hidden_dim)
        lstm_params = []
        for layer in range(n_layer):
            d_in = in_dim if layer == 0 else hidden_dim
            key, k1, k2, k3, k4 = jax.random.split(key, 5)
            w_ih = jax.random.uniform(k1, (4 * hidden_dim, d_in), jnp.float32, -k, k)
            w_hh = jax.random.uniform(k2, (4 * hidden_dim, hidden_dim), jnp.float32, -k, k)
            b_ih = jax.random.uniform(k3, (4 * hidden_dim,), jnp.float32, -k, k)
            b_hh = jax.random.uniform(k4, (4 * hidden_dim,), jnp.float32, -k, k)
            lstm_params.append((
                jnp.transpose(w_ih),                       # (D_l, 4H)
                jnp.transpose(w_hh),                       # (H,   4H)
                jnp.reshape(b_ih + b_hh, (1, 4 * hidden_dim)),
            ))
        key, k5, k6 = jax.random.split(key, 3)
        w_cls = jax.random.uniform(k5, (n_class, hidden_dim), jnp.float32, -k, k)
        b_cls = jax.random.uniform(k6, (n_class,), jnp.float32, -k, k)
        self.params = {
            "lstm": lstm_params,
            "cls": (jnp.transpose(w_cls), jnp.reshape(b_cls, (1, n_class))),
        }

    def __call__(self, x):
        return lstm_behind_forward(x, self.params)


# --------------------------------------------------------------------------
# Pure-JAX reference (PyTorch LSTM math), for correctness checking.
# --------------------------------------------------------------------------
def lstm_behind_ref(x, params):
    B = x.shape[0]
    seq = x
    for (w_ih_t, w_hh_t, b) in params["lstm"]:
        H = w_hh_t.shape[0]
        h = jnp.zeros((B, H), jnp.float32)
        c = jnp.zeros((B, H), jnp.float32)
        outs = []
        for t in range(seq.shape[1]):
            gates = seq[:, t, :] @ w_ih_t + h @ w_hh_t + b
            i_g, f_g, g_g, o_g = jnp.split(gates, 4, axis=-1)
            i_g = jax.nn.sigmoid(i_g)
            f_g = jax.nn.sigmoid(f_g)
            g_g = jnp.tanh(g_g)
            o_g = jax.nn.sigmoid(o_g)
            c = f_g * c + i_g * g_g
            h = o_g * jnp.tanh(c)
            outs.append(h)
        seq = jnp.stack(outs, axis=1)
    last = seq[:, -1, :]
    w_cls_t, b_cls = params["cls"]
    return last @ w_cls_t + b_cls


if __name__ == "__main__":
    key = jax.random.PRNGKey(0)
    # Small, TPU-friendly shapes consistent with the module:
    # batch=8, seq=8, in_dim=64, hidden=128, 2 layers, 10 classes.
    B, T, IN_DIM, HIDDEN, N_LAYER, N_CLASS = 8, 8, 64, 128, 2, 10

    k_x, k_p = jax.random.split(key)
    x = jax.random.normal(k_x, (B, T, IN_DIM), dtype=jnp.float32)

    model = LSTMBehind(IN_DIM, HIDDEN, N_LAYER, N_CLASS, k_p)

    out = jax.block_until_ready(model(x))
    ref = lstm_behind_ref(x, model.params)

    assert out.shape == (B, N_CLASS), out.shape
    assert out.dtype == x.dtype
    max_err = float(jnp.max(jnp.abs(out - ref)))
    assert jnp.allclose(out, ref, atol=2e-2, rtol=2e-2), f"max_err={max_err}"

    print("KERNEL_OK")
</pallas_src>

<mosaic_0001>
module attributes {stable_mosaic.version = 11 : i64} {
  func.func @kernel(%arg0: memref<64x64xf32, #tpu.memory_space<vmem>>, %arg1: memref<64x512xf32, #tpu.memory_space<vmem>>, %arg2: memref<128x512xf32, #tpu.memory_space<vmem>>, %arg3: memref<1x512xf32, #tpu.memory_space<vmem>>, %arg4: memref<128x512xf32, #tpu.memory_space<vmem>>, %arg5: memref<128x512xf32, #tpu.memory_space<vmem>>, %arg6: memref<1x512xf32, #tpu.memory_space<vmem>>, %arg7: memref<128x10xf32, #tpu.memory_space<vmem>>, %arg8: memref<1x10xf32, #tpu.memory_space<vmem>>, %arg9: memref<8x10xf32, #tpu.memory_space<vmem>>, %arg10: memref<64x128xf32, #tpu.memory_space<vmem>>, %arg11: memref<64x512xf32, #tpu.memory_space<vmem>>) attributes {dimension_semantics = [], scalar_prefetch = 0 : i64, scratch_operands = 2 : i64, tpu.core_type = #tpu.core_type<tc>} {
    %c0 = arith.constant 0 : index
    %c0_0 = arith.constant 0 : index
    %0 = vector.load %arg0[%c0, %c0_0] : memref<64x64xf32, #tpu.memory_space<vmem>>, vector<64x64xf32>
    %c0_1 = arith.constant 0 : index
    %c0_2 = arith.constant 0 : index
    %1 = vector.load %arg1[%c0_1, %c0_2] : memref<64x512xf32, #tpu.memory_space<vmem>>, vector<64x512xf32>
    %cst = arith.constant dense<0.000000e+00> : vector<64x512xf32>
    %2 = tpu.matmul %0, %1, %cst {dimension_numbers = #tpu.dot_dimension_numbers<[1], [0], [0], [1], [0, 0, 1, 1], [], []>} : vector<64x64xf32>, vector<64x512xf32>, vector<64x512xf32> -> vector<64x512xf32>
    %c0_3 = arith.constant 0 : index
    %c0_4 = arith.constant 0 : index
    %3 = vector.load %arg3[%c0_3, %c0_4] : memref<1x512xf32, #tpu.memory_space<vmem>>, vector<1x512xf32>
    %4 = vector.broadcast %3 : vector<1x512xf32> to vector<64x512xf32>
    %5 = arith.addf %2, %4 : vector<64x512xf32>
    %c0_5 = arith.constant 0 : index
    %c0_6 = arith.constant 0 : index
    %6 = vector.load %arg11[%c0_5, %c0_6] : memref<64x512xf32, #tpu.memory_space<vmem>>, vector<64x512xf32>
    tpu.vector_store %arg11[%c0_5, %c0_6], %5 {strides = array<i32>} : memref<64x512xf32, #tpu.memory_space<vmem>>, vector<64x512xf32>,
    %cst_7 = arith.constant 0.000000e+00 : f32
    %7 = vector.broadcast %cst_7 : f32 to vector<8x128xf32>
    %cst_8 = arith.constant 0.000000e+00 : f32
    %8 = vector.broadcast %cst_8 : f32 to vector<8x128xf32>
    %c0_9 = arith.constant 0 : index
    %c0_10 = arith.constant 0 : index
    %9 = vector.load %arg11[%c0_9, %c0_10] : memref<64x512xf32, #tpu.memory_space<vmem>>, vector<8x512xf32>
    %c0_11 = arith.constant 0 : index
    %c0_12 = arith.constant 0 : index
    %10 = vector.load %arg2[%c0_11, %c0_12] : memref<128x512xf32, #tpu.memory_space<vmem>>, vector<128x512xf32>
    %cst_13 = arith.constant dense<0.000000e+00> : vector<8x512xf32>
    %11 = tpu.matmul %7, %10, %cst_13 {dimension_numbers = #tpu.dot_dimension_numbers<[1], [0], [0], [1], [0, 0, 1, 1], [], []>} : vector<8x128xf32>, vector<128x512xf32>, vector<8x512xf32> -> vector<8x512xf32>
    %12 = arith.addf %9, %11 : vector<8x512xf32>
    %13 = vector.extract_strided_slice %12 {offsets = [0, 0], sizes = [8, 128], strides = [1, 1]} : vector<8x512xf32> to vector<8x128xf32>
    %cst_14 = arith.constant 5.000000e-01 : f32
    %14 = vector.broadcast %cst_14 : f32 to vector<8x128xf32>
    %15 = arith.mulf %14, %13 : vector<8x128xf32>
    %16 = math.tanh %15 : vector<8x128xf32>
    %cst_15 = arith.constant 5.000000e-01 : f32
    %17 = vector.broadcast %cst_15 : f32 to vector<8x128xf32>
    %18 = arith.mulf %17, %16 : vector<8x128xf32>
    %cst_16 = arith.constant 5.000000e-01 : f32
    %19 = vector.broadcast %cst_16 : f32 to vector<8x128xf32>
    %20 = arith.addf %18, %19 : vector<8x128xf32>
    %21 = vector.extract_strided_slice %12 {offsets = [0, 128], sizes = [8, 128], strides = [1, 1]} : vector<8x512xf32> to vector<8x128xf32>
    %cst_17 = arith.constant 5.000000e-01 : f32
    %22 = vector.broadcast %cst_17 : f32 to vector<8x128xf32>
    %23 = arith.mulf %22, %21 : vector<8x128xf32>
    %24 = math.tanh %23 : vector<8x128xf32>
    %cst_18 = arith.constant 5.000000e-01 : f32
    %25 = vector.broadcast %cst_18 : f32 to vector<8x128xf32>
    %26 = arith.mulf %25, %24 : vector<8x128xf32>
    %cst_19 = arith.constant 5.000000e-01 : f32
    %27 = vector.broadcast %cst_19 : f32 to vector<8x128xf32>
    %28 = arith.addf %26, %27 : vector<8x128xf32>
    %29 = vector.extract_strided_slice %12 {offsets = [0, 256], sizes = [8, 128], strides = [1, 1]} : vector<8x512xf32> to vector<8x128xf32>
    %30 = math.tanh %29 : vector<8x128xf32>
    %31 = vector.extract_strided_slice %12 {offsets = [0, 384], sizes = [8, 128], strides = [1, 1]} : vector<8x512xf32> to vector<8x128xf32>
    %cst_20 = arith.constant 5.000000e-01 : f32
    %32 = vector.broadcast %cst_20 : f32 to vector<8x128xf32>
    %33 = arith.mulf %32, %31 : vector<8x128xf32>
    %34 = math.tanh %33 : vector<8x128xf32>
    %cst_21 = arith.constant 5.000000e-01 : f32
    %35 = vector.broadcast %cst_21 : f32 to vector<8x128xf32>
    %36 = arith.mulf %35, %34 : vector<8x128xf32>
    %cst_22 = arith.constant 5.000000e-01 : f32
    %37 = vector.broadcast %cst_22 : f32 to vector<8x128xf32>
    %38 = arith.addf %36, %37 : vector<8x128xf32>
    %39 = arith.mulf %28, %8 : vector<8x128xf32>
    %40 = arith.mulf %20, %30 : vector<8x128xf32>
    %41 = arith.addf %39, %40 : vector<8x128xf32>
    %42 = math.tanh %41 : vector<8x128xf32>
    %43 = arith.mulf %38, %42 : vector<8x128xf32>
    %c0_23 = arith.constant 0 : index
    %c0_24 = arith.constant 0 : index
    %44 = vector.load %arg10[%c0_23, %c0_24] : memref<64x128xf32, #tpu.memory_space<vmem>>, vector<8x128xf32>
    tpu.vector_store %arg10[%c0_23, %c0_24], %43 {strides = array<i32>} : memref<64x128xf32, #tpu.memory_space<vmem>>, vector<8x128xf32>,
    %c8 = arith.constant 8 : index
    %c0_25 = arith.constant 0 : index
    %45 = vector.load %arg11[%c8, %c0_25] : memref<64x512xf32, #tpu.memory_space<vmem>>, vector<8x512xf32>
    %c0_26 = arith.constant 0 : index
    %c0_27 = arith.constant 0 : index
    %46 = vector.load %arg2[%c0_26, %c0_27] : memref<128x512xf32, #tpu.memory_space<vmem>>, vector<128x512xf32>
    %cst_28 = arith.constant dense<0.000000e+00> : vector<8x512xf32>
    %47 = tpu.matmul %43, %46, %cst_28 {dimension_numbers = #tpu.dot_dimension_numbers<[1], [0], [0], [1], [0, 0, 1, 1], [], []>} : vector<8x128xf32>, vector<128x512xf32>, vector<8x512xf32> -> vector<8x512xf32>
    %48 = arith.addf %45, %47 : vector<8x512xf32>
    %49 = vector.extract_strided_slice %48 {offsets = [0, 0], sizes = [8, 128], strides = [1, 1]} : vector<8x512xf32> to vector<8x128xf32>
    %cst_29 = arith.constant 5.000000e-01 : f32
    %50 = vector.broadcast %cst_29 : f32 to vector<8x128xf32>
    %51 = arith.mulf %50, %49 : vector<8x128xf32>
    %52 = math.tanh %51 : vector<8x128xf32>
    %cst_30 = arith.constant 5.000000e-01 : f32
    %53 = vector.broadcast %cst_30 : f32 to vector<8x128xf32>
    %54 = arith.mulf %53, %52 : vector<8x128xf32>
    %cst_31 = arith.constant 5.000000e-01 : f32
    %55 = vector.broadcast %cst_31 : f32 to vector<8x128xf32>
    %56 = arith.addf %54, %55 : vector<8x128xf32>
    %57 = vector.extract_strided_slice %48 {offsets = [0, 128], sizes = [8, 128], strides = [1, 1]} : vector<8x512xf32> to vector<8x128xf32>
    %cst_32 = arith.constant 5.000000e-01 : f32
    %58 = vector.broadcast %cst_32 : f32 to vector<8x128xf32>
    %59 = arith.mulf %58, %57 : vector<8x128xf32>
    %60 = math.tanh %59 : vector<8x128xf32>
    %cst_33 = arith.constant 5.000000e-01 : f32
    %61 = vector.broadcast %cst_33 : f32 to vector<8x128xf32>
    %62 = arith.mulf %61, %60 : vector<8x128xf32>
    %cst_34 = arith.constant 5.000000e-01 : f32
    %63 = vector.broadcast %cst_34 : f32 to vector<8x128xf32>
    %64 = arith.addf %62, %63 : vector<8x128xf32>
    %65 = vector.extract_strided_slice %48 {offsets = [0, 256], sizes = [8, 128], strides = [1, 1]} : vector<8x512xf32> to vector<8x128xf32>
    %66 = math.tanh %65 : vector<8x128xf32>
    %67 = vector.extract_strided_slice %48 {offsets = [0, 384], sizes = [8, 128], strides = [1, 1]} : vector<8x512xf32> to vector<8x128xf32>
    %cst_35 = arith.constant 5.000000e-01 : f32
    %68 = vector.broadcast %cst_35 : f32 to vector<8x128xf32>
    %69 = arith.mulf %68, %67 : vector<8x128xf32>
    %70 = math.tanh %69 : vector<8x128xf32>
    %cst_36 = arith.constant 5.000000e-01 : f32
    %71 = vector.broadcast %cst_36 : f32 to vector<8x128xf32>
    %72 = arith.mulf %71, %70 : vector<8x128xf32>
    %cst_37 = arith.constant 5.000000e-01 : f32
    %73 = vector.broadcast %cst_37 : f32 to vector<8x128xf32>
    %74 = arith.addf %72, %73 : vector<8x128xf32>
    %75 = arith.mulf %64, %41 : vector<8x128xf32>
    %76 = arith.mulf %56, %66 : vector<8x128xf32>
    %77 = arith.addf %75, %76 : vector<8x128xf32>
    %78 = math.tanh %77 : vector<8x128xf32>
    %79 = arith.mulf %74, %78 : vector<8x128xf32>
    %c8_38 = arith.constant 8 : index
    %c0_39 = arith.constant 0 : index
    %80 = vector.load %arg10[%c8_38, %c0_39] : memref<64x128xf32, #tpu.memory_space<vmem>>, vector<8x128xf32>
    tpu.vector_store %arg10[%c8_38, %c0_39], %79 {strides = array<i32>} : memref<64x128xf32, #tpu.memory_space<vmem>>, vector<8x128xf32>,
    %c16 = arith.constant 16 : index
    %c0_40 = arith.constant 0 : index
    %81 = vector.load %arg11[%c16, %c0_40] : memref<64x512xf32, #tpu.memory_space<vmem>>, vector<8x512xf32>
    %c0_41 = arith.constant 0 : index
    %c0_42 = arith.constant 0 : index
    %82 = vector.load %arg2[%c0_41, %c0_42] : memref<128x512xf32, #tpu.memory_space<vmem>>, vector<128x512xf32>
    %cst_43 = arith.constant dense<0.000000e+00> : vector<8x512xf32>
    %83 = tpu.matmul %79, %82, %cst_43 {dimension_numbers = #tpu.dot_dimension_numbers<[1], [0], [0], [1], [0, 0, 1, 1], [], []>} : vector<8x128xf32>, vector<128x512xf32>, vector<8x512xf32> -> vector<8x512xf32>
    %84 = arith.addf %81, %83 : vector<8x512xf32>
    %85 = vector.extract_strided_slice %84 {offsets = [0, 0], sizes = [8, 128], strides = [1, 1]} : vector<8x512xf32> to vector<8x128xf32>
    %cst_44 = arith.constant 5.000000e-01 : f32
    %86 = vector.broadcast %cst_44 : f32 to vector<8x128xf32>
    %87 = arith.mulf %86, %85 : vector<8x128xf32>
    %88 = math.tanh %87 : vector<8x128xf32>
    %cst_45 = arith.constant 5.000000e-01 : f32
    %89 = vector.broadcast %cst_45 : f32 to vector<8x128xf32>
    %90 = arith.mulf %89, %88 : vector<8x128xf32>
    %cst_46 = arith.constant 5.000000e-01 : f32
    %91 = vector.broadcast %cst_46 : f32 to vector<8x128xf32>
    %92 = arith.addf %90, %91 : vector<8x128xf32>
    %93 = vector.extract_strided_slice %84 {offsets = [0, 128], sizes = [8, 128], strides = [1, 1]} : vector<8x512xf32> to vector<8x128xf32>
    %cst_47 = arith.constant 5.000000e-01 : f32
    %94 = vector.broadcast %cst_47 : f32 to vector<8x128xf32>
    %95 = arith.mulf %94, %93 : vector<8x128xf32>
    %96 = math.tanh %95 : vector<8x128xf32>
    %cst_48 = arith.constant 5.000000e-01 : f32
    %97 = vector.broadcast %cst_48 : f32 to vector<8x128xf32>
    %98 = arith.mulf %97, %96 : vector<8x128xf32>
    %cst_49 = arith.constant 5.000000e-01 : f32
    %99 = vector.broadcast %cst_49 : f32 to vector<8x128xf32>
    %100 = arith.addf %98, %99 : vector<8x128xf32>
    %101 = vector.extract_strided_slice %84 {offsets = [0, 256], sizes = [8, 128], strides = [1, 1]} : vector<8x512xf32> to vector<8x128xf32>
    %102 = math.tanh %101 : vector<8x128xf32>
    %103 = vector.extract_strided_slice %84 {offsets = [0, 384], sizes = [8, 128], strides = [1, 1]} : vector<8x512xf32> to vector<8x128xf32>
    %cst_50 = arith.constant 5.000000e-01 : f32
    %104 = vector.broadcast %cst_50 : f32 to vector<8x128xf32>
    %105 = arith.mulf %104, %103 : vector<8x128xf32>
    %106 = math.tanh %105 : vector<8x128xf32>
    %cst_51 = arith.constant 5.000000e-01 : f32
    %107 = vector.broadcast %cst_51 : f32 to vector<8x128xf32>
    %108 = arith.mulf %107, %106 : vector<8x128xf32>
    %cst_52 = arith.constant 5.000000e-01 : f32
    %109 = vector.broadcast %cst_52 : f32 to vector<8x128xf32>
    %110 = arith.addf %108, %109 : vector<8x128xf32>
    %111 = arith.mulf %100, %77 : vector<8x128xf32>
    %112 = arith.mulf %92, %102 : vector<8x128xf32>
    %113 = arith.addf %111, %112 : vector<8x128xf32>
    %114 = math.tanh %113 : vector<8x128xf32>
    %115 = arith.mulf %110, %114 : vector<8x128xf32>
    %c16_53 = arith.constant 16 : index
    %c0_54 = arith.constant 0 : index
    %116 = vector.load %arg10[%c16_53, %c0_54] : memref<64x128xf32, #tpu.memory_space<vmem>>, vector<8x128xf32>
    tpu.vector_store %arg10[%c16_53, %c0_54], %115 {strides = array<i32>} : memref<64x128xf32, #tpu.memory_space<vmem>>, vector<8x128xf32>,
    %c24 = arith.constant 24 : index
    %c0_55 = arith.constant 0 : index
    %117 = vector.load %arg11[%c24, %c0_55] : memref<64x512xf32, #tpu.memory_space<vmem>>, vector<8x512xf32>
    %c0_56 = arith.constant 0 : index
    %c0_57 = arith.constant 0 : index
    %118 = vector.load %arg2[%c0_56, %c0_57] : memref<128x512xf32, #tpu.memory_space<vmem>>, vector<128x512xf32>
    %cst_58 = arith.constant dense<0.000000e+00> : vector<8x512xf32>
    %119 = tpu.matmul %115, %118, %cst_58 {dimension_numbers = #tpu.dot_dimension_numbers<[1], [0], [0], [1], [0, 0, 1, 1], [], []>} : vector<8x128xf32>, vector<128x512xf32>, vector<8x512xf32> -> vector<8x512xf32>
    %120 = arith.addf %117, %119 : vector<8x512xf32>
    %121 = vector.extract_strided_slice %120 {offsets = [0, 0], sizes = [8, 128], strides = [1, 1]} : vector<8x512xf32> to vector<8x128xf32>
    %cst_59 = arith.constant 5.000000e-01 : f32
    %122 = vector.broadcast %cst_59 : f32 to vector<8x128xf32>
    %123 = arith.mulf %122, %121 : vector<8x128xf32>
    %124 = math.tanh %123 : vector<8x128xf32>
    %cst_60 = arith.constant 5.000000e-01 : f32
    %125 = vector.broadcast %cst_60 : f32 to vector<8x128xf32>
    %126 = arith.mulf %125, %124 : vector<8x128xf32>
    %cst_61 = arith.constant 5.000000e-01 : f32
    %127 = vector.broadcast %cst_61 : f32 to vector<8x128xf32>
    %128 = arith.addf %126, %127 : vector<8x128xf32>
    %129 = vector.extract_strided_slice %120 {offsets = [0, 128], sizes = [8, 128], strides = [1, 1]} : vector<8x512xf32> to vector<8x128xf32>
    %cst_62 = arith.constant 5.000000e-01 : f32
    %130 = vector.broadcast %cst_62 : f32 to vector<8x128xf32>
    %131 = arith.mulf %130, %129 : vector<8x128xf32>
    %132 = math.tanh %131 : vector<8x128xf32>
    %cst_63 = arith.constant 5.000000e-01 : f32
    %133 = vector.broadcast %cst_63 : f32 to vector<8x128xf32>
    %134 = arith.mulf %133, %132 : vector<8x128xf32>
    %cst_64 = arith.constant 5.000000e-01 : f32
    %135 = vector.broadcast %cst_64 : f32 to vector<8x128xf32>
    %136 = arith.addf %134, %135 : vector<8x128xf32>
    %137 = vector.extract_strided_slice %120 {offsets = [0, 256], sizes = [8, 128], strides = [1, 1]} : vector<8x512xf32> to vector<8x128xf32>
    %138 = math.tanh %137 : vector<8x128xf32>
    %139 = vector.extract_strided_slice %120 {offsets = [0, 384], sizes = [8, 128], strides = [1, 1]} : vector<8x512xf32> to vector<8x128xf32>
    %cst_65 = arith.constant 5.000000e-01 : f32
    %140 = vector.broadcast %cst_65 : f32 to vector<8x128xf32>
    %141 = arith.mulf %140, %139 : vector<8x128xf32>
    %142 = math.tanh %141 : vector<8x128xf32>
    %cst_66 = arith.constant 5.000000e-01 : f32
    %143 = vector.broadcast %cst_66 : f32 to vector<8x128xf32>
    %144 = arith.mulf %143, %142 : vector<8x128xf32>
    %cst_67 = arith.constant 5.000000e-01 : f32
    %145 = vector.broadcast %cst_67 : f32 to vector<8x128xf32>
    %146 = arith.addf %144, %145 : vector<8x128xf32>
    %147 = arith.mulf %136, %113 : vector<8x128xf32>
    %148 = arith.mulf %128, %138 : vector<8x128xf32>
    %149 = arith.addf %147, %148 : vector<8x128xf32>
    %150 = math.tanh %149 : vector<8x128xf32>
    %151 = arith.mulf %146, %150 : vector<8x128xf32>
    %c24_68 = arith.constant 24 : index
    %c0_69 = arith.constant 0 : index
    %152 = vector.load %arg10[%c24_68, %c0_69] : memref<64x128xf32, #tpu.memory_space<vmem>>, vector<8x128xf32>
    tpu.vector_store %arg10[%c24_68, %c0_69], %151 {strides = array<i32>} : memref<64x128xf32, #tpu.memory_space<vmem>>, vector<8x128xf32>,
    %c32 = arith.constant 32 : index
    %c0_70 = arith.constant 0 : index
    %153 = vector.load %arg11[%c32, %c0_70] : memref<64x512xf32, #tpu.memory_space<vmem>>, vector<8x512xf32>
    %c0_71 = arith.constant 0 : index
    %c0_72 = arith.constant 0 : index
    %154 = vector.load %arg2[%c0_71, %c0_72] : memref<128x512xf32, #tpu.memory_space<vmem>>, vector<128x512xf32>
    %cst_73 = arith.constant dense<0.000000e+00> : vector<8x512xf32>
    %155 = tpu.matmul %151, %154, %cst_73 {dimension_numbers = #tpu.dot_dimension_numbers<[1], [0], [0], [1], [0, 0, 1, 1], [], []>} : vector<8x128xf32>, vector<128x512xf32>, vector<8x512xf32> -> vector<8x512xf32>
    %156 = arith.addf %153, %155 : vector<8x512xf32>
    %157 = vector.extract_strided_slice %156 {offsets = [0, 0], sizes = [8, 128], strides = [1, 1]} : vector<8x512xf32> to vector<8x128xf32>
    %cst_74 = arith.constant 5.000000e-01 : f32
    %158 = vector.broadcast %cst_74 : f32 to vector<8x128xf32>
    %159 = arith.mulf %158, %157 : vector<8x128xf32>
    %160 = math.tanh %159 : vector<8x128xf32>
    %cst_75 = arith.constant 5.000000e-01 : f32
    %161 = vector.broadcast %cst_75 : f32 to vector<8x128xf32>
    %162 = arith.mulf %161, %160 : vector<8x128xf32>
    %cst_76 = arith.constant 5.000000e-01 : f32
    %163 = vector.broadcast %cst_76 : f32 to vector<8x128xf32>
    %164 = arith.addf %162, %163 : vector<8x128xf32>
    %165 = vector.extract_strided_slice %156 {offsets = [0, 128], sizes = [8, 128], strides = [1, 1]} : vector<8x512xf32> to vector<8x128xf32>
    %cst_77 = arith.constant 5.000000e-01 : f32
    %166 = vector.broadcast %cst_77 : f32 to vector<8x128xf32>
    %167 = arith.mulf %166, %165 : vector<8x128xf32>
    %168 = math.tanh %167 : vector<8x128xf32>
    %cst_78 = arith.constant 5.000000e-01 : f32
    %169 = vector.broadcast %cst_78 : f32 to vector<8x128xf32>
    %170 = arith.mulf %169, %168 : vector<8x128xf32>
    %cst_79 = arith.constant 5.000000e-01 : f32
    %171 = vector.broadcast %cst_79 : f32 to vector<8x128xf32>
    %172 = arith.addf %170, %171 : vector<8x128xf32>
    %173 = vector.extract_strided_slice %156 {offsets = [0, 256], sizes = [8, 128], strides = [1, 1]} : vector<8x512xf32> to vector<8x128xf32>
    %174 = math.tanh %173 : vector<8x128xf32>
    %175 = vector.extract_strided_slice %156 {offsets = [0, 384], sizes = [8, 128], strides = [1, 1]} : vector<8x512xf32> to vector<8x128xf32>
    %cst_80 = arith.constant 5.000000e-01 : f32
    %176 = vector.broadcast %cst_80 : f32 to vector<8x128xf32>
    %177 = arith.mulf %176, %175 : vector<8x128xf32>
    %178 = math.tanh %177 : vector<8x128xf32>
    %cst_81 = arith.constant 5.000000e-01 : f32
    %179 = vector.broadcast %cst_81 : f32 to vector<8x128xf32>
    %180 = arith.mulf %179, %178 : vector<8x128xf32>
    %cst_82 = arith.constant 5.000000e-01 : f32
    %181 = vector.broadcast %cst_82 : f32 to vector<8x128xf32>
    %182 = arith.addf %180, %181 : vector<8x128xf32>
    %183 = arith.mulf %172, %149 : vector<8x128xf32>
    %184 = arith.mulf %164, %174 : vector<8x128xf32>
    %185 = arith.addf %183, %184 : vector<8x128xf32>
    %186 = math.tanh %185 : vector<8x128xf32>
    %187 = arith.mulf %182, %186 : vector<8x128xf32>
    %c32_83 = arith.constant 32 : index
    %c0_84 = arith.constant 0 : index
    %188 = vector.load %arg10[%c32_83, %c0_84] : memref<64x128xf32, #tpu.memory_space<vmem>>, vector<8x128xf32>
    tpu.vector_store %arg10[%c32_83, %c0_84], %187 {strides = array<i32>} : memref<64x128xf32, #tpu.memory_space<vmem>>, vector<8x128xf32>,
    %c40 = arith.constant 40 : index
    %c0_85 = arith.constant 0 : index
    %189 = vector.load %arg11[%c40, %c0_85] : memref<64x512xf32, #tpu.memory_space<vmem>>, vector<8x512xf32>
    %c0_86 = arith.constant 0 : index
    %c0_87 = arith.constant 0 : index
    %190 = vector.load %arg2[%c0_86, %c0_87] : memref<128x512xf32, #tpu.memory_space<vmem>>, vector<128x512xf32>
    %cst_88 = arith.constant dense<0.000000e+00> : vector<8x512xf32>
    %191 = tpu.matmul %187, %190, %cst_88 {dimension_numbers = #tpu.dot_dimension_numbers<[1], [0], [0], [1], [0, 0, 1, 1], [], []>} : vector<8x128xf32>, vector<128x512xf32>, vector<8x512xf32> -> vector<8x512xf32>
    %192 = arith.addf %189, %191 : vector<8x512xf32>
    %193 = vector.extract_strided_slice %192 {offsets = [0, 0], sizes = [8, 128], strides = [1, 1]} : vector<8x512xf32> to vector<8x128xf32>
    %cst_89 = arith.constant 5.000000e-01 : f32
    %194 = vector.broadcast %cst_89 : f32 to vector<8x128xf32>
    %195 = arith.mulf %194, %193 : vector<8x128xf32>
    %196 = math.tanh %195 : vector<8x128xf32>
    %cst_90 = arith.constant 5.000000e-01 : f32
    %197 = vector.broadcast %cst_90 : f32 to vector<8x128xf32>
    %198 = arith.mulf %197, %196 : vector<8x128xf32>
    %cst_91 = arith.constant 5.000000e-01 : f32
    %199 = vector.broadcast %cst_91 : f32 to vector<8x128xf32>
    %200 = arith.addf %198, %199 : vector<8x128xf32>
    %201 = vector.extract_strided_slice %192 {offsets = [0, 128], sizes = [8, 128], strides = [1, 1]} : vector<8x512xf32> to vector<8x128xf32>
    %cst_92 = arith.constant 5.000000e-01 : f32
    %202 = vector.broadcast %cst_92 : f32 to vector<8x128xf32>
    %203 = arith.mulf %202, %201 : vector<8x128xf32>
    %204 = math.tanh %203 : vector<8x128xf32>
    %cst_93 = arith.constant 5.000000e-01 : f32
    %205 = vector.broadcast %cst_93 : f32 to vector<8x128xf32>
    %206 = arith.mulf %205, %204 : vector<8x128xf32>
    %cst_94 = arith.constant 5.000000e-01 : f32
    %207 = vector.broadcast %cst_94 : f32 to vector<8x128xf32>
    %208 = arith.addf %206, %207 : vector<8x128xf32>
    %209 = vector.extract_strided_slice %192 {offsets = [0, 256], sizes = [8, 128], strides = [1, 1]} : vector<8x512xf32> to vector<8x128xf32>
    %210 = math.tanh %209 : vector<8x128xf32>
    %211 = vector.extract_strided_slice %192 {offsets = [0, 384], sizes = [8, 128], strides = [1, 1]} : vector<8x512xf32> to vector<8x128xf32>
    %cst_95 = arith.constant 5.000000e-01 : f32
    %212 = vector.broadcast %cst_95 : f32 to vector<8x128xf32>
    %213 = arith.mulf %212, %211 : vector<8x128xf32>
    %214 = math.tanh %213 : vector<8x128xf32>
    %cst_96 = arith.constant 5.000000e-01 : f32
    %215 = vector.broadcast %cst_96 : f32 to vector<8x128xf32>
    %216 = arith.mulf %215, %214 : vector<8x128xf32>
    %cst_97 = arith.constant 5.000000e-01 : f32
    %217 = vector.broadcast %cst_97 : f32 to vector<8x128xf32>
    %218 = arith.addf %216, %217 : vector<8x128xf32>
    %219 = arith.mulf %208, %185 : vector<8x128xf32>
    %220 = arith.mulf %200, %210 : vector<8x128xf32>
    %221 = arith.addf %219, %220 : vector<8x128xf32>
    %222 = math.tanh %221 : vector<8x128xf32>
    %223 = arith.mulf %218, %222 : vector<8x128xf32>
    %c40_98 = arith.constant 40 : index
    %c0_99 = arith.constant 0 : index
    %224 = vector.load %arg10[%c40_98, %c0_99] : memref<64x128xf32, #tpu.memory_space<vmem>>, vector<8x128xf32>
    tpu.vector_store %arg10[%c40_98, %c0_99], %223 {strides = array<i32>} : memref<64x128xf32, #tpu.memory_space<vmem>>, vector<8x128xf32>,
    %c48 = arith.constant 48 : index
    %c0_100 = arith.constant 0 : index
    %225 = vector.load %arg11[%c48, %c0_100] : memref<64x512xf32, #tpu.memory_space<vmem>>, vector<8x512xf32>
    %c0_101 = arith.constant 0 : index
    %c0_102 = arith.constant 0 : index
    %226 = vector.load %arg2[%c0_101, %c0_102] : memref<128x512xf32, #tpu.memory_space<vmem>>, vector<128x512xf32>
    %cst_103 = arith.constant dense<0.000000e+00> : vector<8x512xf32>
    %227 = tpu.matmul %223, %226, %cst_103 {dimension_numbers = #tpu.dot_dimension_numbers<[1], [0], [0], [1], [0, 0, 1, 1], [], []>} : vector<8x128xf32>, vector<128x512xf32>, vector<8x512xf32> -> vector<8x512xf32>
    %228 = arith.addf %225, %227 : vector<8x512xf32>
    %229 = vector.extract_strided_slice %228 {offsets = [0, 0], sizes = [8, 128], strides = [1, 1]} : vector<8x512xf32> to vector<8x128xf32>
    %cst_104 = arith.constant 5.000000e-01 : f32
    %230 = vector.broadcast %cst_104 : f32 to vector<8x128xf32>
    %231 = arith.mulf %230, %229 : vector<8x128xf32>
    %232 = math.tanh %231 : vector<8x128xf32>
    %cst_105 = arith.constant 5.000000e-01 : f32
    %233 = vector.broadcast %cst_105 : f32 to vector<8x128xf32>
    %234 = arith.mulf %233, %232 : vector<8x128xf32>
    %cst_106 = arith.constant 5.000000e-01 : f32
    %235 = vector.broadcast %cst_106 : f32 to vector<8x128xf32>
    %236 = arith.addf %234, %235 : vector<8x128xf32>
    %237 = vector.extract_strided_slice %228 {offsets = [0, 128], sizes = [8, 128], strides = [1, 1]} : vector<8x512xf32> to vector<8x128xf32>
    %cst_107 = arith.constant 5.000000e-01 : f32
    %238 = vector.broadcast %cst_107 : f32 to vector<8x128xf32>
    %239 = arith.mulf %238, %237 : vector<8x128xf32>
    %240 = math.tanh %239 : vector<8x128xf32>
    %cst_108 = arith.constant 5.000000e-01 : f32
    %241 = vector.broadcast %cst_108 : f32 to vector<8x128xf32>
    %242 = arith.mulf %241, %240 : vector<8x128xf32>
    %cst_109 = arith.constant 5.000000e-01 : f32
    %243 = vector.broadcast %cst_109 : f32 to vector<8x128xf32>
    %244 = arith.addf %242, %243 : vector<8x128xf32>
    %245 = vector.extract_strided_slice %228 {offsets = [0, 256], sizes = [8, 128], strides = [1, 1]} : vector<8x512xf32> to vector<8x128xf32>
    %246 = math.tanh %245 : vector<8x128xf32>
    %247 = vector.extract_strided_slice %228 {offsets = [0, 384], sizes = [8, 128], strides = [1, 1]} : vector<8x512xf32> to vector<8x128xf32>
    %cst_110 = arith.constant 5.000000e-01 : f32
    %248 = vector.broadcast %cst_110 : f32 to vector<8x128xf32>
    %249 = arith.mulf %248, %247 : vector<8x128xf32>
    %250 = math.tanh %249 : vector<8x128xf32>
    %cst_111 = arith.constant 5.000000e-01 : f32
    %251 = vector.broadcast %cst_111 : f32 to vector<8x128xf32>
    %252 = arith.mulf %251, %250 : vector<8x128xf32>
    %cst_112 = arith.constant 5.000000e-01 : f32
    %253 = vector.broadcast %cst_112 : f32 to vector<8x128xf32>
    %254 = arith.addf %252, %253 : vector<8x128xf32>
    %255 = arith.mulf %244, %221 : vector<8x128xf32>
    %256 = arith.mulf %236, %246 : vector<8x128xf32>
    %257 = arith.addf %255, %256 : vector<8x128xf32>
    %258 = math.tanh %257 : vector<8x128xf32>
    %259 = arith.mulf %254, %258 : vector<8x128xf32>
    %c48_113 = arith.constant 48 : index
    %c0_114 = arith.constant 0 : index
    %260 = vector.load %arg10[%c48_113, %c0_114] : memref<64x128xf32, #tpu.memory_space<vmem>>, vector<8x128xf32>
    tpu.vector_store %arg10[%c48_113, %c0_114], %259 {strides = array<i32>} : memref<64x128xf32, #tpu.memory_space<vmem>>, vector<8x128xf32>,
    %c56 = arith.constant 56 : index
    %c0_115 = arith.constant 0 : index
    %261 = vector.load %arg11[%c56, %c0_115] : memref<64x512xf32, #tpu.memory_space<vmem>>, vector<8x512xf32>
    %c0_116 = arith.constant 0 : index
    %c0_117 = arith.constant 0 : index
    %262 = vector.load %arg2[%c0_116, %c0_117] : memref<128x512xf32, #tpu.memory_space<vmem>>, vector<128x512xf32>
    %cst_118 = arith.constant dense<0.000000e+00> : vector<8x512xf32>
    %263 = tpu.matmul %259, %262, %cst_118 {dimension_numbers = #tpu.dot_dimension_numbers<[1], [0], [0], [1], [0, 0, 1, 1], [], []>} : vector<8x128xf32>, vector<128x512xf32>, vector<8x512xf32> -> vector<8x512xf32>
    %264 = arith.addf %261, %263 : vector<8x512xf32>
    %265 = vector.extract_strided_slice %264 {offsets = [0, 0], sizes = [8, 128], strides = [1, 1]} : vector<8x512xf32> to vector<8x128xf32>
    %cst_119 = arith.constant 5.000000e-01 : f32
    %266 = vector.broadcast %cst_119 : f32 to vector<8x128xf32>
    %267 = arith.mulf %266, %265 : vector<8x128xf32>
    %268 = math.tanh %267 : vector<8x128xf32>
    %cst_120 = arith.constant 5.000000e-01 : f32
    %269 = vector.broadcast %cst_120 : f32 to vector<8x128xf32>
    %270 = arith.mulf %269, %268 : vector<8x128xf32>
    %cst_121 = arith.constant 5.000000e-01 : f32
    %271 = vector.broadcast %cst_121 : f32 to vector<8x128xf32>
    %272 = arith.addf %270, %271 : vector<8x128xf32>
    %273 = vector.extract_strided_slice %264 {offsets = [0, 128], sizes = [8, 128], strides = [1, 1]} : vector<8x512xf32> to vector<8x128xf32>
    %cst_122 = arith.constant 5.000000e-01 : f32
    %274 = vector.broadcast %cst_122 : f32 to vector<8x128xf32>
    %275 = arith.mulf %274, %273 : vector<8x128xf32>
    %276 = math.tanh %275 : vector<8x128xf32>
    %cst_123 = arith.constant 5.000000e-01 : f32
    %277 = vector.broadcast %cst_123 : f32 to vector<8x128xf32>
    %278 = arith.mulf %277, %276 : vector<8x128xf32>
    %cst_124 = arith.constant 5.000000e-01 : f32
    %279 = vector.broadcast %cst_124 : f32 to vector<8x128xf32>
    %280 = arith.addf %278, %279 : vector<8x128xf32>
    %281 = vector.extract_strided_slice %264 {offsets = [0, 256], sizes = [8, 128], strides = [1, 1]} : vector<8x512xf32> to vector<8x128xf32>
    %282 = math.tanh %281 : vector<8x128xf32>
    %283 = vector.extract_strided_slice %264 {offsets = [0, 384], sizes = [8, 128], strides = [1, 1]} : vector<8x512xf32> to vector<8x128xf32>
    %cst_125 = arith.constant 5.000000e-01 : f32
    %284 = vector.broadcast %cst_125 : f32 to vector<8x128xf32>
    %285 = arith.mulf %284, %283 : vector<8x128xf32>
    %286 = math.tanh %285 : vector<8x128xf32>
    %cst_126 = arith.constant 5.000000e-01 : f32
    %287 = vector.broadcast %cst_126 : f32 to vector<8x128xf32>
    %288 = arith.mulf %287, %286 : vector<8x128xf32>
    %cst_127 = arith.constant 5.000000e-01 : f32
    %289 = vector.broadcast %cst_127 : f32 to vector<8x128xf32>
    %290 = arith.addf %288, %289 : vector<8x128xf32>
    %291 = arith.mulf %280, %257 : vector<8x128xf32>
    %292 = arith.mulf %272, %282 : vector<8x128xf32>
    %293 = arith.addf %291, %292 : vector<8x128xf32>
    %294 = math.tanh %293 : vector<8x128xf32>
    %295 = arith.mulf %290, %294 : vector<8x128xf32>
    %c56_128 = arith.constant 56 : index
    %c0_129 = arith.constant 0 : index
    %296 = vector.load %arg10[%c56_128, %c0_129] : memref<64x128xf32, #tpu.memory_space<vmem>>, vector<8x128xf32>
    tpu.vector_store %arg10[%c56_128, %c0_129], %295 {strides = array<i32>} : memref<64x128xf32, #tpu.memory_space<vmem>>, vector<8x128xf32>,
    %c0_130 = arith.constant 0 : index
    %c0_131 = arith.constant 0 : index
    %297 = vector.load %arg10[%c0_130, %c0_131] : memref<64x128xf32, #tpu.memory_space<vmem>>, vector<64x128xf32>
    %c0_132 = arith.constant 0 : index
    %c0_133 = arith.constant 0 : index
    %298 = vector.load %arg4[%c0_132, %c0_133] : memref<128x512xf32, #tpu.memory_space<vmem>>, vector<128x512xf32>
    %cst_134 = arith.constant dense<0.000000e+00> : vector<64x512xf32>
    %299 = tpu.matmul %297, %298, %cst_134 {dimension_numbers = #tpu.dot_dimension_numbers<[1], [0], [0], [1], [0, 0, 1, 1], [], []>} : vector<64x128xf32>, vector<128x512xf32>, vector<64x512xf32> -> vector<64x512xf32>
    %c0_135 = arith.constant 0 : index
    %c0_136 = arith.constant 0 : index
    %300 = vector.load %arg6[%c0_135, %c0_136] : memref<1x512xf32, #tpu.memory_space<vmem>>, vector<1x512xf32>
    %301 = vector.broadcast %300 : vector<1x512xf32> to vector<64x512xf32>
    %302 = arith.addf %299, %301 : vector<64x512xf32>
    %c0_137 = arith.constant 0 : index
    %c0_138 = arith.constant 0 : index
    %303 = vector.load %arg11[%c0_137, %c0_138] : memref<64x512xf32, #tpu.memory_space<vmem>>, vector<64x512xf32>
    tpu.vector_store %arg11[%c0_137, %c0_138], %302 {strides = array<i32>} : memref<64x512xf32, #tpu.memory_space<vmem>>, vector<64x512xf32>,
    %cst_139 = arith.constant 0.000000e+00 : f32
    %304 = vector.broadcast %cst_139 : f32 to vector<8x128xf32>
    %cst_140 = arith.constant 0.000000e+00 : f32
    %305 = vector.broadcast %cst_140 : f32 to vector<8x128xf32>
    %c0_141 = arith.constant 0 : index
    %c0_142 = arith.constant 0 : index
    %306 = vector.load %arg11[%c0_141, %c0_142] : memref<64x512xf32, #tpu.memory_space<vmem>>, vector<8x512xf32>
    %c0_143 = arith.constant 0 : index
    %c0_144 = arith.constant 0 : index
    %307 = vector.load %arg5[%c0_143, %c0_144] : memref<128x512xf32, #tpu.memory_space<vmem>>, vector<128x512xf32>
    %cst_145 = arith.constant dense<0.000000e+00> : vector<8x512xf32>
    %308 = tpu.matmul %304, %307, %cst_145 {dimension_numbers = #tpu.dot_dimension_numbers<[1], [0], [0], [1], [0, 0, 1, 1], [], []>} : vector<8x128xf32>, vector<128x512xf32>, vector<8x512xf32> -> vector<8x512xf32>
    %309 = arith.addf %306, %308 : vector<8x512xf32>
    %310 = vector.extract_strided_slice %309 {offsets = [0, 0], sizes = [8, 128], strides = [1, 1]} : vector<8x512xf32> to vector<8x128xf32>
    %cst_146 = arith.constant 5.000000e-01 : f32
    %311 = vector.broadcast %cst_146 : f32 to vector<8x128xf32>
    %312 = arith.mulf %311, %310 : vector<8x128xf32>
    %313 = math.tanh %312 : vector<8x128xf32>
    %cst_147 = arith.constant 5.000000e-01 : f32
    %314 = vector.broadcast %cst_147 : f32 to vector<8x128xf32>
    %315 = arith.mulf %314, %313 : vector<8x128xf32>
    %cst_148 = arith.constant 5.000000e-01 : f32
    %316 = vector.broadcast %cst_148 : f32 to vector<8x128xf32>
    %317 = arith.addf %315, %316 : vector<8x128xf32>
    %318 = vector.extract_strided_slice %309 {offsets = [0, 128], sizes = [8, 128], strides = [1, 1]} : vector<8x512xf32> to vector<8x128xf32>
    %cst_149 = arith.constant 5.000000e-01 : f32
    %319 = vector.broadcast %cst_149 : f32 to vector<8x128xf32>
    %320 = arith.mulf %319, %318 : vector<8x128xf32>
    %321 = math.tanh %320 : vector<8x128xf32>
    %cst_150 = arith.constant 5.000000e-01 : f32
    %322 = vector.broadcast %cst_150 : f32 to vector<8x128xf32>
    %323 = arith.mulf %322, %321 : vector<8x128xf32>
    %cst_151 = arith.constant 5.000000e-01 : f32
    %324 = vector.broadcast %cst_151 : f32 to vector<8x128xf32>
    %325 = arith.addf %323, %324 : vector<8x128xf32>
    %326 = vector.extract_strided_slice %309 {offsets = [0, 256], sizes = [8, 128], strides = [1, 1]} : vector<8x512xf32> to vector<8x128xf32>
    %327 = math.tanh %326 : vector<8x128xf32>
    %328 = vector.extract_strided_slice %309 {offsets = [0, 384], sizes = [8, 128], strides = [1, 1]} : vector<8x512xf32> to vector<8x128xf32>
    %cst_152 = arith.constant 5.000000e-01 : f32
    %329 = vector.broadcast %cst_152 : f32 to vector<8x128xf32>
    %330 = arith.mulf %329, %328 : vector<8x128xf32>
    %331 = math.tanh %330 : vector<8x128xf32>
    %cst_153 = arith.constant 5.000000e-01 : f32
    %332 = vector.broadcast %cst_153 : f32 to vector<8x128xf32>
    %333 = arith.mulf %332, %331 : vector<8x128xf32>
    %cst_154 = arith.constant 5.000000e-01 : f32
    %334 = vector.broadcast %cst_154 : f32 to vector<8x128xf32>
    %335 = arith.addf %333, %334 : vector<8x128xf32>
    %336 = arith.mulf %325, %305 : vector<8x128xf32>
    %337 = arith.mulf %317, %327 : vector<8x128xf32>
    %338 = arith.addf %336, %337 : vector<8x128xf32>
    %339 = math.tanh %338 : vector<8x128xf32>
    %340 = arith.mulf %335, %339 : vector<8x128xf32>
    %c8_155 = arith.constant 8 : index
    %c0_156 = arith.constant 0 : index
    %341 = vector.load %arg11[%c8_155, %c0_156] : memref<64x512xf32, #tpu.memory_space<vmem>>, vector<8x512xf32>
    %c0_157 = arith.constant 0 : index
    %c0_158 = arith.constant 0 : index
    %342 = vector.load %arg5[%c0_157, %c0_158] : memref<128x512xf32, #tpu.memory_space<vmem>>, vector<128x512xf32>
    %cst_159 = arith.constant dense<0.000000e+00> : vector<8x512xf32>
    %343 = tpu.matmul %340, %342, %cst_159 {dimension_numbers = #tpu.dot_dimension_numbers<[1], [0], [0], [1], [0, 0, 1, 1], [], []>} : vector<8x128xf32>, vector<128x512xf32>, vector<8x512xf32> -> vector<8x512xf32>
    %344 = arith.addf %341, %343 : vector<8x512xf32>
    %345 = vector.extract_strided_slice %344 {offsets = [0, 0], sizes = [8, 128], strides = [1, 1]} : vector<8x512xf32> to vector<8x128xf32>
    %cst_160 = arith.constant 5.000000e-01 : f32
    %346 = vector.broadcast %cst_160 : f32 to vector<8x128xf32>
    %347 = arith.mulf %346, %345 : vector<8x128xf32>
    %348 = math.tanh %347 : vector<8x128xf32>
    %cst_161 = arith.constant 5.000000e-01 : f32
    %349 = vector.broadcast %cst_161 : f32 to vector<8x128xf32>
    %350 = arith.mulf %349, %348 : vector<8x128xf32>
    %cst_162 = arith.constant 5.000000e-01 : f32
    %351 = vector.broadcast %cst_162 : f32 to vector<8x128xf32>
    %352 = arith.addf %350, %351 : vector<8x128xf32>
    %353 = vector.extract_strided_slice %344 {offsets = [0, 128], sizes = [8, 128], strides = [1, 1]} : vector<8x512xf32> to vector<8x128xf32>
    %cst_163 = arith.constant 5.000000e-01 : f32
    %354 = vector.broadcast %cst_163 : f32 to vector<8x128xf32>
    %355 = arith.mulf %354, %353 : vector<8x128xf32>
    %356 = math.tanh %355 : vector<8x128xf32>
    %cst_164 = arith.constant 5.000000e-01 : f32
    %357 = vector.broadcast %cst_164 : f32 to vector<8x128xf32>
    %358 = arith.mulf %357, %356 : vector<8x128xf32>
    %cst_165 = arith.constant 5.000000e-01 : f32
    %359 = vector.broadcast %cst_165 : f32 to vector<8x128xf32>
    %360 = arith.addf %358, %359 : vector<8x128xf32>
    %361 = vector.extract_strided_slice %344 {offsets = [0, 256], sizes = [8, 128], strides = [1, 1]} : vector<8x512xf32> to vector<8x128xf32>
    %362 = math.tanh %361 : vector<8x128xf32>
    %363 = vector.extract_strided_slice %344 {offsets = [0, 384], sizes = [8, 128], strides = [1, 1]} : vector<8x512xf32> to vector<8x128xf32>
    %cst_166 = arith.constant 5.000000e-01 : f32
    %364 = vector.broadcast %cst_166 : f32 to vector<8x128xf32>
    %365 = arith.mulf %364, %363 : vector<8x128xf32>
    %366 = math.tanh %365 : vector<8x128xf32>
    %cst_167 = arith.constant 5.000000e-01 : f32
    %367 = vector.broadcast %cst_167 : f32 to vector<8x128xf32>
    %368 = arith.mulf %367, %366 : vector<8x128xf32>
    %cst_168 = arith.constant 5.000000e-01 : f32
    %369 = vector.broadcast %cst_168 : f32 to vector<8x128xf32>
    %370 = arith.addf %368, %369 : vector<8x128xf32>
    %371 = arith.mulf %360, %338 : vector<8x128xf32>
    %372 = arith.mulf %352, %362 : vector<8x128xf32>
    %373 = arith.addf %371, %372 : vector<8x128xf32>
    %374 = math.tanh %373 : vector<8x128xf32>
    %375 = arith.mulf %370, %374 : vector<8x128xf32>
    %c16_169 = arith.constant 16 : index
    %c0_170 = arith.constant 0 : index
    %376 = vector.load %arg11[%c16_169, %c0_170] : memref<64x512xf32, #tpu.memory_space<vmem>>, vector<8x512xf32>
    %c0_171 = arith.constant 0 : index
    %c0_172 = arith.constant 0 : index
    %377 = vector.load %arg5[%c0_171, %c0_172] : memref<128x512xf32, #tpu.memory_space<vmem>>, vector<128x512xf32>
    %cst_173 = arith.constant dense<0.000000e+00> : vector<8x512xf32>
    %378 = tpu.matmul %375, %377, %cst_173 {dimension_numbers = #tpu.dot_dimension_numbers<[1], [0], [0], [1], [0, 0, 1, 1], [], []>} : vector<8x128xf32>, vector<128x512xf32>, vector<8x512xf32> -> vector<8x512xf32>
    %379 = arith.addf %376, %378 : vector<8x512xf32>
    %380 = vector.extract_strided_slice %379 {offsets = [0, 0], sizes = [8, 128], strides = [1, 1]} : vector<8x512xf32> to vector<8x128xf32>
    %cst_174 = arith.constant 5.000000e-01 : f32
    %381 = vector.broadcast %cst_174 : f32 to vector<8x128xf32>
    %382 = arith.mulf %381, %380 : vector<8x128xf32>
    %383 = math.tanh %382 : vector<8x128xf32>
    %cst_175 = arith.constant 5.000000e-01 : f32
    %384 = vector.broadcast %cst_175 : f32 to vector<8x128xf32>
    %385 = arith.mulf %384, %383 : vector<8x128xf32>
    %cst_176 = arith.constant 5.000000e-01 : f32
    %386 = vector.broadcast %cst_176 : f32 to vector<8x128xf32>
    %387 = arith.addf %385, %386 : vector<8x128xf32>
    %388 = vector.extract_strided_slice %379 {offsets = [0, 128], sizes = [8, 128], strides = [1, 1]} : vector<8x512xf32> to vector<8x128xf32>
    %cst_177 = arith.constant 5.000000e-01 : f32
    %389 = vector.broadcast %cst_177 : f32 to vector<8x128xf32>
    %390 = arith.mulf %389, %388 : vector<8x128xf32>
    %391 = math.tanh %390 : vector<8x128xf32>
    %cst_178 = arith.constant 5.000000e-01 : f32
    %392 = vector.broadcast %cst_178 : f32 to vector<8x128xf32>
    %393 = arith.mulf %392, %391 : vector<8x128xf32>
    %cst_179 = arith.constant 5.000000e-01 : f32
    %394 = vector.broadcast %cst_179 : f32 to vector<8x128xf32>
    %395 = arith.addf %393, %394 : vector<8x128xf32>
    %396 = vector.extract_strided_slice %379 {offsets = [0, 256], sizes = [8, 128], strides = [1, 1]} : vector<8x512xf32> to vector<8x128xf32>
    %397 = math.tanh %396 : vector<8x128xf32>
    %398 = vector.extract_strided_slice %379 {offsets = [0, 384], sizes = [8, 128], strides = [1, 1]} : vector<8x512xf32> to vector<8x128xf32>
    %cst_180 = arith.constant 5.000000e-01 : f32
    %399 = vector.broadcast %cst_180 : f32 to vector<8x128xf32>
    %400 = arith.mulf %399, %398 : vector<8x128xf32>
    %401 = math.tanh %400 : vector<8x128xf32>
    %cst_181 = arith.constant 5.000000e-01 : f32
    %402 = vector.broadcast %cst_181 : f32 to vector<8x128xf32>
    %403 = arith.mulf %402, %401 : vector<8x128xf32>
    %cst_182 = arith.constant 5.000000e-01 : f32
    %404 = vector.broadcast %cst_182 : f32 to vector<8x128xf32>
    %405 = arith.addf %403, %404 : vector<8x128xf32>
    %406 = arith.mulf %395, %373 : vector<8x128xf32>
    %407 = arith.mulf %387, %397 : vector<8x128xf32>
    %408 = arith.addf %406, %407 : vector<8x128xf32>
    %409 = math.tanh %408 : vector<8x128xf32>
    %410 = arith.mulf %405, %409 : vector<8x128xf32>
    %c24_183 = arith.constant 24 : index
    %c0_184 = arith.constant 0 : index
    %411 = vector.load %arg11[%c24_183, %c0_184] : memref<64x512xf32, #tpu.memory_space<vmem>>, vector<8x512xf32>
    %c0_185 = arith.constant 0 : index
    %c0_186 = arith.constant 0 : index
    %412 = vector.load %arg5[%c0_185, %c0_186] : memref<128x512xf32, #tpu.memory_space<vmem>>, vector<128x512xf32>
    %cst_187 = arith.constant dense<0.000000e+00> : vector<8x512xf32>
    %413 = tpu.matmul %410, %412, %cst_187 {dimension_numbers = #tpu.dot_dimension_numbers<[1], [0], [0], [1], [0, 0, 1, 1], [], []>} : vector<8x128xf32>, vector<128x512xf32>, vector<8x512xf32> -> vector<8x512xf32>
    %414 = arith.addf %411, %413 : vector<8x512xf32>
    %415 = vector.extract_strided_slice %414 {offsets = [0, 0], sizes = [8, 128], strides = [1, 1]} : vector<8x512xf32> to vector<8x128xf32>
    %cst_188 = arith.constant 5.000000e-01 : f32
    %416 = vector.broadcast %cst_188 : f32 to vector<8x128xf32>
    %417 = arith.mulf %416, %415 : vector<8x128xf32>
    %418 = math.tanh %417 : vector<8x128xf32>
    %cst_189 = arith.constant 5.000000e-01 : f32
    %419 = vector.broadcast %cst_189 : f32 to vector<8x128xf32>
    %420 = arith.mulf %419, %418 : vector<8x128xf32>
    %cst_190 = arith.constant 5.000000e-01 : f32
    %421 = vector.broadcast %cst_190 : f32 to vector<8x128xf32>
    %422 = arith.addf %420, %421 : vector<8x128xf32>
    %423 = vector.extract_strided_slice %414 {offsets = [0, 128], sizes = [8, 128], strides = [1, 1]} : vector<8x512xf32> to vector<8x128xf32>
    %cst_191 = arith.constant 5.000000e-01 : f32
    %424 = vector.broadcast %cst_191 : f32 to vector<8x128xf32>
    %425 = arith.mulf %424, %423 : vector<8x128xf32>
    %426 = math.tanh %425 : vector<8x128xf32>
    %cst_192 = arith.constant 5.000000e-01 : f32
    %427 = vector.broadcast %cst_192 : f32 to vector<8x128xf32>
    %428 = arith.mulf %427, %426 : vector<8x128xf32>
    %cst_193 = arith.constant 5.000000e-01 : f32
    %429 = vector.broadcast %cst_193 : f32 to vector<8x128xf32>
    %430 = arith.addf %428, %429 : vector<8x128xf32>
    %431 = vector.extract_strided_slice %414 {offsets = [0, 256], sizes = [8, 128], strides = [1, 1]} : vector<8x512xf32> to vector<8x128xf32>
    %432 = math.tanh %431 : vector<8x128xf32>
    %433 = vector.extract_strided_slice %414 {offsets = [0, 384], sizes = [8, 128], strides = [1, 1]} : vector<8x512xf32> to vector<8x128xf32>
    %cst_194 = arith.constant 5.000000e-01 : f32
    %434 = vector.broadcast %cst_194 : f32 to vector<8x128xf32>
    %435 = arith.mulf %434, %433 : vector<8x128xf32>
    %436 = math.tanh %435 : vector<8x128xf32>
    %cst_195 = arith.constant 5.000000e-01 : f32
    %437 = vector.broadcast %cst_195 : f32 to vector<8x128xf32>
    %438 = arith.mulf %437, %436 : vector<8x128xf32>
    %cst_196 = arith.constant 5.000000e-01 : f32
    %439 = vector.broadcast %cst_196 : f32 to vector<8x128xf32>
    %440 = arith.addf %438, %439 : vector<8x128xf32>
    %441 = arith.mulf %430, %408 : vector<8x128xf32>
    %442 = arith.mulf %422, %432 : vector<8x128xf32>
    %443 = arith.addf %441, %442 : vector<8x128xf32>
    %444 = math.tanh %443 : vector<8x128xf32>
    %445 = arith.mulf %440, %444 : vector<8x128xf32>
    %c32_197 = arith.constant 32 : index
    %c0_198 = arith.constant 0 : index
    %446 = vector.load %arg11[%c32_197, %c0_198] : memref<64x512xf32, #tpu.memory_space<vmem>>, vector<8x512xf32>
    %c0_199 = arith.constant 0 : index
    %c0_200 = arith.constant 0 : index
    %447 = vector.load %arg5[%c0_199, %c0_200] : memref<128x512xf32, #tpu.memory_space<vmem>>, vector<128x512xf32>
    %cst_201 = arith.constant dense<0.000000e+00> : vector<8x512xf32>
    %448 = tpu.matmul %445, %447, %cst_201 {dimension_numbers = #tpu.dot_dimension_numbers<[1], [0], [0], [1], [0, 0, 1, 1], [], []>} : vector<8x128xf32>, vector<128x512xf32>, vector<8x512xf32> -> vector<8x512xf32>
    %449 = arith.addf %446, %448 : vector<8x512xf32>
    %450 = vector.extract_strided_slice %449 {offsets = [0, 0], sizes = [8, 128], strides = [1, 1]} : vector<8x512xf32> to vector<8x128xf32>
    %cst_202 = arith.constant 5.000000e-01 : f32
    %451 = vector.broadcast %cst_202 : f32 to vector<8x128xf32>
    %452 = arith.mulf %451, %450 : vector<8x128xf32>
    %453 = math.tanh %452 : vector<8x128xf32>
    %cst_203 = arith.constant 5.000000e-01 : f32
    %454 = vector.broadcast %cst_203 : f32 to vector<8x128xf32>
    %455 = arith.mulf %454, %453 : vector<8x128xf32>
    %cst_204 = arith.constant 5.000000e-01 : f32
    %456 = vector.broadcast %cst_204 : f32 to vector<8x128xf32>
    %457 = arith.addf %455, %456 : vector<8x128xf32>
    %458 = vector.extract_strided_slice %449 {offsets = [0, 128], sizes = [8, 128], strides = [1, 1]} : vector<8x512xf32> to vector<8x128xf32>
    %cst_205 = arith.constant 5.000000e-01 : f32
    %459 = vector.broadcast %cst_205 : f32 to vector<8x128xf32>
    %460 = arith.mulf %459, %458 : vector<8x128xf32>
    %461 = math.tanh %460 : vector<8x128xf32>
    %cst_206 = arith.constant 5.000000e-01 : f32
    %462 = vector.broadcast %cst_206 : f32 to vector<8x128xf32>
    %463 = arith.mulf %462, %461 : vector<8x128xf32>
    %cst_207 = arith.constant 5.000000e-01 : f32
    %464 = vector.broadcast %cst_207 : f32 to vector<8x128xf32>
    %465 = arith.addf %463, %464 : vector<8x128xf32>
    %466 = vector.extract_strided_slice %449 {offsets = [0, 256], sizes = [8, 128], strides = [1, 1]} : vector<8x512xf32> to vector<8x128xf32>
    %467 = math.tanh %466 : vector<8x128xf32>
    %468 = vector.extract_strided_slice %449 {offsets = [0, 384], sizes = [8, 128], strides = [1, 1]} : vector<8x512xf32> to vector<8x128xf32>
    %cst_208 = arith.constant 5.000000e-01 : f32
    %469 = vector.broadcast %cst_208 : f32 to vector<8x128xf32>
    %470 = arith.mulf %469, %468 : vector<8x128xf32>
    %471 = math.tanh %470 : vector<8x128xf32>
    %cst_209 = arith.constant 5.000000e-01 : f32
    %472 = vector.broadcast %cst_209 : f32 to vector<8x128xf32>
    %473 = arith.mulf %472, %471 : vector<8x128xf32>
    %cst_210 = arith.constant 5.000000e-01 : f32
    %474 = vector.broadcast %cst_210 : f32 to vector<8x128xf32>
    %475 = arith.addf %473, %474 : vector<8x128xf32>
    %476 = arith.mulf %465, %443 : vector<8x128xf32>
    %477 = arith.mulf %457, %467 : vector<8x128xf32>
    %478 = arith.addf %476, %477 : vector<8x128xf32>
    %479 = math.tanh %478 : vector<8x128xf32>
    %480 = arith.mulf %475, %479 : vector<8x128xf32>
    %c40_211 = arith.constant 40 : index
    %c0_212 = arith.constant 0 : index
    %481 = vector.load %arg11[%c40_211, %c0_212] : memref<64x512xf32, #tpu.memory_space<vmem>>, vector<8x512xf32>
    %c0_213 = arith.constant 0 : index
    %c0_214 = arith.constant 0 : index
    %482 = vector.load %arg5[%c0_213, %c0_214] : memref<128x512xf32, #tpu.memory_space<vmem>>, vector<128x512xf32>
    %cst_215 = arith.constant dense<0.000000e+00> : vector<8x512xf32>
    %483 = tpu.matmul %480, %482, %cst_215 {dimension_numbers = #tpu.dot_dimension_numbers<[1], [0], [0], [1], [0, 0, 1, 1], [], []>} : vector<8x128xf32>, vector<128x512xf32>, vector<8x512xf32> -> vector<8x512xf32>
    %484 = arith.addf %481, %483 : vector<8x512xf32>
    %485 = vector.extract_strided_slice %484 {offsets = [0, 0], sizes = [8, 128], strides = [1, 1]} : vector<8x512xf32> to vector<8x128xf32>
    %cst_216 = arith.constant 5.000000e-01 : f32
    %486 = vector.broadcast %cst_216 : f32 to vector<8x128xf32>
    %487 = arith.mulf %486, %485 : vector<8x128xf32>
    %488 = math.tanh %487 : vector<8x128xf32>
    %cst_217 = arith.constant 5.000000e-01 : f32
    %489 = vector.broadcast %cst_217 : f32 to vector<8x128xf32>
    %490 = arith.mulf %489, %488 : vector<8x128xf32>
    %cst_218 = arith.constant 5.000000e-01 : f32
    %491 = vector.broadcast %cst_218 : f32 to vector<8x128xf32>
    %492 = arith.addf %490, %491 : vector<8x128xf32>
    %493 = vector.extract_strided_slice %484 {offsets = [0, 128], sizes = [8, 128], strides = [1, 1]} : vector<8x512xf32> to vector<8x128xf32>
    %cst_219 = arith.constant 5.000000e-01 : f32
    %494 = vector.broadcast %cst_219 : f32 to vector<8x128xf32>
    %495 = arith.mulf %494, %493 : vector<8x128xf32>
    %496 = math.tanh %495 : vector<8x128xf32>
    %cst_220 = arith.constant 5.000000e-01 : f32
    %497 = vector.broadcast %cst_220 : f32 to vector<8x128xf32>
    %498 = arith.mulf %497, %496 : vector<8x128xf32>
    %cst_221 = arith.constant 5.000000e-01 : f32
    %499 = vector.broadcast %cst_221 : f32 to vector<8x128xf32>
    %500 = arith.addf %498, %499 : vector<8x128xf32>
    %501 = vector.extract_strided_slice %484 {offsets = [0, 256], sizes = [8, 128], strides = [1, 1]} : vector<8x512xf32> to vector<8x128xf32>
    %502 = math.tanh %501 : vector<8x128xf32>
    %503 = vector.extract_strided_slice %484 {offsets = [0, 384], sizes = [8, 128], strides = [1, 1]} : vector<8x512xf32> to vector<8x128xf32>
    %cst_222 = arith.constant 5.000000e-01 : f32
    %504 = vector.broadcast %cst_222 : f32 to vector<8x128xf32>
    %505 = arith.mulf %504, %503 : vector<8x128xf32>
    %506 = math.tanh %505 : vector<8x128xf32>
    %cst_223 = arith.constant 5.000000e-01 : f32
    %507 = vector.broadcast %cst_223 : f32 to vector<8x128xf32>
    %508 = arith.mulf %507, %506 : vector<8x128xf32>
    %cst_224 = arith.constant 5.000000e-01 : f32
    %509 = vector.broadcast %cst_224 : f32 to vector<8x128xf32>
    %510 = arith.addf %508, %509 : vector<8x128xf32>
    %511 = arith.mulf %500, %478 : vector<8x128xf32>
    %512 = arith.mulf %492, %502 : vector<8x128xf32>
    %513 = arith.addf %511, %512 : vector<8x128xf32>
    %514 = math.tanh %513 : vector<8x128xf32>
    %515 = arith.mulf %510, %514 : vector<8x128xf32>
    %c48_225 = arith.constant 48 : index
    %c0_226 = arith.constant 0 : index
    %516 = vector.load %arg11[%c48_225, %c0_226] : memref<64x512xf32, #tpu.memory_space<vmem>>, vector<8x512xf32>
    %c0_227 = arith.constant 0 : index
    %c0_228 = arith.constant 0 : index
    %517 = vector.load %arg5[%c0_227, %c0_228] : memref<128x512xf32, #tpu.memory_space<vmem>>, vector<128x512xf32>
    %cst_229 = arith.constant dense<0.000000e+00> : vector<8x512xf32>
    %518 = tpu.matmul %515, %517, %cst_229 {dimension_numbers = #tpu.dot_dimension_numbers<[1], [0], [0], [1], [0, 0, 1, 1], [], []>} : vector<8x128xf32>, vector<128x512xf32>, vector<8x512xf32> -> vector<8x512xf32>
    %519 = arith.addf %516, %518 : vector<8x512xf32>
    %520 = vector.extract_strided_slice %519 {offsets = [0, 0], sizes = [8, 128], strides = [1, 1]} : vector<8x512xf32> to vector<8x128xf32>
    %cst_230 = arith.constant 5.000000e-01 : f32
    %521 = vector.broadcast %cst_230 : f32 to vector<8x128xf32>
    %522 = arith.mulf %521, %520 : vector<8x128xf32>
    %523 = math.tanh %522 : vector<8x128xf32>
    %cst_231 = arith.constant 5.000000e-01 : f32
    %524 = vector.broadcast %cst_231 : f32 to vector<8x128xf32>
    %525 = arith.mulf %524, %523 : vector<8x128xf32>
    %cst_232 = arith.constant 5.000000e-01 : f32
    %526 = vector.broadcast %cst_232 : f32 to vector<8x128xf32>
    %527 = arith.addf %525, %526 : vector<8x128xf32>
    %528 = vector.extract_strided_slice %519 {offsets = [0, 128], sizes = [8, 128], strides = [1, 1]} : vector<8x512xf32> to vector<8x128xf32>
    %cst_233 = arith.constant 5.000000e-01 : f32
    %529 = vector.broadcast %cst_233 : f32 to vector<8x128xf32>
    %530 = arith.mulf %529, %528 : vector<8x128xf32>
    %531 = math.tanh %530 : vector<8x128xf32>
    %cst_234 = arith.constant 5.000000e-01 : f32
    %532 = vector.broadcast %cst_234 : f32 to vector<8x128xf32>
    %533 = arith.mulf %532, %531 : vector<8x128xf32>
    %cst_235 = arith.constant 5.000000e-01 : f32
    %534 = vector.broadcast %cst_235 : f32 to vector<8x128xf32>
    %535 = arith.addf %533, %534 : vector<8x128xf32>
    %536 = vector.extract_strided_slice %519 {offsets = [0, 256], sizes = [8, 128], strides = [1, 1]} : vector<8x512xf32> to vector<8x128xf32>
    %537 = math.tanh %536 : vector<8x128xf32>
    %538 = vector.extract_strided_slice %519 {offsets = [0, 384], sizes = [8, 128], strides = [1, 1]} : vector<8x512xf32> to vector<8x128xf32>
    %cst_236 = arith.constant 5.000000e-01 : f32
    %539 = vector.broadcast %cst_236 : f32 to vector<8x128xf32>
    %540 = arith.mulf %539, %538 : vector<8x128xf32>
    %541 = math.tanh %540 : vector<8x128xf32>
    %cst_237 = arith.constant 5.000000e-01 : f32
    %542 = vector.broadcast %cst_237 : f32 to vector<8x128xf32>
    %543 = arith.mulf %542, %541 : vector<8x128xf32>
    %cst_238 = arith.constant 5.000000e-01 : f32
    %544 = vector.broadcast %cst_238 : f32 to vector<8x128xf32>
    %545 = arith.addf %543, %544 : vector<8x128xf32>
    %546 = arith.mulf %535, %513 : vector<8x128xf32>
    %547 = arith.mulf %527, %537 : vector<8x128xf32>
    %548 = arith.addf %546, %547 : vector<8x128xf32>
    %549 = math.tanh %548 : vector<8x128xf32>
    %550 = arith.mulf %545, %549 : vector<8x128xf32>
    %c56_239 = arith.constant 56 : index
    %c0_240 = arith.constant 0 : index
    %551 = vector.load %arg11[%c56_239, %c0_240] : memref<64x512xf32, #tpu.memory_space<vmem>>, vector<8x512xf32>
    %c0_241 = arith.constant 0 : index
    %c0_242 = arith.constant 0 : index
    %552 = vector.load %arg5[%c0_241, %c0_242] : memref<128x512xf32, #tpu.memory_space<vmem>>, vector<128x512xf32>
    %cst_243 = arith.constant dense<0.000000e+00> : vector<8x512xf32>
    %553 = tpu.matmul %550, %552, %cst_243 {dimension_numbers = #tpu.dot_dimension_numbers<[1], [0], [0], [1], [0, 0, 1, 1], [], []>} : vector<8x128xf32>, vector<128x512xf32>, vector<8x512xf32> -> vector<8x512xf32>
    %554 = arith.addf %551, %553 : vector<8x512xf32>
    %555 = vector.extract_strided_slice %554 {offsets = [0, 0], sizes = [8, 128], strides = [1, 1]} : vector<8x512xf32> to vector<8x128xf32>
    %cst_244 = arith.constant 5.000000e-01 : f32
    %556 = vector.broadcast %cst_244 : f32 to vector<8x128xf32>
    %557 = arith.mulf %556, %555 : vector<8x128xf32>
    %558 = math.tanh %557 : vector<8x128xf32>
    %cst_245 = arith.constant 5.000000e-01 : f32
    %559 = vector.broadcast %cst_245 : f32 to vector<8x128xf32>
    %560 = arith.mulf %559, %558 : vector<8x128xf32>
    %cst_246 = arith.constant 5.000000e-01 : f32
    %561 = vector.broadcast %cst_246 : f32 to vector<8x128xf32>
    %562 = arith.addf %560, %561 : vector<8x128xf32>
    %563 = vector.extract_strided_slice %554 {offsets = [0, 128], sizes = [8, 128], strides = [1, 1]} : vector<8x512xf32> to vector<8x128xf32>
    %cst_247 = arith.constant 5.000000e-01 : f32
    %564 = vector.broadcast %cst_247 : f32 to vector<8x128xf32>
    %565 = arith.mulf %564, %563 : vector<8x128xf32>
    %566 = math.tanh %565 : vector<8x128xf32>
    %cst_248 = arith.constant 5.000000e-01 : f32
    %567 = vector.broadcast %cst_248 : f32 to vector<8x128xf32>
    %568 = arith.mulf %567, %566 : vector<8x128xf32>
    %cst_249 = arith.constant 5.000000e-01 : f32
    %569 = vector.broadcast %cst_249 : f32 to vector<8x128xf32>
    %570 = arith.addf %568, %569 : vector<8x128xf32>
    %571 = vector.extract_strided_slice %554 {offsets = [0, 256], sizes = [8, 128], strides = [1, 1]} : vector<8x512xf32> to vector<8x128xf32>
    %572 = math.tanh %571 : vector<8x128xf32>
    %573 = vector.extract_strided_slice %554 {offsets = [0, 384], sizes = [8, 128], strides = [1, 1]} : vector<8x512xf32> to vector<8x128xf32>
    %cst_250 = arith.constant 5.000000e-01 : f32
    %574 = vector.broadcast %cst_250 : f32 to vector<8x128xf32>
    %575 = arith.mulf %574, %573 : vector<8x128xf32>
    %576 = math.tanh %575 : vector<8x128xf32>
    %cst_251 = arith.constant 5.000000e-01 : f32
    %577 = vector.broadcast %cst_251 : f32 to vector<8x128xf32>
    %578 = arith.mulf %577, %576 : vector<8x128xf32>
    %cst_252 = arith.constant 5.000000e-01 : f32
    %579 = vector.broadcast %cst_252 : f32 to vector<8x128xf32>
    %580 = arith.addf %578, %579 : vector<8x128xf32>
    %581 = arith.mulf %570, %548 : vector<8x128xf32>
    %582 = arith.mulf %562, %572 : vector<8x128xf32>
    %583 = arith.addf %581, %582 : vector<8x128xf32>
    %584 = math.tanh %583 : vector<8x128xf32>
    %585 = arith.mulf %580, %584 : vector<8x128xf32>
    %c0_253 = arith.constant 0 : index
    %c0_254 = arith.constant 0 : index
    %586 = vector.load %arg7[%c0_253, %c0_254] : memref<128x10xf32, #tpu.memory_space<vmem>>, vector<128x10xf32>
    %cst_255 = arith.constant dense<0.000000e+00> : vector<8x10xf32>
    %587 = tpu.matmul %585, %586, %cst_255 {dimension_numbers = #tpu.dot_dimension_numbers<[1], [0], [0], [1], [0, 0, 1, 1], [], []>} : vector<8x128xf32>, vector<128x10xf32>, vector<8x10xf32> -> vector<8x10xf32>
    %c0_256 = arith.constant 0 : index
    %c0_257 = arith.constant 0 : index
    %588 = vector.load %arg8[%c0_256, %c0_257] : memref<1x10xf32, #tpu.memory_space<vmem>>, vector<1x10xf32>
    %589 = vector.broadcast %588 : vector<1x10xf32> to vector<8x10xf32>
    %590 = arith.addf %587, %589 : vector<8x10xf32>
    %c0_258 = arith.constant 0 : index
    %c0_259 = arith.constant 0 : index
    %591 = vector.load %arg9[%c0_258, %c0_259] : memref<8x10xf32, #tpu.memory_space<vmem>>, vector<8x10xf32>
    tpu.vector_store %arg9[%c0_258, %c0_259], %590 {strides = array<i32>} : memref<8x10xf32, #tpu.memory_space<vmem>>, vector<8x10xf32>,
    return
  }
}

</mosaic_0001>

<bundles_post_ra>
// kernel: lstm_behind_forward.1
= control target key start
LH: loop header
LB: loop body
LE: loop exit
PB: predicated region body
PF: predicated region fallthrough
CT: control target
= control target key end

     0   :  { %14 = vsyncpa [#allocation5], 0  ;;  %s7039_s0 = inlined_call_operand.vmem [shape: f32[64,64], index: 0, kind: input, shape index: {}]   ;;  %s7040_s1 = inlined_call_operand.vmem [shape: f32[64,512], index: 1, kind: input, shape index: {}]   ;;  %s7041_s2 = inlined_call_operand.hbm [shape: f32[128,512], index: 2, kind: input, shape index: {}]   ;;  %s7042_s3 = inlined_call_operand.vmem [shape: f32[1,512], index: 3, kind: input, shape index: {}]   ;;  %s7043_s4 = inlined_call_operand.hbm [shape: f32[128,512], index: 4, kind: input, shape index: {}]   ;;  %s7044_s5 = inlined_call_operand.hbm [shape: f32[128,512], index: 5, kind: input, shape index: {}]   ;;  %s7045_s6 = inlined_call_operand.vmem [shape: f32[1,512], index: 6, kind: input, shape index: {}]   ;;  %s7046_s7 = inlined_call_operand.vmem [shape: f32[128,10], index: 7, kind: input, shape index: {}]   ;;  %s7047_s8 = inlined_call_operand.vmem [shape: f32[1,10], index: 8, kind: input, shape index: {}]   ;;  %s7048_s9 = inlined_call_operand.hbm [shape: f32[8,10], index: 9, kind: output, shape index: {}]  }
   0x1   :  { %15 = vsyncpa [#allocation8], 0 }
   0x2   :  { %16 = vsyncpa [#allocation6], 0  ;;  %s5758_s30 = smov [#allocation7]   ;;  %s5759_s11 = smov [#allocation4]  }
   0x3   :  { %s40_s10 = sshll.u32 %s5758_s30, 4  ;;  %s26_s12 = sshll.u32 %s5759_s11, 4  ;;  %s41_s10 = int_to_ptr.vmem [resolvable:$true] %s40_s10  ;;  %s5817_s12 = int_to_ptr.vmem [resolvable:$true] %s26_s12 }
   0x4   :  { %s5664_s15 = scalar_lea.hbm %s7043_s4, 8192 }
   0x5   :  { %p5665_p0 = scmp.ne.s32.totalorder %s7043_s4, %s5664_s15  ;;  %p5668_p1 = scmp.lt.u32.totalorder %s5664_s15, %s7043_s4 }
   0x7   :  { %p5670_p2 = pnand %p5668_p1, %p5665_p0 }
   0x9   :  { %5673 = shalt.err (!%p5670_p2)
}
   0xa   :  { %s5674_s20 = scalar_lea.vmem %s41_s10, 8192  ;;  %p5679_p4 = scmp.lt.s32.totalorder %s41_s10, %s41_s10 }
   0xb   :  { %p5675_p3 = scmp.ne.s32.totalorder %s41_s10, %s5674_s20  ;;  %p5680_p5 = scmp.lt.s32.totalorder %s5674_s20, %s5674_s20 }
   0xd   :  { %p5681_p6 = por %p5680_p5, %p5679_p4 }
   0xf   :  { %p5682_p7 = pnand %p5681_p6, %p5675_p3 }
  0x11   :  { %5685 = shalt.err (!%p5682_p7)
}
  0x12   :  { %s5760_s21 = smov 512   ;;  %s5761_s22 = smov 32  }
  0x13   :  { %46 = dma.hbm_to_vmem [thread:$0]  %s7043_s4, 8192, %s41_s10, [#allocation8], %s5760_s21, %s5760_s21, %s5761_s22  }
  0x14   :  { %s5686_s27 = scalar_lea.hbm %s7041_s2, 8192 }
  0x15   :  { %p5687_p8 = scmp.ne.s32.totalorder %s7041_s2, %s5686_s27  ;;  %p5690_p9 = scmp.lt.u32.totalorder %s5686_s27, %s7041_s2 }
  0x17   :  { %p5692_p10 = pnand %p5690_p9, %p5687_p8 }
  0x19   :  { %5695 = shalt.err (!%p5692_p10)
}
  0x1a   :  { %s5696_s13 = scalar_lea.vmem %s5817_s12, 8192  ;;  %p5701_p12 = scmp.lt.s32.totalorder %s5817_s12, %s5817_s12 }
  0x1b   :  { %p5697_p11 = scmp.ne.s32.totalorder %s5817_s12, %s5696_s13  ;;  %p5702_p13 = scmp.lt.s32.totalorder %s5696_s13, %s5696_s13 }
  0x1d   :  { %p5703_p0 = por %p5702_p13, %p5701_p12 }
  0x1f   :  { %p5704_p1 = pnand %p5703_p0, %p5697_p11 }
  0x21   :  { %5707 = shalt.err (!%p5704_p1)
}
  0x22   :  { %32 = dma.hbm_to_vmem [thread:$0]  %s7041_s2, 8192, %s5817_s12, [#allocation5], %s5760_s21, %s5760_s21, %s5761_s22  }
  0x23   :  { %s5762_s14 = smov [#allocation9]   ;;  %s5708_s18 = scalar_lea.hbm %s7044_s5, 8192 }
  0x24   :  { %s52_s15 = sshll.u32 %s5762_s14, 4  ;;  %p5709_p2 = scmp.ne.s32.totalorder %s7044_s5, %s5708_s18  ;;  %s53_s15 = int_to_ptr.vmem [resolvable:$true] %s52_s15 }
  0x25   :  { %p5712_p3 = scmp.lt.u32.totalorder %s5708_s18, %s7044_s5 }
  0x27   :  { %p5714_p4 = pnand %p5712_p3, %p5709_p2 }
  0x29   :  { %5717 = shalt.err (!%p5714_p4)
}
  0x2a   :  { %s5718_s25 = scalar_lea.vmem %s53_s15, 8192  ;;  %p5723_p6 = scmp.lt.s32.totalorder %s53_s15, %s53_s15 }
  0x2b   :  { %p5719_p5 = scmp.ne.s32.totalorder %s53_s15, %s5718_s25  ;;  %p5724_p7 = scmp.lt.s32.totalorder %s5718_s25, %s5718_s25 }
  0x2d   :  { %p5725_p8 = por %p5724_p7, %p5723_p6 }
  0x2f   :  { %p5726_p9 = pnand %p5725_p8, %p5719_p5 }
  0x31   :  { %5729 = shalt.err (!%p5726_p9)
}
  0x32   :  { %58 = dma.hbm_to_vmem [thread:$0]  %s7044_s5, 8192, %s53_s15, [#allocation8], %s5760_s21, %s5760_s21, %s5761_s22  }
  0x33   :  { %5752 = dma.done.wait [#allocation5], 8192  }
  0x34   :  { %5753 = vsyncadd [#allocation5], 4294959104 }
  0x35   :  { %5754 = dma.done.wait [#allocation8], 16384  }
  0x36   :  { %5755 = vsyncadd [#allocation8], 4294950912  ;;  %v5763_v0 = vmov 0.0   ;;  %v83_v1 = vld [vmem:[%s7040_s1 + $0x8] sm:$0xff]  ;;  %v85_v3 = vld [vmem:[%s7040_s1 + $0x18] sm:$0xff]  ;;  %vm136_vm0 = vcmask 523264  }
  0x37   :  { %225 = vmatprep.mubr.f32.mxu0 %v5763_v0  ;;  %338 = vmatprep.mubr.f32.mxu1 %v5763_v0  ;;  %v87_v2 = vld [vmem:[%s7040_s1 + $0x28] sm:$0xff]  ;;  %v89_v5 = vld [vmem:[%s7040_s1 + $0x38] sm:$0xff]  ;;  %v82_v6 = vld [vmem:[%s7040_s1] sm:$0xff]  ;;  %vm5765_vm1 = vmmov 0   ;;  %s5766_s15 = smov [#allocation10]   ;;  %vm4136_vm2 = vcmask 80896  }
  0x38   :  { %v4223_v4 = vpack.c.bf16 %v87_v2, %v83_v1  ;;  %v86_v7 = vld [vmem:[%s7040_s1 + $0x20] sm:$0xff]  ;;  %v4239_v8 = vpack.c.bf16 %v89_v5, %v85_v3  ;;  %v84_v10 = vld [vmem:[%s7040_s1 + $0x10] sm:$0xff]  ;;  %v91_v12 = vld [vmem:[%s7040_s1 + $0x48] sm:$0xff]  ;;  %s4144_s16 = sshll.u32 %s5766_s15, 4  ;;  %s4145_s16 = int_to_ptr.vmem [resolvable:$true] %s4144_s16 }
  0x39   :  { %v4225_v9 = vpack.c.bf16 %v86_v7, %v82_v6  ;;  %v88_v11 = vld [vmem:[%s7040_s1 + $0x30] sm:$0xff]  ;;  %v95_v14 = vld [vmem:[%s7040_s1 + $0x68] sm:$0xff]  ;;  %v93_v15 = vld [vmem:[%s7040_s1 + $0x58] sm:$0xff]  ;;  %s5730_s17 = scalar_lea.vmem %s4145_s16, 128  ;;  %p5735_p11 = scmp.lt.s32.totalorder %s4145_s16, %s4145_s16 }
  0x3a   :  { %4224 = vmatprep.subr.bf16.mxu0 %v4223_v4  ;;  %v4241_v13 = vpack.c.bf16 %v88_v11, %v84_v10  ;;  %v97_v16 = vld [vmem:[%s7040_s1 + $0x78] sm:$0xff]  ;;  %4240 = vmatprep.subr.bf16.mxu1 %v4239_v8  ;;  %v4227_v17 = vpack.c.bf16 %v95_v14, %v91_v12  ;;  %v90_v19 = vld [vmem:[%s7040_s1 + $0x40] sm:$0xff]  ;;  %v92_v21 = vld [vmem:[%s7040_s1 + $0x50] sm:$0xff]  ;;  %p5731_p10 = scmp.ne.s32.totalorder %s4145_s16, %s5730_s17  ;;  %p5736_p12 = scmp.lt.s32.totalorder %s5730_s17, %s5730_s17 }
  0x3b   :  { %4226 = vmatpush1.bf16.msra.mxu0 %v4225_v9  ;;  %v4243_v18 = vpack.c.bf16 %v97_v16, %v93_v15  ;;  %v94_v20 = vld [vmem:[%s7040_s1 + $0x60] sm:$0xff]  ;;  %v96_v23 = vld [vmem:[%s7040_s1 + $0x70] sm:$0xff]  ;;  %v99_v24 = vld [vmem:[%s7040_s1 + $0x88] sm:$0xff] }
  0x3c   :  { %4242 = vmatpush1.bf16.msra.mxu1 %v4241_v13  ;;  %v4229_v22 = vpack.c.bf16 %v94_v20, %v90_v19  ;;  %v103_v25 = vld [vmem:[%s7040_s1 + $0xa8] sm:$0xff]  ;;  %4228 = vmatprep.subr.bf16.mxu0 %v4227_v17  ;;  %v4245_v26 = vpack.c.bf16 %v96_v23, %v92_v21  ;;  %v101_v28 = vld [vmem:[%s7040_s1 + $0x98] sm:$0xff]  ;;  %v98_v30 = vld [vmem:[%s7040_s1 + $0x80] sm:$0xff]  ;;  %p5737_p13 = por %p5736_p12, %p5735_p11 }
  0x3d   :  { %4244 = vmatprep.subr.bf16.mxu1 %v4243_v18  ;;  %v4231_v27 = vpack.c.bf16 %v103_v25, %v99_v24  ;;  %v105_v29 = vld [vmem:[%s7040_s1 + $0xb8] sm:$0xff]  ;;  %v102_v32 = vld [vmem:[%s7040_s1 + $0xa0] sm:$0xff]  ;;  %v100_v33 = vld [vmem:[%s7040_s1 + $0x90] sm:$0xff] }
  0x3e   :  { %v4247_v31 = vpack.c.bf16 %v105_v29, %v101_v28  ;;  %v104_v34 = vld [vmem:[%s7040_s1 + $0xb0] sm:$0xff]  ;;  %v4233_v35 = vpack.c.bf16 %v102_v32, %v98_v30  ;;  %v107_v36 = vld [vmem:[%s7040_s1 + $0xc8] sm:$0xff]  ;;  %v109_v38 = vld [vmem:[%s7040_s1 + $0xd8] sm:$0xff]  ;;  %p5738_p0 = pnand %p5737_p13, %p5731_p10 }
  0x3f   :  { %4230 = vmatpush1.bf16.msra.mxu0 %v4229_v22  ;;  %v111_v37 = vld [vmem:[%s7040_s1 + $0xe8] sm:$0xff]  ;;  %v4249_v39 = vpack.c.bf16 %v104_v34, %v100_v33  ;;  %v113_v41 = vld [vmem:[%s7040_s1 + $0xf8] sm:$0xff]  ;;  %v106_v42 = vld [vmem:[%s7040_s1 + $0xc0] sm:$0xff] }
  0x40   :  { %4246 = vmatpush1.bf16.msra.mxu1 %v4245_v26  ;;  %4232 = vmatprep.subr.bf16.mxu0 %v4231_v27  ;;  %v4235_v40 = vpack.c.bf16 %v111_v37, %v107_v36  ;;  %v110_v43 = vld [vmem:[%s7040_s1 + $0xe0] sm:$0xff]  ;;  %v4251_v44 = vpack.c.bf16 %v113_v41, %v109_v38  ;;  %v108_v45 = vld [vmem:[%s7040_s1 + $0xd0] sm:$0xff]  ;;  %v424_v47 = vld [vmem:[#allocation4 + $0x8] sm:$0xff] }
  0x41   :  { %4248 = vmatprep.subr.bf16.mxu1 %v4247_v31  ;;  %v112_v46 = vld [vmem:[%s7040_s1 + $0xf0] sm:$0xff]  ;;  %v428_v48 = vld [vmem:[#allocation4 + $0x28] sm:$0xff]  ;;  %v426_v49 = vld [vmem:[#allocation4 + $0x18] sm:$0xff]  ;;  %v4237_v50 = vpack.c.bf16 %v110_v43, %v106_v42 }
  0x42   :  { %v430_v51 = vld [vmem:[#allocation4 + $0x38] sm:$0xff]  ;;  %v4253_v52 = vpack.c.bf16 %v112_v46, %v108_v45  ;;  %v5967_v53 = vpack.c.bf16 %v428_v48, %v424_v47  ;;  %v423_v54 = vld [vmem:[#allocation4] sm:$0xff]  ;;  %v425_v57 = vld [vmem:[#allocation4 + $0x10] sm:$0xff] }
  0x43   :  { %4234 = vmatpush1.bf16.msra.mxu0 %v4233_v35  ;;  %v427_v55 = vld [vmem:[#allocation4 + $0x20] sm:$0xff]  ;;  %v5969_v56 = vpack.c.bf16 %v430_v51, %v426_v49  ;;  %v429_v58 = vld [vmem:[#allocation4 + $0x30] sm:$0xff]  ;;  %v432_v59 = vld [vmem:[#allocation4 + $0x48] sm:$0xff] }
  0x44   :  { %4250 = vmatpush1.bf16.msra.mxu1 %v4249_v39  ;;  %4236 = vmatprep.subr.bf16.mxu0 %v4235_v40  ;;  %v436_v60 = vld [vmem:[#allocation4 + $0x68] sm:$0xff]  ;;  %v74_v61 = vld [vmem:[%s7039_s0] sm:$0xff]  ;;  %v5974_v62 = vpack.c.bf16 %v427_v55, %v423_v54  ;;  %v434_v63 = vld [vmem:[#allocation4 + $0x58] sm:$0xff]  ;;  %v5977_v2 = vpack.c.bf16 %v429_v58, %v425_v57 }
  0x45   :  { %4252 = vmatprep.subr.bf16.mxu1 %v4251_v44  ;;  %v438_v1 = vld [vmem:[#allocation4 + $0x78] sm:$0xff]  ;;  %v431_v3 = vld [vmem:[#allocation4 + $0x40] sm:$0xff]  ;;  %v5980_v5 = vpack.c.bf16 %v436_v60, %v432_v59  ;;  %v433_v6 = vld [vmem:[#allocation4 + $0x50] sm:$0xff] }
  0x46   :  { %v435_v4 = vld [vmem:[#allocation4 + $0x60] sm:$0xff]  ;;  %v437_v7 = vld [vmem:[#allocation4 + $0x70] sm:$0xff]  ;;  %v5983_v8 = vpack.c.bf16 %v438_v1, %v434_v63  ;;  %v440_v9 = vld [vmem:[#allocation4 + $0x88] sm:$0xff] }
  0x47   :  { %4238 = vmatpush1.bf16.msra.mxu0 %v4237_v50  ;;  %v444_v10 = vld [vmem:[#allocation4 + $0xa8] sm:$0xff]  ;;  %v5990_v12 = vpack.c.bf16 %v435_v4, %v431_v3  ;;  %v442_v13 = vld [vmem:[#allocation4 + $0x98] sm:$0xff]  ;;  %v5994_v15 = vpack.c.bf16 %v437_v7, %v433_v6  ;;  %v439_v16 = vld [vmem:[#allocation4 + $0x80] sm:$0xff] }
  0x48   :  { %4254 = vmatpush1.bf16.msra.mxu1 %v4253_v52  ;;  %4256 = vmatprep.subr.bf16.mxu0 %v5967_v53  ;;  %v75_v11 = vld [vmem:[%s7039_s0 + $0x8] sm:$0xff]  ;;  %v446_v14 = vld [vmem:[#allocation4 + $0xb8] sm:$0xff]  ;;  %v443_v17 = vld [vmem:[#allocation4 + $0xa0] sm:$0xff]  ;;  %v5998_v18 = vpack.c.bf16 %v444_v10, %v440_v9 }
  0x49   :  { %4288 = vmatprep.subr.bf16.mxu1 %v5969_v56  ;;  %v441_v19 = vld [vmem:[#allocation4 + $0x90] sm:$0xff]  ;;  %v6002_v21 = vpack.c.bf16 %v446_v14, %v442_v13  ;;  %v448_v22 = vld [vmem:[#allocation4 + $0xc8] sm:$0xff]  ;;  %v6009_v25 = vpack.c.bf16 %v443_v17, %v439_v16  ;;  %v450_v26 = vld [vmem:[#allocation4 + $0xd8] sm:$0xff] }
  0x4a   :  { %4154 = vmatmul.mubr.msk.f32.vlgmr.msra.gmra.mrb[0].mxu0 %vm136_vm0, %v74_v61  ;;  %v445_v20 = vld [vmem:[#allocation4 + $0xb0] sm:$0xff]  ;;  %v452_v23 = vld [vmem:[#allocation4 + $0xe8] sm:$0xff]  ;;  %v454_v27 = vld [vmem:[#allocation4 + $0xf8] sm:$0xff] }
  0x4b   :  { %4162 = vmatmul.mubr.msk.f32.vlgmr.msra.gmra.mrb[0].mxu1 %vm136_vm0, %v74_v61  ;;  %4258 = vmatpush1.bf16.msra.mxu0 %v5974_v62  ;;  %v76_v24 = vld [vmem:[%s7039_s0 + $0x10] sm:$0xff]  ;;  %v6013_v28 = vpack.c.bf16 %v445_v20, %v441_v19  ;;  %v447_v29 = vld [vmem:[#allocation4 + $0xc0] sm:$0xff]  ;;  %v6017_v31 = vpack.c.bf16 %v452_v23, %v448_v22  ;;  %v6021_v34 = vpack.c.bf16 %v454_v27, %v450_v26  ;;  %v456_v35 = vld [vmem:[#allocation4 + $0x108] sm:$0xff] }
  0x4c   :  { %4290 = vmatpush1.bf16.msra.mxu1 %v5977_v2  ;;  %231 = vmatprep.mubr.f32.mxu0 %v5763_v0  ;;  %v451_v30 = vld [vmem:[#allocation4 + $0xe0] sm:$0xff]  ;;  %v449_v32 = vld [vmem:[#allocation4 + $0xd0] sm:$0xff]  ;;  %v460_v36 = vld [vmem:[#allocation4 + $0x128] sm:$0xff] }
  0x4d   :  { %344 = vmatprep.mubr.f32.mxu1 %v5763_v0  ;;  %4260 = vmatprep.subr.bf16.mxu0 %v5980_v5  ;;  %v453_v33 = vld [vmem:[#allocation4 + $0xf0] sm:$0xff]  ;;  %v77_v37 = vld [vmem:[%s7039_s0 + $0x18] sm:$0xff]  ;;  %v6028_v38 = vpack.c.bf16 %v451_v30, %v447_v29  ;;  %v455_v42 = vld [vmem:[#allocation4 + $0x100] sm:$0xff]  ;;  %v6036_v44 = vpack.c.bf16 %v460_v36, %v456_v35 }
  0x4e   :  { %4155 = vmatmul.mubr.msk.f32.gmra.mrb[2].mxu0 %vm136_vm0, %v75_v11  ;;  %4292 = vmatprep.subr.bf16.mxu1 %v5983_v8  ;;  %v458_v39 = vld [vmem:[#allocation4 + $0x118] sm:$0xff]  ;;  %v6032_v41 = vpack.c.bf16 %v453_v33, %v449_v32  ;;  %v459_v43 = vld [vmem:[#allocation4 + $0x120] sm:$0xff]  ;;  %v457_v45 = vld [vmem:[#allocation4 + $0x110] sm:$0xff] }
  0x4f   :  { %4163 = vmatmul.mubr.msk.f32.gmra.mrb[2].mxu1 %vm136_vm0, %v75_v11  ;;  %4262 = vmatpush1.bf16.msra.mxu0 %v5990_v12  ;;  %v462_v40 = vld [vmem:[#allocation4 + $0x138] sm:$0xff]  ;;  %v461_v46 = vld [vmem:[#allocation4 + $0x130] sm:$0xff]  ;;  %v464_v48 = vld [vmem:[#allocation4 + $0x148] sm:$0xff]  ;;  %v6047_v51 = vpack.c.bf16 %v459_v43, %v455_v42  ;;  %v116_v43 = vlaneseq }
  0x50   :  { %4294 = vmatpush1.bf16.msra.mxu1 %v5994_v15  ;;  %237 = vmatprep.mubr.f32.mxu0 %v5763_v0  ;;  %v6040_v47 = vpack.c.bf16 %v462_v40, %v458_v39  ;;  %v468_v49 = vld [vmem:[#allocation4 + $0x168] sm:$0xff]  ;;  %v78_v50 = vld [vmem:[%s7039_s0 + $0x20] sm:$0xff]  ;;  %v466_v52 = vld [vmem:[#allocation4 + $0x158] sm:$0xff]  ;;  %v6051_v55 = vpack.c.bf16 %v461_v46, %v457_v45 }
  0x51   :  { %350 = vmatprep.mubr.f32.mxu1 %v5763_v0  ;;  %4264 = vmatprep.subr.bf16.mxu0 %v5998_v18  ;;  %v470_v54 = vld [vmem:[#allocation4 + $0x178] sm:$0xff]  ;;  %v463_v57 = vld [vmem:[#allocation4 + $0x140] sm:$0xff]  ;;  %v6055_v59 = vpack.c.bf16 %v468_v49, %v464_v48  ;;  %v465_v60 = vld [vmem:[#allocation4 + $0x150] sm:$0xff]  ;;  %v6157_v45 = vshrl.u32 %v116_v43, 7 }
  0x52   :  { %4156 = vmatmul.mubr.msk.f32.gmra.mrb[4].mxu0 %vm136_vm0, %v76_v24  ;;  %4296 = vmatprep.subr.bf16.mxu1 %v6002_v21  ;;  %v467_v58 = vld [vmem:[#allocation4 + $0x160] sm:$0xff]  ;;  %v469_v61 = vld [vmem:[#allocation4 + $0x170] sm:$0xff]  ;;  %v6059_v63 = vpack.c.bf16 %v470_v54, %v466_v52  ;;  %v472_v1 = vld [vmem:[#allocation4 + $0x188] sm:$0xff] }
  0x53   :  { %4164 = vmatmul.mubr.msk.f32.gmra.mrb[4].mxu1 %vm136_vm0, %v76_v24  ;;  %4266 = vmatpush1.bf16.msra.mxu0 %v6009_v25  ;;  %v476_v3 = vld [vmem:[#allocation4 + $0x1a8] sm:$0xff]  ;;  %v6066_v6 = vpack.c.bf16 %v467_v58, %v463_v57  ;;  %v474_v7 = vld [vmem:[#allocation4 + $0x198] sm:$0xff]  ;;  %v6070_v10 = vpack.c.bf16 %v469_v61, %v465_v60  ;;  %v471_v11 = vld [vmem:[#allocation4 + $0x180] sm:$0xff]  ;;  %v118_v46 = vsub.s32 0, %v6157_v45  ;;  %v122_v49 = vsub.s32 1, %v6157_v45 }
  0x54   :  { %4298 = vmatpush1.bf16.msra.mxu1 %v6013_v28  ;;  %243 = vmatprep.mubr.f32.mxu0 %v5763_v0  ;;  %v79_v4 = vld [vmem:[%s7039_s0 + $0x28] sm:$0xff]  ;;  %v478_v9 = vld [vmem:[#allocation4 + $0x1b8] sm:$0xff]  ;;  %v475_v13 = vld [vmem:[#allocation4 + $0x1a0] sm:$0xff]  ;;  %v6074_v14 = vpack.c.bf16 %v476_v3, %v472_v1  ;;  %v126_v52 = vsub.s32 2, %v6157_v45  ;;  %v130_v61 = vsub.s32 3, %v6157_v45 }
  0x55   :  { %356 = vmatprep.mubr.f32.mxu1 %v5763_v0  ;;  %4268 = vmatprep.subr.bf16.mxu0 %v6017_v31  ;;  %v473_v16 = vld [vmem:[#allocation4 + $0x190] sm:$0xff]  ;;  %v6078_v19 = vpack.c.bf16 %v478_v9, %v474_v7  ;;  %v480_v20 = vld [vmem:[#allocation4 + $0x1c8] sm:$0xff]  ;;  %v6085_v24 = vpack.c.bf16 %v475_v13, %v471_v11  ;;  %v482_v26 = vld [vmem:[#allocation4 + $0x1d8] sm:$0xff] }
  0x56   :  { %4157 = vmatmul.mubr.msk.f32.gmra.mrb[6].mxu0 %vm136_vm0, %v77_v37  ;;  %4300 = vmatprep.subr.bf16.mxu1 %v6021_v34  ;;  %v477_v17 = vld [vmem:[#allocation4 + $0x1b0] sm:$0xff]  ;;  %v484_v22 = vld [vmem:[#allocation4 + $0x1e8] sm:$0xff]  ;;  %v486_v27 = vld [vmem:[#allocation4 + $0x1f8] sm:$0xff] }
  0x57   :  { %4165 = vmatmul.mubr.msk.f32.gmra.mrb[6].mxu1 %vm136_vm0, %v77_v37  ;;  %4270 = vmatpush1.bf16.msra.mxu0 %v6028_v38  ;;  %v80_v23 = vld [vmem:[%s7039_s0 + $0x30] sm:$0xff]  ;;  %v6089_v29 = vpack.c.bf16 %v477_v17, %v473_v16  ;;  %v479_v30 = vld [vmem:[#allocation4 + $0x1c0] sm:$0xff]  ;;  %v6093_v33 = vpack.c.bf16 %v484_v22, %v480_v20  ;;  %v6097_v37 = vpack.c.bf16 %v486_v27, %v482_v26  ;;  %v81_v39 = vld [vmem:[%s7039_s0 + $0x38] sm:$0xff] }
  0x58   :  { %4302 = vmatpush1.bf16.msra.mxu1 %v6032_v41  ;;  %249 = vmatprep.mubr.f32.mxu0 %v5763_v0  ;;  %v483_v32 = vld [vmem:[#allocation4 + $0x1e0] sm:$0xff]  ;;  %v481_v35 = vld [vmem:[#allocation4 + $0x1d0] sm:$0xff] }
  0x59   :  { %362 = vmatprep.mubr.f32.mxu1 %v5763_v0  ;;  %4272 = vmatprep.subr.bf16.mxu0 %v6036_v44  ;;  %v485_v36 = vld [vmem:[#allocation4 + $0x1f0] sm:$0xff]  ;;  %v6104_v40 = vpack.c.bf16 %v483_v32, %v479_v30  ;;  %v114_v48 = vld [vmem:[%s7042_s3] sm:$0xf] }
  0x5a   :  { %4158 = vmatmul.mubr.msk.f32.gmra.mrb[8].mxu0 %vm136_vm0, %v78_v50  ;;  %4304 = vmatprep.subr.bf16.mxu1 %v6040_v47  ;;  %v6108_v42 = vpack.c.bf16 %v485_v36, %v481_v35  ;;  %v6176_v57 = vrot.slane %v114_v48, %v126_v52  ;;  %v6183_v11 = vrot.slane %v114_v48, %v130_v61 }
  0x5b   :  { %4166 = vmatmul.mubr.msk.f32.gmra.mrb[8].mxu1 %vm136_vm0, %v78_v50  ;;  %4274 = vmatpush1.bf16.msra.mxu0 %v6047_v51  ;;  %v6166_v50 = vrot.slane %v114_v48, %v118_v46 }
  0x5c   :  { %4306 = vmatpush1.bf16.msra.mxu1 %v6051_v55  ;;  %255 = vmatprep.mubr.f32.mxu0 %v5763_v0 }
  0x5d   :  { %368 = vmatprep.mubr.f32.mxu1 %v5763_v0  ;;  %4276 = vmatprep.subr.bf16.mxu0 %v6055_v59 }
  0x5e   :  { %4159 = vmatmul.mubr.msk.f32.gmra.mrb[10].mxu0 %vm136_vm0, %v79_v4  ;;  %4308 = vmatprep.subr.bf16.mxu1 %v6059_v63 }
  0x5f   :  { %4167 = vmatmul.mubr.msk.f32.gmra.mrb[10].mxu1 %vm136_vm0, %v79_v4  ;;  %4278 = vmatpush1.bf16.msra.mxu0 %v6066_v6 }
  0x60   :  { %4310 = vmatpush1.bf16.msra.mxu1 %v6070_v10  ;;  %261 = vmatprep.mubr.f32.mxu0 %v5763_v0 }
  0x61   :  { %374 = vmatprep.mubr.f32.mxu1 %v5763_v0  ;;  %4280 = vmatprep.subr.bf16.mxu0 %v6074_v14 }
  0x62   :  { %4160 = vmatmul.mubr.msk.f32.gmra.mrb[12].mxu0 %vm136_vm0, %v80_v23  ;;  %4312 = vmatprep.subr.bf16.mxu1 %v6078_v19 }
  0x63   :  { %4168 = vmatmul.mubr.msk.f32.gmra.mrb[12].mxu1 %vm136_vm0, %v80_v23  ;;  %4282 = vmatpush1.bf16.msra.mxu0 %v6085_v24 }
  0x64   :  { %4314 = vmatpush1.bf16.msra.mxu1 %v6089_v29  ;;  %267 = vmatprep.mubr.f32.mxu0 %v5763_v0 }
  0x65   :  { %380 = vmatprep.mubr.f32.mxu1 %v5763_v0  ;;  %4284 = vmatprep.subr.bf16.mxu0 %v6093_v33 }
  0x66   :  { %4161 = vmatmul.mubr.msk.f32.gmra.mrb[14].mxu0 %vm136_vm0, %v81_v39  ;;  %4316 = vmatprep.subr.bf16.mxu1 %v6097_v37 }
  0x67   :  { %4169 = vmatmul.mubr.msk.f32.gmra.mrb[14].mxu1 %vm136_vm0, %v81_v39  ;;  %4286 = vmatpush1.bf16.msra.mxu0 %v6104_v40 }
  0x68   :  { %4318 = vmatpush1.bf16.msra.mxu1 %v6108_v42  ;;  %551 = vmatprep.mubr.f32.mxu0 %v5763_v0 }
  0x69   :  { %622 = vmatprep.mubr.f32.mxu1 %v5763_v0  ;;  %4320 = vmatprep.subr.bf16.mxu0 %v5967_v53 }
  0x6a   :  { %552 = vmatmul.mubr.f32.vlgmr.msra.gmra.mrb[0].mxu0 %v5763_v0  ;;  %4352 = vmatprep.subr.bf16.mxu1 %v5969_v56 }
  0x6b   :  { %623 = vmatmul.mubr.f32.vlgmr.msra.gmra.mrb[0].mxu1 %v5763_v0  ;;  %4322 = vmatpush1.bf16.msra.mxu0 %v5974_v62 }
  0x6c   :  { %4354 = vmatpush1.bf16.msra.mxu1 %v5977_v2  ;;  %4324 = vmatprep.subr.bf16.mxu0 %v5980_v5 }
  0x6d   :  { %4356 = vmatprep.subr.bf16.mxu1 %v5983_v8  ;;  %784 = vmatprep.mubr.f32.mxu0 %v5763_v0 }
  0x6e   :  { %855 = vmatprep.mubr.f32.mxu1 %v5763_v0 }
  0x6f   :  { %4326 = vmatpush1.bf16.msra.mxu0 %v5990_v12 }
  0x70   :  { %4358 = vmatpush1.bf16.msra.mxu1 %v5994_v15  ;;  %4328 = vmatprep.subr.bf16.mxu0 %v5998_v18 }
  0x71   :  { %4360 = vmatprep.subr.bf16.mxu1 %v6002_v21 }
  0x73   :  { %4330 = vmatpush1.bf16.msra.mxu0 %v6009_v25 }
  0x74   :  { %4362 = vmatpush1.bf16.msra.mxu1 %v6013_v28  ;;  %4332 = vmatprep.subr.bf16.mxu0 %v6017_v31 }
  0x75   :  { %4364 = vmatprep.subr.bf16.mxu1 %v6021_v34 }
  0x77   :  { %4334 = vmatpush1.bf16.msra.mxu0 %v6028_v38 }
  0x78   :  { %4366 = vmatpush1.bf16.msra.mxu1 %v6032_v41  ;;  %4336 = vmatprep.subr.bf16.mxu0 %v6036_v44 }
  0x79   :  { %4368 = vmatprep.subr.bf16.mxu1 %v6040_v47 }
  0x7b   :  { %4338 = vmatpush1.bf16.msra.mxu0 %v6047_v51 }
  0x7c   :  { %4370 = vmatpush1.bf16.msra.mxu1 %v6051_v55  ;;  %4340 = vmatprep.subr.bf16.mxu0 %v6055_v59 }
  0x7d   :  { %4372 = vmatprep.subr.bf16.mxu1 %v6059_v63 }
  0x7f   :  { %4342 = vmatpush1.bf16.msra.mxu0 %v6066_v6 }
  0x80   :  { %4374 = vmatpush1.bf16.msra.mxu1 %v6070_v10  ;;  %4344 = vmatprep.subr.bf16.mxu0 %v6074_v14 }
  0x81   :  { %4376 = vmatprep.subr.bf16.mxu1 %v6078_v19 }
  0x83   :  { %4346 = vmatpush1.bf16.msra.mxu0 %v6085_v24 }
  0x84   :  { %4378 = vmatpush1.bf16.msra.mxu1 %v6089_v29  ;;  %4348 = vmatprep.subr.bf16.mxu0 %v6093_v33 }
  0x85   :  { %4380 = vmatprep.subr.bf16.mxu1 %v6097_v37 }
  0x87   :  { %4350 = vmatpush1.bf16.msra.mxu0 %v6104_v40 }
  0x88   :  { %4382 = vmatpush1.bf16.msra.mxu1 %v6108_v42  ;;  %4384 = vmatprep.subr.bf16.mxu0 %v5967_v53  ;;  %v6171_v53 = vrot.slane %v114_v48, %v122_v49 }
  0x89   :  { %4416 = vmatprep.subr.bf16.mxu1 %v5969_v56 }
 0x13d   :  { %v553_v56 = vpop.f32.mrb[0].mxu0 }
 0x13e   :  { %v5367_v54 = vadd.f32 %v553_v56, %v6166_v50  ;;  %v624_v58 = vpop.f32.mrb[0].mxu1  ;;  %v555_v60 = vpop.f32.mrb[1].mxu0 }
 0x13f   :  { %v5368_v1 = vadd.f32 %v555_v60, %v6171_v53  ;;  %v626_v3 = vpop.f32.mrb[1].mxu1  ;;  %v5383_v9 = vadd.f32 %v624_v58, %v6176_v57 }
 0x140   :  { %v633_v4 = vmul.f32 0.5, %v5367_v54  ;;  %v5384_v13 = vadd.f32 %v626_v3, %v6183_v11 }
 0x141   :  { %v637_v7 = vmul.f32 0.5, %v5368_v1 }
 0x142   :  { %5504 = vtanh.f32 %v633_v4  ;;  %v642_v16 = vmul.f32 0.5, %v5384_v13 }
 0x143   :  { %5506 = vtanh.f32 %v637_v7 }
 0x144   :  { %5508 = vtanh.f32 %v5383_v9 }
 0x145   :  { %5510 = vtanh.f32 %v642_v16 }
 0x14c   :  { %v5505_v17 = vpop.eup %5504 }
 0x14d   :  { %v5507_v20 = vpop.eup %5506  ;;  %v635_v22 = vmul.f32 0.5, %v5505_v17 }
 0x14e   :  { %v639_v23 = vmul.f32 0.5, %v5507_v20  ;;  %v5509_v27 = vpop.eup %5508 }
 0x14f   :  { %v636_v26 = vadd.f32 0.5, %v635_v22  ;;  %v5511_v39 = vpop.eup %5510 }
 0x150   :  { %v640_v30 = vadd.f32 0.5, %v639_v23  ;;  %v644_v43 = vmul.f32 0.5, %v5511_v39 }
 0x151   :  { %v647_v32 = vmul.f32 %v5509_v27, %v636_v26 }
 0x152   :  { %v646_v35 = vmul.f32 0.0, %v640_v30  ;;  %v645_v48 = vadd.f32 0.5, %v644_v43 }
 0x154   :  { %v6186_v36 = vadd.f32 %v647_v32, %v646_v35 }
 0x156   :  { %5512 = vtanh.f32 %v6186_v36 }
 0x160   :  { %v5513_v56 = vpop.eup %5512 }
 0x161   :  { %v6189_v54 = vmul.f32 %v5513_v56, %v645_v48  ;;  %v1123_v48 = vld [vmem:[#allocation4 + $0x8] sm:$0xff]  ;;  %v1125_v56 = vld [vmem:[#allocation4 + $0x18] sm:$0xff] }
 0x163   :  { %785 = vmatmul.mubr.f32.vlgmr.msra.gmra.mrb[2].mxu0 %v6189_v54  ;;  %856 = vmatmul.mubr.f32.vlgmr.msra.gmra.mrb[2].mxu1 %v6189_v54 }
 0x164   :  { %4386 = vmatpush1.bf16.msra.mxu0 %v5974_v62  ;;  %4418 = vmatpush1.bf16.msra.mxu1 %v5977_v2 }
 0x165   :  { %4388 = vmatprep.subr.bf16.mxu0 %v5980_v5  ;;  %4420 = vmatprep.subr.bf16.mxu1 %v5983_v8 }
 0x166   :  { %1017 = vmatprep.mubr.f32.mxu0 %v5763_v0  ;;  %1088 = vmatprep.mubr.f32.mxu1 %v5763_v0 }
 0x168   :  { %4390 = vmatpush1.bf16.msra.mxu0 %v5990_v12  ;;  %4422 = vmatpush1.bf16.msra.mxu1 %v5994_v15 }
 0x169   :  { %4392 = vmatprep.subr.bf16.mxu0 %v5998_v18  ;;  %4424 = vmatprep.subr.bf16.mxu1 %v6002_v21 }
 0x16c   :  { %4394 = vmatpush1.bf16.msra.mxu0 %v6009_v25  ;;  %4426 = vmatpush1.bf16.msra.mxu1 %v6013_v28 }
 0x16d   :  { %4396 = vmatprep.subr.bf16.mxu0 %v6017_v31  ;;  %4428 = vmatprep.subr.bf16.mxu1 %v6021_v34 }
 0x170   :  { %4398 = vmatpush1.bf16.msra.mxu0 %v6028_v38  ;;  %4430 = vmatpush1.bf16.msra.mxu1 %v6032_v41 }
 0x171   :  { %4400 = vmatprep.subr.bf16.mxu0 %v6036_v44  ;;  %4432 = vmatprep.subr.bf16.mxu1 %v6040_v47 }
 0x174   :  { %4402 = vmatpush1.bf16.msra.mxu0 %v6047_v51  ;;  %4434 = vmatpush1.bf16.msra.mxu1 %v6051_v55 }
 0x175   :  { %4404 = vmatprep.subr.bf16.mxu0 %v6055_v59  ;;  %4436 = vmatprep.subr.bf16.mxu1 %v6059_v63 }
 0x178   :  { %4406 = vmatpush1.bf16.msra.mxu0 %v6066_v6  ;;  %4438 = vmatpush1.bf16.msra.mxu1 %v6070_v10 }
 0x179   :  { %4408 = vmatprep.subr.bf16.mxu0 %v6074_v14  ;;  %4440 = vmatprep.subr.bf16.mxu1 %v6078_v19 }
 0x17c   :  { %4410 = vmatpush1.bf16.msra.mxu0 %v6085_v24  ;;  %4442 = vmatpush1.bf16.msra.mxu1 %v6089_v29 }
 0x17d   :  { %4412 = vmatprep.subr.bf16.mxu0 %v6093_v33  ;;  %4444 = vmatprep.subr.bf16.mxu1 %v6097_v37 }
 0x180   :  { %4414 = vmatpush1.bf16.msra.mxu0 %v6104_v40  ;;  %4446 = vmatpush1.bf16.msra.mxu1 %v6108_v42 }
 0x236   :  { %v786_v62 = vpop.f32.mrb[2].mxu0  ;;  %v857_v2 = vpop.f32.mrb[2].mxu1 }
 0x237   :  { %v5369_v5 = vadd.f32 %v786_v62, %v6166_v50  ;;  %v788_v8 = vpop.f32.mrb[3].mxu0  ;;  %v859_v12 = vpop.f32.mrb[3].mxu1  ;;  %v5385_v1 = vadd.f32 %v857_v2, %v6176_v57  ;;  %v1129_v2 = vld [vmem:[#allocation4 + $0x38] sm:$0xff] }
 0x238   :  { %v5370_v15 = vadd.f32 %v788_v8, %v6171_v53  ;;  %v5386_v3 = vadd.f32 %v859_v12, %v6183_v11  ;;  %v1126_v8 = vld [vmem:[#allocation4 + $0x20] sm:$0xff]  ;;  %v6241_v12 = vpack.c.bf16 %v1129_v2, %v1125_v56  ;;  %v1378_v56 = vld [vmem:[#allocation4 + $0xb8] sm:$0xff] }
 0x239   :  { %v866_v58 = vmul.f32 0.5, %v5369_v5  ;;  %v1122_v5 = vld [vmem:[#allocation4] sm:$0xff] }
 0x23a   :  { %v870_v60 = vmul.f32 0.5, %v5370_v15  ;;  %v875_v4 = vmul.f32 0.5, %v5386_v3  ;;  %v6243_v15 = vpack.c.bf16 %v1126_v8, %v1122_v5  ;;  %4480 = vmatprep.subr.bf16.mxu1 %v6241_v12  ;;  %v1131_v3 = vld [vmem:[#allocation4 + $0x48] sm:$0xff]  ;;  %v1371_v2 = vld [vmem:[#allocation4 + $0x80] sm:$0xff] }
 0x23b   :  { %5514 = vtanh.f32 %v866_v58  ;;  %v1124_v58 = vld [vmem:[#allocation4 + $0x10] sm:$0xff]  ;;  %v1375_v5 = vld [vmem:[#allocation4 + $0xa0] sm:$0xff] }
 0x23c   :  { %5516 = vtanh.f32 %v870_v60  ;;  %v1128_v60 = vld [vmem:[#allocation4 + $0x30] sm:$0xff] }
 0x23d   :  { %5518 = vtanh.f32 %v5385_v1  ;;  %v6246_v1 = vpack.c.bf16 %v1128_v60, %v1124_v58  ;;  %v6313_v58 = vpack.c.bf16 %v1375_v5, %v1371_v2  ;;  %v1373_v60 = vld [vmem:[#allocation4 + $0x90] sm:$0xff] }
 0x23e   :  { %5520 = vtanh.f32 %v875_v4  ;;  %v1135_v4 = vld [vmem:[#allocation4 + $0x68] sm:$0xff]  ;;  %v1401_v2 = vld [vmem:[#allocation4 + $0x170] sm:$0xff] }
 0x245   :  { %v5515_v7 = vpop.eup %5514 }
 0x246   :  { %v5517_v9 = vpop.eup %5516  ;;  %v868_v13 = vmul.f32 0.5, %v5515_v7  ;;  %v1133_v7 = vld [vmem:[#allocation4 + $0x58] sm:$0xff] }
 0x247   :  { %v872_v16 = vmul.f32 0.5, %v5517_v9  ;;  %v5519_v20 = vpop.eup %5518  ;;  %v6251_v9 = vpack.c.bf16 %v1135_v4, %v1131_v3  ;;  %v1377_v3 = vld [vmem:[#allocation4 + $0xb0] sm:$0xff] }
 0x248   :  { %v869_v17 = vadd.f32 0.5, %v868_v13  ;;  %v5521_v30 = vpop.eup %5520  ;;  %v1137_v13 = vld [vmem:[#allocation4 + $0x78] sm:$0xff]  ;;  %v6316_v4 = vpack.c.bf16 %v1377_v3, %v1373_v60  ;;  %v1404_v60 = vld [vmem:[#allocation4 + $0x188] sm:$0xff] }
 0x249   :  { %v873_v22 = vadd.f32 0.5, %v872_v16  ;;  %v877_v32 = vmul.f32 0.5, %v5521_v30  ;;  %v1130_v16 = vld [vmem:[#allocation4 + $0x40] sm:$0xff]  ;;  %v1408_v3 = vld [vmem:[#allocation4 + $0x1a8] sm:$0xff] }
 0x24a   :  { %v880_v23 = vmul.f32 %v5519_v20, %v869_v17  ;;  %v1134_v17 = vld [vmem:[#allocation4 + $0x60] sm:$0xff]  ;;  %v6253_v20 = vpack.c.bf16 %v1137_v13, %v1133_v7  ;;  %v1380_v7 = vld [vmem:[#allocation4 + $0xc8] sm:$0xff] }
 0x24b   :  { %v879_v26 = vmul.f32 %v873_v22, %v6186_v36  ;;  %v878_v35 = vadd.f32 0.5, %v877_v32  ;;  %v1127_v36 = vld [vmem:[#allocation4 + $0x28] sm:$0xff]  ;;  %v6255_v22 = vpack.c.bf16 %v1134_v17, %v1130_v16  ;;  %v1382_v16 = vld [vmem:[#allocation4 + $0xd8] sm:$0xff] }
 0x24c   :  { %v6239_v62 = vpack.c.bf16 %v1127_v36, %v1123_v48  ;;  %v1374_v48 = vld [vmem:[#allocation4 + $0x98] sm:$0xff]  ;;  %v1384_v13 = vld [vmem:[#allocation4 + $0xe8] sm:$0xff] }
 0x24d   :  { %v6230_v27 = vadd.f32 %v880_v23, %v879_v26  ;;  %v1132_v23 = vld [vmem:[#allocation4 + $0x50] sm:$0xff]  ;;  %v6311_v8 = vpack.c.bf16 %v1378_v56, %v1374_v48  ;;  %v6321_v17 = vpack.c.bf16 %v1384_v13, %v1380_v7  ;;  %v1406_v7 = vld [vmem:[#allocation4 + $0x198] sm:$0xff]  ;;  %v6357_v13 = vpack.c.bf16 %v1408_v3, %v1404_v60 }
 0x24e   :  { %4448 = vmatprep.subr.bf16.mxu0 %v6239_v62  ;;  %v1136_v26 = vld [vmem:[#allocation4 + $0x70] sm:$0xff] }
 0x24f   :  { %5522 = vtanh.f32 %v6230_v27  ;;  %v6258_v30 = vpack.c.bf16 %v1136_v26, %v1132_v23  ;;  %v1386_v23 = vld [vmem:[#allocation4 + $0xf8] sm:$0xff]  ;;  %v1379_v26 = vld [vmem:[#allocation4 + $0xc0] sm:$0xff]  ;;  %v1397_v56 = vld [vmem:[#allocation4 + $0x150] sm:$0xff] }
 0x250   :  { %v6352_v5 = vpack.c.bf16 %v1401_v2, %v1397_v56 }
 0x259   :  { %v5523_v39 = vpop.eup %5522 }
 0x25a   :  { %v6233_v43 = vmul.f32 %v5523_v39, %v878_v35  ;;  %v1376_v39 = vld [vmem:[#allocation4 + $0xa8] sm:$0xff] }
 0x25c   :  { %1018 = vmatmul.mubr.f32.vlgmr.msra.gmra.mrb[4].mxu0 %v6233_v43  ;;  %1089 = vmatmul.mubr.f32.vlgmr.msra.gmra.mrb[4].mxu1 %v6233_v43 }
 0x25d   :  { %1250 = vmatprep.mubr.f32.mxu0 %v5763_v0  ;;  %1321 = vmatprep.mubr.f32.mxu1 %v5763_v0 }
 0x25e   :  { %4450 = vmatpush1.bf16.msra.mxu0 %v6243_v15  ;;  %4482 = vmatpush1.bf16.msra.mxu1 %v6246_v1 }
 0x25f   :  { %4452 = vmatprep.subr.bf16.mxu0 %v6251_v9  ;;  %4484 = vmatprep.subr.bf16.mxu1 %v6253_v20 }
 0x262   :  { %4454 = vmatpush1.bf16.msra.mxu0 %v6255_v22  ;;  %4486 = vmatpush1.bf16.msra.mxu1 %v6258_v30 }
 0x263   :  { %4456 = vmatprep.subr.bf16.mxu0 %v5998_v18  ;;  %4488 = vmatprep.subr.bf16.mxu1 %v6002_v21 }
 0x266   :  { %4458 = vmatpush1.bf16.msra.mxu0 %v6009_v25  ;;  %4490 = vmatpush1.bf16.msra.mxu1 %v6013_v28 }
 0x267   :  { %4460 = vmatprep.subr.bf16.mxu0 %v6017_v31  ;;  %4492 = vmatprep.subr.bf16.mxu1 %v6021_v34 }
 0x26a   :  { %4462 = vmatpush1.bf16.msra.mxu0 %v6028_v38  ;;  %4494 = vmatpush1.bf16.msra.mxu1 %v6032_v41 }
 0x26b   :  { %4464 = vmatprep.subr.bf16.mxu0 %v6036_v44  ;;  %4496 = vmatprep.subr.bf16.mxu1 %v6040_v47 }
 0x26e   :  { %4466 = vmatpush1.bf16.msra.mxu0 %v6047_v51  ;;  %4498 = vmatpush1.bf16.msra.mxu1 %v6051_v55 }
 0x26f   :  { %4468 = vmatprep.subr.bf16.mxu0 %v6055_v59  ;;  %4500 = vmatprep.subr.bf16.mxu1 %v6059_v63 }
 0x272   :  { %4470 = vmatpush1.bf16.msra.mxu0 %v6066_v6  ;;  %4502 = vmatpush1.bf16.msra.mxu1 %v6070_v10 }
 0x273   :  { %4472 = vmatprep.subr.bf16.mxu0 %v6074_v14  ;;  %4504 = vmatprep.subr.bf16.mxu1 %v6078_v19 }
 0x276   :  { %4474 = vmatpush1.bf16.msra.mxu0 %v6085_v24  ;;  %4506 = vmatpush1.bf16.msra.mxu1 %v6089_v29 }
 0x277   :  { %4476 = vmatprep.subr.bf16.mxu0 %v6093_v33  ;;  %4508 = vmatprep.subr.bf16.mxu1 %v6097_v37 }
 0x27a   :  { %4478 = vmatpush1.bf16.msra.mxu0 %v6104_v40  ;;  %4510 = vmatpush1.bf16.msra.mxu1 %v6108_v42 }
 0x27b   :  { %4512 = vmatprep.subr.bf16.mxu0 %v6239_v62  ;;  %4544 = vmatprep.subr.bf16.mxu1 %v6241_v12 }
 0x32f   :  { %v1019_v18 = vpop.f32.mrb[4].mxu0  ;;  %v1090_v21 = vpop.f32.mrb[4].mxu1 }
 0x330   :  { %v5371_v25 = vadd.f32 %v1019_v18, %v6166_v50  ;;  %v1021_v28 = vpop.f32.mrb[5].mxu0  ;;  %v1092_v31 = vpop.f32.mrb[5].mxu1  ;;  %v5387_v44 = vadd.f32 %v1090_v21, %v6176_v57  ;;  %v1383_v18 = vld [vmem:[#allocation4 + $0xe0] sm:$0xff]  ;;  %v6323_v21 = vpack.c.bf16 %v1386_v23, %v1382_v16  ;;  %v1410_v16 = vld [vmem:[#allocation4 + $0x1b8] sm:$0xff] }
 0x331   :  { %v5372_v34 = vadd.f32 %v1021_v28, %v6171_v53  ;;  %v5388_v47 = vadd.f32 %v1092_v31, %v6183_v11  ;;  %v1381_v28 = vld [vmem:[#allocation4 + $0xd0] sm:$0xff]  ;;  %v1403_v23 = vld [vmem:[#allocation4 + $0x180] sm:$0xff] }
 0x332   :  { %v1099_v38 = vmul.f32 0.5, %v5371_v25  ;;  %v6325_v25 = vpack.c.bf16 %v1383_v18, %v1379_v26  ;;  %v1385_v31 = vld [vmem:[#allocation4 + $0xf0] sm:$0xff]  ;;  %v1407_v26 = vld [vmem:[#allocation4 + $0x1a0] sm:$0xff]  ;;  %v6359_v18 = vpack.c.bf16 %v1410_v16, %v1406_v7 }
 0x333   :  { %v1103_v41 = vmul.f32 0.5, %v5372_v34  ;;  %v1108_v51 = vmul.f32 0.5, %v5388_v47  ;;  %v6328_v34 = vpack.c.bf16 %v1385_v31, %v1381_v28  ;;  %v6361_v28 = vpack.c.bf16 %v1407_v26, %v1403_v23  ;;  %v1405_v31 = vld [vmem:[#allocation4 + $0x190] sm:$0xff] }
 0x334   :  { %5524 = vtanh.f32 %v1099_v38  ;;  %v1388_v38 = vld [vmem:[#allocation4 + $0x108] sm:$0xff] }
 0x335   :  { %5526 = vtanh.f32 %v1103_v41  ;;  %v1392_v41 = vld [vmem:[#allocation4 + $0x128] sm:$0xff] }
 0x336   :  { %5528 = vtanh.f32 %v5387_v44  ;;  %v1390_v44 = vld [vmem:[#allocation4 + $0x118] sm:$0xff]  ;;  %v6333_v47 = vpack.c.bf16 %v1392_v41, %v1388_v38  ;;  %v1409_v38 = vld [vmem:[#allocation4 + $0x1b0] sm:$0xff] }
 0x337   :  { %5530 = vtanh.f32 %v1108_v51  ;;  %v1394_v51 = vld [vmem:[#allocation4 + $0x138] sm:$0xff]  ;;  %v6364_v41 = vpack.c.bf16 %v1409_v38, %v1405_v31 }
 0x33e   :  { %v5525_v55 = vpop.eup %5524 }
 0x33f   :  { %v5527_v59 = vpop.eup %5526  ;;  %v1101_v63 = vmul.f32 0.5, %v5525_v55  ;;  %v1387_v55 = vld [vmem:[#allocation4 + $0x100] sm:$0xff] }
 0x340   :  { %v1105_v6 = vmul.f32 0.5, %v5527_v59  ;;  %v5529_v14 = vpop.eup %5528  ;;  %v1391_v59 = vld [vmem:[#allocation4 + $0x120] sm:$0xff] }
 0x341   :  { %v1102_v10 = vadd.f32 0.5, %v1101_v63  ;;  %v5531_v37 = vpop.eup %5530  ;;  %v6335_v63 = vpack.c.bf16 %v1394_v51, %v1390_v44  ;;  %v1412_v44 = vld [vmem:[#allocation4 + $0x1c8] sm:$0xff] }
 0x342   :  { %v1106_v19 = vadd.f32 0.5, %v1105_v6  ;;  %v1110_v40 = vmul.f32 0.5, %v5531_v37  ;;  %v6337_v6 = vpack.c.bf16 %v1391_v59, %v1387_v55  ;;  %v1398_v37 = vld [vmem:[#allocation4 + $0x158] sm:$0xff]  ;;  %v1416_v51 = vld [vmem:[#allocation4 + $0x1e8] sm:$0xff] }
 0x343   :  { %v1113_v24 = vmul.f32 %v5529_v14, %v1102_v10  ;;  %v1389_v10 = vld [vmem:[#allocation4 + $0x110] sm:$0xff]  ;;  %v1414_v55 = vld [vmem:[#allocation4 + $0x1d8] sm:$0xff]  ;;  %v6369_v59 = vpack.c.bf16 %v1416_v51, %v1412_v44 }
 0x344   :  { %v1112_v29 = vmul.f32 %v1106_v19, %v6230_v27  ;;  %v1111_v42 = vadd.f32 0.5, %v1110_v40  ;;  %v1372_v27 = vld [vmem:[#allocation4 + $0x88] sm:$0xff]  ;;  %v1393_v14 = vld [vmem:[#allocation4 + $0x130] sm:$0xff] }
 0x345   :  { %v6309_v36 = vpack.c.bf16 %v1376_v39, %v1372_v27  ;;  %v6340_v19 = vpack.c.bf16 %v1393_v14, %v1389_v10  ;;  %v1399_v27 = vld [vmem:[#allocation4 + $0x160] sm:$0xff]  ;;  %v1418_v10 = vld [vmem:[#allocation4 + $0x1f8] sm:$0xff] }
 0x346   :  { %v6294_v33 = vadd.f32 %v1113_v24, %v1112_v29  ;;  %v1396_v24 = vld [vmem:[#allocation4 + $0x148] sm:$0xff]  ;;  %v1411_v14 = vld [vmem:[#allocation4 + $0x1c0] sm:$0xff] }
 0x347   :  { %v1400_v29 = vld [vmem:[#allocation4 + $0x168] sm:$0xff] }
 0x348   :  { %5532 = vtanh.f32 %v6294_v33  ;;  %v6345_v40 = vpack.c.bf16 %v1400_v29, %v1396_v24  ;;  %v1415_v24 = vld [vmem:[#allocation4 + $0x1e0] sm:$0xff]  ;;  %v6371_v29 = vpack.c.bf16 %v1418_v10, %v1414_v55 }
 0x352   :  { %v5533_v32 = vpop.eup %5532 }
 0x353   :  { %v6297_v35 = vmul.f32 %v5533_v32, %v1111_v42  ;;  %v1402_v42 = vld [vmem:[#allocation4 + $0x178] sm:$0xff]  ;;  %v1395_v32 = vld [vmem:[#allocation4 + $0x140] sm:$0xff] }
 0x354   :  { %v6347_v39 = vpack.c.bf16 %v1402_v42, %v1398_v37  ;;  %v6349_v48 = vpack.c.bf16 %v1399_v27, %v1395_v32  ;;  %v6373_v37 = vpack.c.bf16 %v1415_v24, %v1411_v14  ;;  %v1413_v42 = vld [vmem:[#allocation4 + $0x1d0] sm:$0xff] }
 0x355   :  { %1251 = vmatmul.mubr.f32.vlgmr.msra.gmra.mrb[6].mxu0 %v6297_v35  ;;  %1322 = vmatmul.mubr.f32.vlgmr.msra.gmra.mrb[6].mxu1 %v6297_v35  ;;  %v1417_v32 = vld [vmem:[#allocation4 + $0x1f0] sm:$0xff] }
 0x356   :  { %4514 = vmatpush1.bf16.msra.mxu0 %v6243_v15  ;;  %4546 = vmatpush1.bf16.msra.mxu1 %v6246_v1  ;;  %v6376_v27 = vpack.c.bf16 %v1417_v32, %v1413_v42 }
 0x357   :  { %4516 = vmatprep.subr.bf16.mxu0 %v6251_v9  ;;  %4548 = vmatprep.subr.bf16.mxu1 %v6253_v20 }
 0x358   :  { %1483 = vmatprep.mubr.f32.mxu0 %v5763_v0  ;;  %1554 = vmatprep.mubr.f32.mxu1 %v5763_v0 }
 0x35a   :  { %4518 = vmatpush1.bf16.msra.mxu0 %v6255_v22  ;;  %4550 = vmatpush1.bf16.msra.mxu1 %v6258_v30 }
 0x35b   :  { %4520 = vmatprep.subr.bf16.mxu0 %v6309_v36  ;;  %4552 = vmatprep.subr.bf16.mxu1 %v6311_v8 }
 0x35e   :  { %4522 = vmatpush1.bf16.msra.mxu0 %v6313_v58  ;;  %4554 = vmatpush1.bf16.msra.mxu1 %v6316_v4 }
 0x35f   :  { %4524 = vmatprep.subr.bf16.mxu0 %v6321_v17  ;;  %4556 = vmatprep.subr.bf16.mxu1 %v6323_v21 }
 0x362   :  { %4526 = vmatpush1.bf16.msra.mxu0 %v6325_v25  ;;  %4558 = vmatpush1.bf16.msra.mxu1 %v6328_v34 }
 0x363   :  { %4528 = vmatprep.subr.bf16.mxu0 %v6333_v47  ;;  %4560 = vmatprep.subr.bf16.mxu1 %v6335_v63 }
 0x366   :  { %4530 = vmatpush1.bf16.msra.mxu0 %v6337_v6  ;;  %4562 = vmatpush1.bf16.msra.mxu1 %v6340_v19 }
 0x367   :  { %4532 = vmatprep.subr.bf16.mxu0 %v6345_v40  ;;  %4564 = vmatprep.subr.bf16.mxu1 %v6347_v39 }
 0x36a   :  { %4534 = vmatpush1.bf16.msra.mxu0 %v6349_v48  ;;  %4566 = vmatpush1.bf16.msra.mxu1 %v6352_v5 }
 0x36b   :  { %4536 = vmatprep.subr.bf16.mxu0 %v6357_v13  ;;  %4568 = vmatprep.subr.bf16.mxu1 %v6359_v18 }
 0x36e   :  { %4538 = vmatpush1.bf16.msra.mxu0 %v6361_v28  ;;  %4570 = vmatpush1.bf16.msra.mxu1 %v6364_v41 }
 0x36f   :  { %4540 = vmatprep.subr.bf16.mxu0 %v6369_v59  ;;  %4572 = vmatprep.subr.bf16.mxu1 %v6371_v29 }
 0x372   :  { %4542 = vmatpush1.bf16.msra.mxu0 %v6373_v37  ;;  %4574 = vmatpush1.bf16.msra.mxu1 %v6376_v27 }
 0x373   :  { %4576 = vmatprep.subr.bf16.mxu0 %v6239_v62  ;;  %4608 = vmatprep.subr.bf16.mxu1 %v6241_v12 }
 0x428   :  { %v1252_v56 = vpop.f32.mrb[6].mxu0  ;;  %v1323_v2 = vpop.f32.mrb[6].mxu1 }
 0x429   :  { %v5373_v60 = vadd.f32 %v1252_v56, %v6166_v50  ;;  %v1254_v3 = vpop.f32.mrb[7].mxu0  ;;  %v1325_v7 = vpop.f32.mrb[7].mxu1  ;;  %v5389_v31 = vadd.f32 %v1323_v2, %v6176_v57 }
 0x42a   :  { %v5374_v16 = vadd.f32 %v1254_v3, %v6171_v53  ;;  %v5390_v38 = vadd.f32 %v1325_v7, %v6183_v11 }
 0x42b   :  { %v1332_v23 = vmul.f32 0.5, %v5373_v60 }
 0x42c   :  { %v1336_v26 = vmul.f32 0.5, %v5374_v16  ;;  %v1341_v44 = vmul.f32 0.5, %v5390_v38 }
 0x42d   :  { %5534 = vtanh.f32 %v1332_v23 }
 0x42e   :  { %5536 = vtanh.f32 %v1336_v26 }
 0x42f   :  { %5538 = vtanh.f32 %v5389_v31 }
 0x430   :  { %5540 = vtanh.f32 %v1341_v44 }
 0x437   :  { %v5535_v51 = vpop.eup %5534 }
 0x438   :  { %v5537_v55 = vpop.eup %5536  ;;  %v1334_v10 = vmul.f32 0.5, %v5535_v51 }
 0x439   :  { %v1338_v14 = vmul.f32 0.5, %v5537_v55  ;;  %v5539_v42 = vpop.eup %5538 }
 0x43a   :  { %v1335_v24 = vadd.f32 0.5, %v1334_v10  ;;  %v5541_v2 = vpop.eup %5540 }
 0x43b   :  { %v1339_v32 = vadd.f32 0.5, %v1338_v14  ;;  %v1343_v16 = vmul.f32 0.5, %v5541_v2 }
 0x43c   :  { %v1346_v56 = vmul.f32 %v5539_v42, %v1335_v24 }
 0x43d   :  { %v1345_v60 = vmul.f32 %v1339_v32, %v6294_v33  ;;  %v1344_v23 = vadd.f32 0.5, %v1343_v16 }
 0x43f   :  { %v6388_v3 = vadd.f32 %v1346_v56, %v1345_v60 }
 0x441   :  { %5542 = vtanh.f32 %v6388_v3 }
 0x44b   :  { %v5543_v7 = vpop.eup %5542 }
 0x44c   :  { %v6391_v26 = vmul.f32 %v5543_v7, %v1344_v23 }
 0x44e   :  { %1484 = vmatmul.mubr.f32.vlgmr.msra.gmra.mrb[8].mxu0 %v6391_v26  ;;  %1555 = vmatmul.mubr.f32.vlgmr.msra.gmra.mrb[8].mxu1 %v6391_v26 }
 0x44f   :  { %4578 = vmatpush1.bf16.msra.mxu0 %v6243_v15  ;;  %4610 = vmatpush1.bf16.msra.mxu1 %v6246_v1 }
 0x450   :  { %4580 = vmatprep.subr.bf16.mxu0 %v6251_v9  ;;  %4612 = vmatprep.subr.bf16.mxu1 %v6253_v20 }
 0x451   :  { %1716 = vmatprep.mubr.f32.mxu0 %v5763_v0  ;;  %1787 = vmatprep.mubr.f32.mxu1 %v5763_v0 }
 0x453   :  { %4582 = vmatpush1.bf16.msra.mxu0 %v6255_v22  ;;  %4614 = vmatpush1.bf16.msra.mxu1 %v6258_v30 }
 0x454   :  { %4584 = vmatprep.subr.bf16.mxu0 %v6309_v36  ;;  %4616 = vmatprep.subr.bf16.mxu1 %v6311_v8 }
 0x457   :  { %4586 = vmatpush1.bf16.msra.mxu0 %v6313_v58  ;;  %4618 = vmatpush1.bf16.msra.mxu1 %v6316_v4 }
 0x458   :  { %4588 = vmatprep.subr.bf16.mxu0 %v6321_v17  ;;  %4620 = vmatprep.subr.bf16.mxu1 %v6323_v21 }
 0x45b   :  { %4590 = vmatpush1.bf16.msra.mxu0 %v6325_v25  ;;  %4622 = vmatpush1.bf16.msra.mxu1 %v6328_v34 }
 0x45c   :  { %4592 = vmatprep.subr.bf16.mxu0 %v6333_v47  ;;  %4624 = vmatprep.subr.bf16.mxu1 %v6335_v63 }
 0x45f   :  { %4594 = vmatpush1.bf16.msra.mxu0 %v6337_v6  ;;  %4626 = vmatpush1.bf16.msra.mxu1 %v6340_v19 }
 0x460   :  { %4596 = vmatprep.subr.bf16.mxu0 %v6345_v40  ;;  %4628 = vmatprep.subr.bf16.mxu1 %v6347_v39 }
 0x463   :  { %4598 = vmatpush1.bf16.msra.mxu0 %v6349_v48  ;;  %4630 = vmatpush1.bf16.msra.mxu1 %v6352_v5 }
 0x464   :  { %4600 = vmatprep.subr.bf16.mxu0 %v6357_v13  ;;  %4632 = vmatprep.subr.bf16.mxu1 %v6359_v18 }
 0x467   :  { %4602 = vmatpush1.bf16.msra.mxu0 %v6361_v28  ;;  %4634 = vmatpush1.bf16.msra.mxu1 %v6364_v41 }
 0x468   :  { %4604 = vmatprep.subr.bf16.mxu0 %v6369_v59  ;;  %4636 = vmatprep.subr.bf16.mxu1 %v6371_v29 }
 0x46b   :  { %4606 = vmatpush1.bf16.msra.mxu0 %v6373_v37  ;;  %4638 = vmatpush1.bf16.msra.mxu1 %v6376_v27 }
 0x46c   :  { %4640 = vmatprep.subr.bf16.mxu0 %v6239_v62  ;;  %4672 = vmatprep.subr.bf16.mxu1 %v6241_v12 }
 0x521   :  { %v1485_v33 = vpop.f32.mrb[8].mxu0  ;;  %v1556_v31 = vpop.f32.mrb[8].mxu1 }
 0x522   :  { %v5375_v38 = vadd.f32 %v1485_v33, %v6166_v50  ;;  %v1487_v44 = vpop.f32.mrb[9].mxu0  ;;  %v1558_v51 = vpop.f32.mrb[9].mxu1  ;;  %v5391_v24 = vadd.f32 %v1556_v31, %v6176_v57 }
 0x523   :  { %v5376_v55 = vadd.f32 %v1487_v44, %v6171_v53  ;;  %v5392_v42 = vadd.f32 %v1558_v51, %v6183_v11 }
 0x524   :  { %v1565_v10 = vmul.f32 0.5, %v5375_v38 }
 0x525   :  { %v1569_v14 = vmul.f32 0.5, %v5376_v55  ;;  %v1574_v62 = vmul.f32 0.5, %v5392_v42 }
 0x526   :  { %5544 = vtanh.f32 %v1565_v10 }
 0x527   :  { %5546 = vtanh.f32 %v1569_v14 }
 0x528   :  { %5548 = vtanh.f32 %v5391_v24 }
 0x529   :  { %5550 = vtanh.f32 %v1574_v62 }
 0x530   :  { %v5545_v32 = vpop.eup %5544 }
 0x531   :  { %v5547_v12 = vpop.eup %5546  ;;  %v1567_v56 = vmul.f32 0.5, %v5545_v32 }
 0x532   :  { %v1571_v60 = vmul.f32 0.5, %v5547_v12  ;;  %v5549_v16 = vpop.eup %5548 }
 0x533   :  { %v1568_v2 = vadd.f32 0.5, %v1567_v56  ;;  %v5551_v31 = vpop.eup %5550 }
 0x534   :  { %v1572_v23 = vadd.f32 0.5, %v1571_v60  ;;  %v1576_v44 = vmul.f32 0.5, %v5551_v31 }
 0x535   :  { %v1579_v7 = vmul.f32 %v5549_v16, %v1568_v2 }
 0x536   :  { %v1578_v33 = vmul.f32 %v1572_v23, %v6388_v3  ;;  %v1577_v55 = vadd.f32 0.5, %v1576_v44 }
 0x538   :  { %v6434_v38 = vadd.f32 %v1579_v7, %v1578_v33 }
 0x53a   :  { %5552 = vtanh.f32 %v6434_v38 }
 0x544   :  { %v5553_v51 = vpop.eup %5552 }
 0x545   :  { %v6437_v10 = vmul.f32 %v5553_v51, %v1577_v55 }
 0x547   :  { %1717 = vmatmul.mubr.f32.vlgmr.msra.gmra.mrb[10].mxu0 %v6437_v10  ;;  %1788 = vmatmul.mubr.f32.vlgmr.msra.gmra.mrb[10].mxu1 %v6437_v10 }
 0x548   :  { %4642 = vmatpush1.bf16.msra.mxu0 %v6243_v15  ;;  %4674 = vmatpush1.bf16.msra.mxu1 %v6246_v1 }
 0x549   :  { %4644 = vmatprep.subr.bf16.mxu0 %v6251_v9  ;;  %4676 = vmatprep.subr.bf16.mxu1 %v6253_v20 }
 0x54a   :  { %1949 = vmatprep.mubr.f32.mxu0 %v5763_v0  ;;  %2020 = vmatprep.mubr.f32.mxu1 %v5763_v0 }
 0x54c   :  { %4646 = vmatpush1.bf16.msra.mxu0 %v6255_v22  ;;  %4678 = vmatpush1.bf16.msra.mxu1 %v6258_v30 }
 0x54d   :  { %4648 = vmatprep.subr.bf16.mxu0 %v6309_v36  ;;  %4680 = vmatprep.subr.bf16.mxu1 %v6311_v8 }
 0x550   :  { %4650 = vmatpush1.bf16.msra.mxu0 %v6313_v58  ;;  %4682 = vmatpush1.bf16.msra.mxu1 %v6316_v4 }
 0x551   :  { %4652 = vmatprep.subr.bf16.mxu0 %v6321_v17  ;;  %4684 = vmatprep.subr.bf16.mxu1 %v6323_v21 }
 0x554   :  { %4654 = vmatpush1.bf16.msra.mxu0 %v6325_v25  ;;  %4686 = vmatpush1.bf16.msra.mxu1 %v6328_v34 }
 0x555   :  { %4656 = vmatprep.subr.bf16.mxu0 %v6333_v47  ;;  %4688 = vmatprep.subr.bf16.mxu1 %v6335_v63 }
 0x558   :  { %4658 = vmatpush1.bf16.msra.mxu0 %v6337_v6  ;;  %4690 = vmatpush1.bf16.msra.mxu1 %v6340_v19 }
 0x559   :  { %4660 = vmatprep.subr.bf16.mxu0 %v6345_v40  ;;  %4692 = vmatprep.subr.bf16.mxu1 %v6347_v39 }
 0x55c   :  { %4662 = vmatpush1.bf16.msra.mxu0 %v6349_v48  ;;  %4694 = vmatpush1.bf16.msra.mxu1 %v6352_v5 }
 0x55d   :  { %4664 = vmatprep.subr.bf16.mxu0 %v6357_v13  ;;  %4696 = vmatprep.subr.bf16.mxu1 %v6359_v18 }
 0x560   :  { %4666 = vmatpush1.bf16.msra.mxu0 %v6361_v28  ;;  %4698 = vmatpush1.bf16.msra.mxu1 %v6364_v41 }
 0x561   :  { %4668 = vmatprep.subr.bf16.mxu0 %v6369_v59  ;;  %4700 = vmatprep.subr.bf16.mxu1 %v6371_v29 }
 0x564   :  { %4670 = vmatpush1.bf16.msra.mxu0 %v6373_v37  ;;  %4702 = vmatpush1.bf16.msra.mxu1 %v6376_v27 }
 0x61a   :  { %v1718_v15 = vpop.f32.mrb[10].mxu0  ;;  %v1789_v1 = vpop.f32.mrb[10].mxu1 }
 0x61b   :  { %v5377_v9 = vadd.f32 %v1718_v15, %v6166_v50  ;;  %v1720_v20 = vpop.f32.mrb[11].mxu0  ;;  %v1791_v22 = vpop.f32.mrb[11].mxu1  ;;  %v5393_v24 = vadd.f32 %v1789_v1, %v6176_v57 }
 0x61c   :  { %v5378_v30 = vadd.f32 %v1720_v20, %v6171_v53  ;;  %v5394_v42 = vadd.f32 %v1791_v22, %v6183_v11  ;;  %v2057_v20 = vld [vmem:[#allocation4 + $0x18] sm:$0xff] }
 0x61d   :  { %v1798_v3 = vmul.f32 0.5, %v5377_v9  ;;  %v2055_v9 = vld [vmem:[#allocation4 + $0x8] sm:$0xff] }
 0x61e   :  { %v1802_v14 = vmul.f32 0.5, %v5378_v30  ;;  %v1807_v62 = vmul.f32 0.5, %v5394_v42  ;;  %v2061_v30 = vld [vmem:[#allocation4 + $0x38] sm:$0xff] }
 0x61f   :  { %5554 = vtanh.f32 %v1798_v3  ;;  %v2054_v3 = vld [vmem:[#allocation4] sm:$0xff] }
 0x620   :  { %5556 = vtanh.f32 %v1802_v14  ;;  %v2058_v14 = vld [vmem:[#allocation4 + $0x20] sm:$0xff] }
 0x621   :  { %5558 = vtanh.f32 %v5393_v24  ;;  %v4735_v24 = vpack.c.bf16 %v2061_v30, %v2057_v20  ;;  %v4705_v42 = vpack.c.bf16 %v2058_v14, %v2054_v3  ;;  %v2291_v14 = vld [vmem:[#allocation7] sm:$0xff] }
 0x622   :  { %5560 = vtanh.f32 %v1807_v62  ;;  %v2056_v62 = vld [vmem:[#allocation4 + $0x10] sm:$0xff] }
 0x623   :  { %4736 = vmatprep.subr.bf16.mxu1 %v4735_v24  ;;  %v2295_v24 = vld [vmem:[#allocation7 + $0x20] sm:$0xff] }
 0x629   :  { %v5555_v32 = vpop.eup %5554 }
 0x62a   :  { %v5557_v12 = vpop.eup %5556  ;;  %v1800_v56 = vmul.f32 0.5, %v5555_v32  ;;  %v2060_v32 = vld [vmem:[#allocation4 + $0x30] sm:$0xff] }
 0x62b   :  { %v1804_v60 = vmul.f32 0.5, %v5557_v12  ;;  %v5559_v16 = vpop.eup %5558  ;;  %v4737_v12 = vpack.c.bf16 %v2060_v32, %v2056_v62  ;;  %v2297_v62 = vld [vmem:[#allocation7 + $0x30] sm:$0xff]  ;;  %v2300_v32 = vld [vmem:[#allocation7 + $0x48] sm:$0xff] }
 0x62c   :  { %v1801_v2 = vadd.f32 0.5, %v1800_v56  ;;  %v5561_v44 = vpop.eup %5560  ;;  %v2063_v56 = vld [vmem:[#allocation4 + $0x48] sm:$0xff] }
 0x62d   :  { %v1805_v23 = vadd.f32 0.5, %v1804_v60  ;;  %v1809_v55 = vmul.f32 0.5, %v5561_v44  ;;  %v2067_v60 = vld [vmem:[#allocation4 + $0x68] sm:$0xff] }
 0x62e   :  { %v1812_v7 = vmul.f32 %v5559_v16, %v1801_v2  ;;  %v2065_v2 = vld [vmem:[#allocation4 + $0x58] sm:$0xff]  ;;  %v4707_v16 = vpack.c.bf16 %v2067_v60, %v2063_v56 }
 0x62f   :  { %v1811_v33 = vmul.f32 %v1805_v23, %v6434_v38  ;;  %v1810_v51 = vadd.f32 0.5, %v1809_v55  ;;  %v2059_v38 = vld [vmem:[#allocation4 + $0x28] sm:$0xff]  ;;  %v2069_v23 = vld [vmem:[#allocation4 + $0x78] sm:$0xff] }
 0x630   :  { %v4703_v22 = vpack.c.bf16 %v2059_v38, %v2055_v9  ;;  %v4739_v44 = vpack.c.bf16 %v2069_v23, %v2065_v2  ;;  %v2302_v56 = vld [vmem:[#allocation7 + $0x58] sm:$0xff]  ;;  %v4769_v23 = vpack.c.bf16 %v2295_v24, %v2291_v14 }
 0x631   :  { %v6478_v31 = vadd.f32 %v1812_v7, %v1811_v33  ;;  %v2062_v7 = vld [vmem:[#allocation4 + $0x40] sm:$0xff]  ;;  %v2306_v60 = vld [vmem:[#allocation7 + $0x78] sm:$0xff] }
 0x632   :  { %4704 = vmatprep.subr.bf16.mxu0 %v4703_v22  ;;  %v2066_v33 = vld [vmem:[#allocation4 + $0x60] sm:$0xff] }
 0x633   :  { %5562 = vtanh.f32 %v6478_v31  ;;  %v4709_v55 = vpack.c.bf16 %v2066_v33, %v2062_v7  ;;  %v2299_v33 = vld [vmem:[#allocation7 + $0x40] sm:$0xff] }
 0x63d   :  { %v5563_v15 = vpop.eup %5562 }
 0x63e   :  { %v6481_v1 = vmul.f32 %v5563_v15, %v1810_v51  ;;  %v2064_v51 = vld [vmem:[#allocation4 + $0x50] sm:$0xff] }
 0x63f   :  { %v2068_v15 = vld [vmem:[#allocation4 + $0x70] sm:$0xff] }
 0x640   :  { %1950 = vmatmul.mubr.f32.vlgmr.msra.gmra.mrb[12].mxu0 %v6481_v1  ;;  %2021 = vmatmul.mubr.f32.vlgmr.msra.gmra.mrb[12].mxu1 %v6481_v1  ;;  %v4741_v9 = vpack.c.bf16 %v2068_v15, %v2064_v51  ;;  %v4803_v51 = vpack.c.bf16 %v2306_v60, %v2302_v56  ;;  %v2301_v15 = vld [vmem:[#allocation7 + $0x50] sm:$0xff] }
 0x641   :  { %2182 = vmatprep.mubr.f32.mxu0 %v5763_v0  ;;  %2253 = vmatprep.mubr.f32.mxu1 %v5763_v0  ;;  %v2325_v56 = vld [vmem:[#allocation7 + $0x110] sm:$0xff] }
 0x642   :  { %4706 = vmatpush1.bf16.msra.mxu0 %v4705_v42  ;;  %4738 = vmatpush1.bf16.msra.mxu1 %v4737_v12  ;;  %v2293_v42 = vld [vmem:[#allocation7 + $0x10] sm:$0xff]  ;;  %v2304_v12 = vld [vmem:[#allocation7 + $0x68] sm:$0xff] }
 0x643   :  { %4708 = vmatprep.subr.bf16.mxu0 %v4707_v16  ;;  %4740 = vmatprep.subr.bf16.mxu1 %v4739_v44  ;;  %v4801_v7 = vpack.c.bf16 %v2297_v62, %v2293_v42  ;;  %v2323_v42 = vld [vmem:[#allocation7 + $0x100] sm:$0xff]  ;;  %v2329_v60 = vld [vmem:[#allocation7 + $0x130] sm:$0xff] }
 0x644   :  { %v2327_v62 = vld [vmem:[#allocation7 + $0x120] sm:$0xff] }
 0x646   :  { %4710 = vmatpush1.bf16.msra.mxu0 %v4709_v55  ;;  %4742 = vmatpush1.bf16.msra.mxu1 %v4741_v9  ;;  %v4771_v55 = vpack.c.bf16 %v2304_v12, %v2300_v32  ;;  %v2305_v9 = vld [vmem:[#allocation7 + $0x70] sm:$0xff] }
 0x647   :  { %4712 = vmatprep.subr.bf16.mxu0 %v6309_v36  ;;  %4744 = vmatprep.subr.bf16.mxu1 %v6311_v8  ;;  %v2292_v36 = vld [vmem:[#allocation7 + $0x8] sm:$0xff] }
 0x648   :  { %v2296_v8 = vld [vmem:[#allocation7 + $0x28] sm:$0xff] }
 0x64a   :  { %4714 = vmatpush1.bf16.msra.mxu0 %v6313_v58  ;;  %4746 = vmatpush1.bf16.msra.mxu1 %v6316_v4  ;;  %v2294_v58 = vld [vmem:[#allocation7 + $0x18] sm:$0xff]  ;;  %v4767_v4 = vpack.c.bf16 %v2296_v8, %v2292_v36  ;;  %v2308_v36 = vld [vmem:[#allocation7 + $0x88] sm:$0xff] }
 0x64b   :  { %4716 = vmatprep.subr.bf16.mxu0 %v6321_v17  ;;  %4748 = vmatprep.subr.bf16.mxu1 %v6323_v21  ;;  %v2298_v17 = vld [vmem:[#allocation7 + $0x38] sm:$0xff]  ;;  %v2312_v8 = vld [vmem:[#allocation7 + $0xa8] sm:$0xff] }
 0x64c   :  { %v4799_v21 = vpack.c.bf16 %v2298_v17, %v2294_v58  ;;  %v2310_v58 = vld [vmem:[#allocation7 + $0x98] sm:$0xff] }
 0x64e   :  { %4718 = vmatpush1.bf16.msra.mxu0 %v6325_v25  ;;  %4750 = vmatpush1.bf16.msra.mxu1 %v6328_v34 }
 0x64f   :  { %4720 = vmatprep.subr.bf16.mxu0 %v6333_v47  ;;  %4752 = vmatprep.subr.bf16.mxu1 %v6335_v63 }
 0x652   :  { %4722 = vmatpush1.bf16.msra.mxu0 %v6337_v6  ;;  %4754 = vmatpush1.bf16.msra.mxu1 %v6340_v19 }
 0x653   :  { %4724 = vmatprep.subr.bf16.mxu0 %v6345_v40  ;;  %4756 = vmatprep.subr.bf16.mxu1 %v6347_v39 }
 0x656   :  { %4726 = vmatpush1.bf16.msra.mxu0 %v6349_v48  ;;  %4758 = vmatpush1.bf16.msra.mxu1 %v6352_v5 }
 0x657   :  { %4728 = vmatprep.subr.bf16.mxu0 %v6357_v13  ;;  %4760 = vmatprep.subr.bf16.mxu1 %v6359_v18 }
 0x65a   :  { %4730 = vmatpush1.bf16.msra.mxu0 %v6361_v28  ;;  %4762 = vmatpush1.bf16.msra.mxu1 %v6364_v41 }
 0x65b   :  { %4732 = vmatprep.subr.bf16.mxu0 %v6369_v59  ;;  %4764 = vmatprep.subr.bf16.mxu1 %v6371_v29 }
 0x65e   :  { %4734 = vmatpush1.bf16.msra.mxu0 %v6373_v37  ;;  %4766 = vmatpush1.bf16.msra.mxu1 %v6376_v27 }
 0x65f   :  { %4768 = vmatprep.subr.bf16.mxu0 %v4767_v4  ;;  %4800 = vmatprep.subr.bf16.mxu1 %v4799_v21  ;;  %v2314_v4 = vld [vmem:[#allocation7 + $0xb8] sm:$0xff]  ;;  %v4805_v21 = vpack.c.bf16 %v2305_v9, %v2301_v15 }
 0x713   :  { %v1951_v25 = vpop.f32.mrb[12].mxu0  ;;  %v2022_v34 = vpop.f32.mrb[12].mxu1 }
 0x714   :  { %v5379_v47 = vadd.f32 %v1951_v25, %v6166_v50  ;;  %v1953_v63 = vpop.f32.mrb[13].mxu0  ;;  %v2024_v6 = vpop.f32.mrb[13].mxu1  ;;  %v5395_v48 = vadd.f32 %v2022_v34, %v6176_v57  ;;  %v2307_v25 = vld [vmem:[#allocation7 + $0x80] sm:$0xff] }
 0x715   :  { %v5380_v19 = vadd.f32 %v1953_v63, %v6171_v53  ;;  %v5396_v5 = vadd.f32 %v2024_v6, %v6183_v11  ;;  %v2311_v34 = vld [vmem:[#allocation7 + $0xa0] sm:$0xff]  ;;  %v4807_v63 = vpack.c.bf16 %v2314_v4, %v2310_v58  ;;  %v2309_v6 = vld [vmem:[#allocation7 + $0x90] sm:$0xff]  ;;  %v2340_v58 = vld [vmem:[#allocation7 + $0x188] sm:$0xff] }
 0x716   :  { %v2031_v40 = vmul.f32 0.5, %v5379_v47  ;;  %v4775_v47 = vpack.c.bf16 %v2312_v8, %v2308_v36  ;;  %v2333_v36 = vld [vmem:[#allocation7 + $0x150] sm:$0xff]  ;;  %v2344_v4 = vld [vmem:[#allocation7 + $0x1a8] sm:$0xff] }
 0x717   :  { %v2035_v39 = vmul.f32 0.5, %v5380_v19  ;;  %v2040_v13 = vmul.f32 0.5, %v5396_v5  ;;  %v2313_v19 = vld [vmem:[#allocation7 + $0xb0] sm:$0xff]  ;;  %v2322_v5 = vld [vmem:[#allocation7 + $0xf8] sm:$0xff] }
 0x718   :  { %5564 = vtanh.f32 %v2031_v40  ;;  %v2316_v40 = vld [vmem:[#allocation7 + $0xc8] sm:$0xff]  ;;  %v2337_v8 = vld [vmem:[#allocation7 + $0x170] sm:$0xff] }
 0x719   :  { %5566 = vtanh.f32 %v2035_v39  ;;  %v2320_v39 = vld [vmem:[#allocation7 + $0xe8] sm:$0xff] }
 0x71a   :  { %5568 = vtanh.f32 %v5395_v48  ;;  %v2318_v48 = vld [vmem:[#allocation7 + $0xd8] sm:$0xff] }
 0x71b   :  { %5570 = vtanh.f32 %v2040_v13  ;;  %v4777_v13 = vpack.c.bf16 %v2311_v34, %v2307_v25  ;;  %v4821_v34 = vpack.c.bf16 %v2337_v8, %v2333_v36  ;;  %v2660_v36 = vld [vmem:[#allocation9 + $0xa8] sm:$0xff]  ;;  %v2658_v8 = vld [vmem:[#allocation9 + $0x98] sm:$0xff] }
 0x722   :  { %v5565_v18 = vpop.eup %5564 }
 0x723   :  { %v5567_v28 = vpop.eup %5566  ;;  %v2033_v41 = vmul.f32 0.5, %v5565_v18  ;;  %v4809_v18 = vpack.c.bf16 %v2313_v19, %v2309_v6  ;;  %v4791_v6 = vpack.c.bf16 %v2344_v4, %v2340_v58  ;;  %v2662_v4 = vld [vmem:[#allocation9 + $0xb8] sm:$0xff] }
 0x724   :  { %v2037_v59 = vmul.f32 0.5, %v5567_v28  ;;  %v5569_v37 = vpop.eup %5568  ;;  %v2315_v28 = vld [vmem:[#allocation7 + $0xc0] sm:$0xff] }
 0x725   :  { %v2034_v29 = vadd.f32 0.5, %v2033_v41  ;;  %v5571_v30 = vpop.eup %5570  ;;  %v2319_v41 = vld [vmem:[#allocation7 + $0xe0] sm:$0xff] }
 0x726   :  { %v2038_v27 = vadd.f32 0.5, %v2037_v59  ;;  %v2042_v3 = vmul.f32 0.5, %v5571_v30  ;;  %v4779_v59 = vpack.c.bf16 %v2320_v39, %v2316_v40  ;;  %v2326_v30 = vld [vmem:[#allocation7 + $0x118] sm:$0xff]  ;;  %v4781_v14 = vpack.c.bf16 %v2319_v41, %v2315_v28  ;;  %v2341_v40 = vld [vmem:[#allocation7 + $0x190] sm:$0xff] }
 0x727   :  { %v2045_v38 = vmul.f32 %v5569_v37, %v2034_v29  ;;  %v4811_v29 = vpack.c.bf16 %v2322_v5, %v2318_v48  ;;  %v2317_v37 = vld [vmem:[#allocation7 + $0xd0] sm:$0xff]  ;;  %v2348_v48 = vld [vmem:[#allocation7 + $0x1c8] sm:$0xff] }
 0x728   :  { %v2044_v20 = vmul.f32 %v2038_v27, %v6478_v31  ;;  %v2043_v2 = vadd.f32 0.5, %v2042_v3  ;;  %v2303_v31 = vld [vmem:[#allocation7 + $0x60] sm:$0xff]  ;;  %v2321_v27 = vld [vmem:[#allocation7 + $0xf0] sm:$0xff]  ;;  %v2330_v3 = vld [vmem:[#allocation7 + $0x138] sm:$0xff] }
 0x729   :  { %v4773_v17 = vpack.c.bf16 %v2303_v31, %v2299_v33  ;;  %v4813_v24 = vpack.c.bf16 %v2321_v27, %v2317_v37  ;;  %v4815_v12 = vpack.c.bf16 %v2330_v3, %v2326_v30  ;;  %v4785_v33 = vpack.c.bf16 %v2327_v62, %v2323_v42  ;;  %v2345_v39 = vld [vmem:[#allocation7 + $0x1b0] sm:$0xff]  ;;  %v2352_v5 = vld [vmem:[#allocation7 + $0x1e8] sm:$0xff]  ;;  %v2351_v27 = vld [vmem:[#allocation7 + $0x1e0] sm:$0xff] }
 0x72a   :  { %v6516_v22 = vadd.f32 %v2045_v38, %v2044_v20  ;;  %v2324_v38 = vld [vmem:[#allocation7 + $0x108] sm:$0xff]  ;;  %v4817_v31 = vpack.c.bf16 %v2329_v60, %v2325_v56  ;;  %v4825_v41 = vpack.c.bf16 %v2345_v39, %v2341_v40  ;;  %v2641_v62 = vld [vmem:[#allocation9 + $0x10] sm:$0xff]  ;;  %v2650_v60 = vld [vmem:[#allocation9 + $0x58] sm:$0xff] }
 0x72b   :  { %v2328_v20 = vld [vmem:[#allocation7 + $0x128] sm:$0xff]  ;;  %v2666_v39 = vld [vmem:[#allocation9 + $0xd8] sm:$0xff] }
 0x72c   :  { %5572 = vtanh.f32 %v6516_v22  ;;  %v4783_v32 = vpack.c.bf16 %v2328_v20, %v2324_v38  ;;  %v2349_v38 = vld [vmem:[#allocation7 + $0x1d0] sm:$0xff]  ;;  %v2652_v56 = vld [vmem:[#allocation9 + $0x68] sm:$0xff] }
 0x72d   :  { %v2353_v20 = vld [vmem:[#allocation7 + $0x1f0] sm:$0xff]  ;;  %v2668_v40 = vld [vmem:[#allocation9 + $0xe8] sm:$0xff] }
 0x72e   :  { %v4829_v3 = vpack.c.bf16 %v2353_v20, %v2349_v38  ;;  %v2676_v38 = vld [vmem:[#allocation9 + $0x128] sm:$0xff]  ;;  %v2674_v20 = vld [vmem:[#allocation9 + $0x118] sm:$0xff] }
 0x736   :  { %v5573_v16 = vpop.eup %5572 }
 0x737   :  { %v6519_v44 = vmul.f32 %v5573_v16, %v2043_v2  ;;  %v2332_v2 = vld [vmem:[#allocation7 + $0x148] sm:$0xff] }
 0x738   :  { %v2336_v16 = vld [vmem:[#allocation7 + $0x168] sm:$0xff] }
 0x739   :  { %2183 = vmatmul.mubr.f32.vlgmr.msra.gmra.mrb[14].mxu0 %v6519_v44  ;;  %2254 = vmatmul.mubr.f32.vlgmr.msra.gmra.mrb[14].mxu1 %v6519_v44  ;;  %v4787_v15 = vpack.c.bf16 %v2336_v16, %v2332_v2  ;;  %v2654_v16 = vld [vmem:[#allocation9 + $0x78] sm:$0xff] }
 0x73a   :  { %4770 = vmatpush1.bf16.msra.mxu0 %v4769_v23  ;;  %4802 = vmatpush1.bf16.msra.mxu1 %v4801_v7  ;;  %v2334_v23 = vld [vmem:[#allocation7 + $0x158] sm:$0xff] }
 0x73b   :  { %4772 = vmatprep.subr.bf16.mxu0 %v4771_v55  ;;  %4804 = vmatprep.subr.bf16.mxu1 %v4803_v51  ;;  %v2338_v7 = vld [vmem:[#allocation7 + $0x178] sm:$0xff]  ;;  %v2331_v55 = vld [vmem:[#allocation7 + $0x140] sm:$0xff] }
 0x73c   :  { %2441 = vmatprep.mubr.f32.mxu0 %v5763_v0  ;;  %2554 = vmatprep.mubr.f32.mxu1 %v5763_v0  ;;  %v2335_v51 = vld [vmem:[#allocation7 + $0x160] sm:$0xff]  ;;  %v4819_v9 = vpack.c.bf16 %v2338_v7, %v2334_v23 }
 0x73d   :  { %v4789_v25 = vpack.c.bf16 %v2335_v51, %v2331_v55  ;;  %v2647_v23 = vld [vmem:[#allocation9 + $0x40] sm:$0xff]  ;;  %v2649_v55 = vld [vmem:[#allocation9 + $0x50] sm:$0xff] }
 0x73e   :  { %4774 = vmatpush1.bf16.msra.mxu0 %v4773_v17  ;;  %4806 = vmatpush1.bf16.msra.mxu1 %v4805_v21  ;;  %v2342_v17 = vld [vmem:[#allocation7 + $0x198] sm:$0xff]  ;;  %v2651_v7 = vld [vmem:[#allocation9 + $0x60] sm:$0xff]  ;;  %v2653_v51 = vld [vmem:[#allocation9 + $0x70] sm:$0xff] }
 0x73f   :  { %4776 = vmatprep.subr.bf16.mxu0 %v4775_v47  ;;  %4808 = vmatprep.subr.bf16.mxu1 %v4807_v63  ;;  %v2346_v21 = vld [vmem:[#allocation7 + $0x1b8] sm:$0xff]  ;;  %v2339_v47 = vld [vmem:[#allocation7 + $0x180] sm:$0xff] }
 0x740   :  { %v2343_v63 = vld [vmem:[#allocation7 + $0x1a0] sm:$0xff]  ;;  %v4823_v19 = vpack.c.bf16 %v2346_v21, %v2342_v17 }
 0x741   :  { %v4793_v28 = vpack.c.bf16 %v2343_v63, %v2339_v47  ;;  %v2655_v17 = vld [vmem:[#allocation9 + $0x80] sm:$0xff]  ;;  %v2657_v47 = vld [vmem:[#allocation9 + $0x90] sm:$0xff] }
 0x742   :  { %4778 = vmatpush1.bf16.msra.mxu0 %v4777_v13  ;;  %4810 = vmatpush1.bf16.msra.mxu1 %v4809_v18  ;;  %v2350_v13 = vld [vmem:[#allocation7 + $0x1d8] sm:$0xff]  ;;  %v2659_v21 = vld [vmem:[#allocation9 + $0xa0] sm:$0xff]  ;;  %v2661_v63 = vld [vmem:[#allocation9 + $0xb0] sm:$0xff] }
 0x743   :  { %4780 = vmatprep.subr.bf16.mxu0 %v4779_v59  ;;  %4812 = vmatprep.subr.bf16.mxu1 %v4811_v29  ;;  %v2354_v18 = vld [vmem:[#allocation7 + $0x1f8] sm:$0xff]  ;;  %v2347_v59 = vld [vmem:[#allocation7 + $0x1c0] sm:$0xff]  ;;  %v4795_v29 = vpack.c.bf16 %v2352_v5, %v2348_v48 }
 0x744   :  { %v4827_v37 = vpack.c.bf16 %v2354_v18, %v2350_v13  ;;  %v4797_v30 = vpack.c.bf16 %v2351_v27, %v2347_v59  ;;  %v2670_v5 = vld [vmem:[#allocation9 + $0xf8] sm:$0xff]  ;;  %v2663_v13 = vld [vmem:[#allocation9 + $0xc0] sm:$0xff]  ;;  %v2665_v59 = vld [vmem:[#allocation9 + $0xd0] sm:$0xff] }
 0x745   :  { %v2667_v18 = vld [vmem:[#allocation9 + $0xe0] sm:$0xff]  ;;  %v2672_v27 = vld [vmem:[#allocation9 + $0x108] sm:$0xff] }
 0x746   :  { %4782 = vmatpush1.bf16.msra.mxu0 %v4781_v14  ;;  %4814 = vmatpush1.bf16.msra.mxu1 %v4813_v24  ;;  %v2639_v14 = vld [vmem:[#allocation9] sm:$0xff] }
 0x747   :  { %4784 = vmatprep.subr.bf16.mxu0 %v4783_v32  ;;  %4816 = vmatprep.subr.bf16.mxu1 %v4815_v12  ;;  %v2645_v32 = vld [vmem:[#allocation9 + $0x30] sm:$0xff]  ;;  %v2648_v12 = vld [vmem:[#allocation9 + $0x48] sm:$0xff] }
 0x748   :  { %v6565_v2 = vpack.c.bf16 %v2652_v56, %v2648_v12  ;;  %v2684_v12 = vld [vmem:[#allocation9 + $0x168] sm:$0xff]  ;;  %v2682_v56 = vld [vmem:[#allocation9 + $0x158] sm:$0xff] }
 0x74a   :  { %4786 = vmatpush1.bf16.msra.mxu0 %v4785_v33  ;;  %4818 = vmatpush1.bf16.msra.mxu1 %v4817_v31  ;;  %v6567_v33 = vpack.c.bf16 %v2654_v16, %v2650_v60  ;;  %v6569_v31 = vpack.c.bf16 %v2651_v7, %v2647_v23  ;;  %v2686_v60 = vld [vmem:[#allocation9 + $0x178] sm:$0xff]  ;;  %v2679_v7 = vld [vmem:[#allocation9 + $0x140] sm:$0xff] }
 0x74b   :  { %4788 = vmatprep.subr.bf16.mxu0 %v4787_v15  ;;  %4820 = vmatprep.subr.bf16.mxu1 %v4819_v9  ;;  %v6572_v15 = vpack.c.bf16 %v2653_v51, %v2649_v55  ;;  %v2656_v9 = vld [vmem:[#allocation9 + $0x88] sm:$0xff]  ;;  %v6614_v23 = vpack.c.bf16 %v2686_v60, %v2682_v56  ;;  %v2683_v55 = vld [vmem:[#allocation9 + $0x160] sm:$0xff]  ;;  %v2681_v51 = vld [vmem:[#allocation9 + $0x150] sm:$0xff] }
 0x74c   :  { %v6577_v58 = vpack.c.bf16 %v2660_v36, %v2656_v9  ;;  %v6617_v9 = vpack.c.bf16 %v2683_v55, %v2679_v7  ;;  %v2685_v36 = vld [vmem:[#allocation9 + $0x170] sm:$0xff] }
 0x74e   :  { %4790 = vmatpush1.bf16.msra.mxu0 %v4789_v25  ;;  %4822 = vmatpush1.bf16.msra.mxu1 %v4821_v34  ;;  %v6579_v25 = vpack.c.bf16 %v2662_v4, %v2658_v8  ;;  %v6581_v34 = vpack.c.bf16 %v2659_v21, %v2655_v17  ;;  %v2688_v8 = vld [vmem:[#allocation9 + $0x188] sm:$0xff]  ;;  %v6621_v17 = vpack.c.bf16 %v2685_v36, %v2681_v51 }
 0x74f   :  { %4792 = vmatprep.subr.bf16.mxu0 %v4791_v6  ;;  %4824 = vmatprep.subr.bf16.mxu1 %v4823_v19  ;;  %v6584_v6 = vpack.c.bf16 %v2661_v63, %v2657_v47  ;;  %v2664_v19 = vld [vmem:[#allocation9 + $0xc8] sm:$0xff]  ;;  %v2690_v47 = vld [vmem:[#allocation9 + $0x198] sm:$0xff] }
 0x750   :  { %v6589_v48 = vpack.c.bf16 %v2668_v40, %v2664_v19  ;;  %v2692_v4 = vld [vmem:[#allocation9 + $0x1a8] sm:$0xff]  ;;  %v2694_v63 = vld [vmem:[#allocation9 + $0x1b8] sm:$0xff]  ;;  %v2687_v19 = vld [vmem:[#allocation9 + $0x180] sm:$0xff] }
 0x751   :  { %v6623_v21 = vpack.c.bf16 %v2692_v4, %v2688_v8  ;;  %v6625_v40 = vpack.c.bf16 %v2694_v63, %v2690_v47 }
 0x752   :  { %4794 = vmatpush1.bf16.msra.mxu0 %v4793_v28  ;;  %4826 = vmatpush1.bf16.msra.mxu1 %v4825_v41  ;;  %v6591_v28 = vpack.c.bf16 %v2670_v5, %v2666_v39  ;;  %v6593_v41 = vpack.c.bf16 %v2667_v18, %v2663_v13  ;;  %v2691_v39 = vld [vmem:[#allocation9 + $0x1a0] sm:$0xff]  ;;  %v2689_v5 = vld [vmem:[#allocation9 + $0x190] sm:$0xff] }
 0x753   :  { %4796 = vmatprep.subr.bf16.mxu0 %v4795_v29  ;;  %4828 = vmatprep.subr.bf16.mxu1 %v4827_v37  ;;  %v2669_v29 = vld [vmem:[#allocation9 + $0xf0] sm:$0xff]  ;;  %v6628_v18 = vpack.c.bf16 %v2691_v39, %v2687_v19 }
 0x754   :  { %v6596_v37 = vpack.c.bf16 %v2669_v29, %v2665_v59  ;;  %v2693_v13 = vld [vmem:[#allocation9 + $0x1b0] sm:$0xff]  ;;  %v2696_v29 = vld [vmem:[#allocation9 + $0x1c8] sm:$0xff] }
 0x755   :  { %v6632_v59 = vpack.c.bf16 %v2693_v13, %v2689_v5 }
 0x756   :  { %4798 = vmatpush1.bf16.msra.mxu0 %v4797_v30  ;;  %4830 = vmatpush1.bf16.msra.mxu1 %v4829_v3  ;;  %v6601_v30 = vpack.c.bf16 %v2676_v38, %v2672_v27  ;;  %v2678_v3 = vld [vmem:[#allocation9 + $0x138] sm:$0xff]  ;;  %v2700_v27 = vld [vmem:[#allocation9 + $0x1e8] sm:$0xff] }
 0x757   :  { %v2698_v38 = vld [vmem:[#allocation9 + $0x1d8] sm:$0xff] }
 0x759   :  { %2442 = vmatmul.mubr.f32.vlgmr.msra.gmra.mrb[16].mxu0 %v6189_v54  ;;  %2555 = vmatmul.mubr.f32.vlgmr.msra.gmra.mrb[16].mxu1 %v6189_v54  ;;  %v2640_v54 = vld [vmem:[#allocation9 + $0x8] sm:$0xff] }
 0x75a   :  { %2447 = vmatprep.mubr.f32.mxu0 %v5763_v0  ;;  %2560 = vmatprep.mubr.f32.mxu1 %v5763_v0 }
 0x75d   :  { %2448 = vmatmul.mubr.f32.gmra.mrb[18].mxu0 %v6233_v43  ;;  %2561 = vmatmul.mubr.f32.gmra.mrb[18].mxu1 %v6233_v43  ;;  %v2644_v43 = vld [vmem:[#allocation9 + $0x28] sm:$0xff] }
 0x75e   :  { %2453 = vmatprep.mubr.f32.mxu0 %v5763_v0  ;;  %2566 = vmatprep.mubr.f32.mxu1 %v5763_v0 }
 0x761   :  { %2454 = vmatmul.mubr.f32.gmra.mrb[20].mxu0 %v6297_v35  ;;  %2567 = vmatmul.mubr.f32.gmra.mrb[20].mxu1 %v6297_v35  ;;  %v2642_v35 = vld [vmem:[#allocation9 + $0x18] sm:$0xff] }
 0x762   :  { %2459 = vmatprep.mubr.f32.mxu0 %v5763_v0  ;;  %2572 = vmatprep.mubr.f32.mxu1 %v5763_v0 }
 0x765   :  { %2460 = vmatmul.mubr.f32.gmra.mrb[22].mxu0 %v6391_v26  ;;  %2573 = vmatmul.mubr.f32.gmra.mrb[22].mxu1 %v6391_v26  ;;  %v6553_v26 = vpack.c.bf16 %v2644_v43, %v2640_v54  ;;  %v2671_v54 = vld [vmem:[#allocation9 + $0x100] sm:$0xff] }
 0x766   :  { %2465 = vmatprep.mubr.f32.mxu0 %v5763_v0  ;;  %2578 = vmatprep.mubr.f32.mxu1 %v5763_v0  ;;  %v2675_v43 = vld [vmem:[#allocation9 + $0x120] sm:$0xff] }
 0x767   :  { %4832 = vmatprep.subr.bf16.mxu0 %v6553_v26 }
 0x769   :  { %2466 = vmatmul.mubr.f32.gmra.mrb[24].mxu0 %v6437_v10  ;;  %2579 = vmatmul.mubr.f32.gmra.mrb[24].mxu1 %v6437_v10  ;;  %v2646_v10 = vld [vmem:[#allocation9 + $0x38] sm:$0xff] }
 0x76a   :  { %2471 = vmatprep.mubr.f32.mxu0 %v5763_v0  ;;  %2584 = vmatprep.mubr.f32.mxu1 %v5763_v0  ;;  %v6555_v24 = vpack.c.bf16 %v2646_v10, %v2642_v35  ;;  %v6603_v35 = vpack.c.bf16 %v2678_v3, %v2674_v20  ;;  %v6605_v10 = vpack.c.bf16 %v2675_v43, %v2671_v54  ;;  %v2702_v3 = vld [vmem:[#allocation9 + $0x1f8] sm:$0xff]  ;;  %v2695_v54 = vld [vmem:[#allocation9 + $0x1c0] sm:$0xff] }
 0x76b   :  { %v6637_v20 = vpack.c.bf16 %v2700_v27, %v2696_v29  ;;  %v2699_v43 = vld [vmem:[#allocation9 + $0x1e0] sm:$0xff] }
 0x76c   :  { %4864 = vmatprep.subr.bf16.mxu1 %v6555_v24 }
 0x76d   :  { %2472 = vmatmul.mubr.f32.gmra.mrb[26].mxu0 %v6481_v1  ;;  %2585 = vmatmul.mubr.f32.gmra.mrb[26].mxu1 %v6481_v1  ;;  %v2643_v1 = vld [vmem:[#allocation9 + $0x20] sm:$0xff] }
 0x76e   :  { %2477 = vmatprep.mubr.f32.mxu0 %v5763_v0  ;;  %2590 = vmatprep.mubr.f32.mxu1 %v5763_v0  ;;  %v6557_v42 = vpack.c.bf16 %v2643_v1, %v2639_v14  ;;  %v2673_v14 = vld [vmem:[#allocation9 + $0x110] sm:$0xff] }
 0x76f   :  { %v2677_v1 = vld [vmem:[#allocation9 + $0x130] sm:$0xff] }
 0x770   :  { %4834 = vmatpush1.bf16.msra.mxu0 %v6557_v42 }
 0x771   :  { %2478 = vmatmul.mubr.f32.gmra.mrb[28].mxu0 %v6519_v44  ;;  %2591 = vmatmul.mubr.f32.gmra.mrb[28].mxu1 %v6519_v44  ;;  %v6560_v44 = vpack.c.bf16 %v2645_v32, %v2641_v62  ;;  %v2680_v62 = vld [vmem:[#allocation9 + $0x148] sm:$0xff]  ;;  %v6608_v32 = vpack.c.bf16 %v2677_v1, %v2673_v14  ;;  %v6639_v14 = vpack.c.bf16 %v2702_v3, %v2698_v38 }
 0x772   :  { %2483 = vmatprep.mubr.f32.mxu0 %v5763_v0  ;;  %2596 = vmatprep.mubr.f32.mxu1 %v5763_v0  ;;  %v6612_v16 = vpack.c.bf16 %v2684_v12, %v2680_v62  ;;  %v6641_v1 = vpack.c.bf16 %v2699_v43, %v2695_v54  ;;  %v2697_v62 = vld [vmem:[#allocation9 + $0x1d0] sm:$0xff] }
 0x773   :  { %4866 = vmatpush1.bf16.msra.mxu1 %v6560_v44  ;;  %4836 = vmatprep.subr.bf16.mxu0 %v6565_v2  ;;  %v2701_v12 = vld [vmem:[#allocation9 + $0x1f0] sm:$0xff] }
 0x774   :  { %4868 = vmatprep.subr.bf16.mxu1 %v6567_v33  ;;  %4838 = vmatpush1.bf16.msra.mxu0 %v6569_v31  ;;  %v6644_v56 = vpack.c.bf16 %v2701_v12, %v2697_v62 }
 0x775   :  { %4840 = vmatprep.subr.bf16.mxu0 %v6577_v58 }
 0x777   :  { %4870 = vmatpush1.bf16.msra.mxu1 %v6572_v15 }
 0x778   :  { %4872 = vmatprep.subr.bf16.mxu1 %v6579_v25  ;;  %4842 = vmatpush1.bf16.msra.mxu0 %v6581_v34 }
 0x779   :  { %4844 = vmatprep.subr.bf16.mxu0 %v6589_v48 }
 0x77b   :  { %4874 = vmatpush1.bf16.msra.mxu1 %v6584_v6 }
 0x77c   :  { %4876 = vmatprep.subr.bf16.mxu1 %v6591_v28  ;;  %4846 = vmatpush1.bf16.msra.mxu0 %v6593_v41 }
 0x77d   :  { %4848 = vmatprep.subr.bf16.mxu0 %v6601_v30 }
 0x77f   :  { %4878 = vmatpush1.bf16.msra.mxu1 %v6596_v37 }
 0x780   :  { %4880 = vmatprep.subr.bf16.mxu1 %v6603_v35  ;;  %4850 = vmatpush1.bf16.msra.mxu0 %v6605_v10 }
 0x781   :  { %4852 = vmatprep.subr.bf16.mxu0 %v6612_v16 }
 0x783   :  { %4882 = vmatpush1.bf16.msra.mxu1 %v6608_v32 }
 0x784   :  { %4884 = vmatprep.subr.bf16.mxu1 %v6614_v23  ;;  %4854 = vmatpush1.bf16.msra.mxu0 %v6617_v9 }
 0x785   :  { %4856 = vmatprep.subr.bf16.mxu0 %v6623_v21 }
 0x787   :  { %4886 = vmatpush1.bf16.msra.mxu1 %v6621_v17 }
 0x788   :  { %4888 = vmatprep.subr.bf16.mxu1 %v6625_v40  ;;  %4858 = vmatpush1.bf16.msra.mxu0 %v6628_v18 }
 0x789   :  { %4860 = vmatprep.subr.bf16.mxu0 %v6637_v20 }
 0x78b   :  { %4890 = vmatpush1.bf16.msra.mxu1 %v6632_v59 }
 0x78c   :  { %4892 = vmatprep.subr.bf16.mxu1 %v6639_v14  ;;  %4862 = vmatpush1.bf16.msra.mxu0 %v6641_v1 }
 0x78d   :  { %4896 = vmatprep.subr.bf16.mxu0 %v6553_v26 }
 0x78f   :  { %4894 = vmatpush1.bf16.msra.mxu1 %v6644_v56 }
 0x790   :  { %4928 = vmatprep.subr.bf16.mxu1 %v6555_v24 }
 0x80c   :  { %v2184_v60 = vpop.f32.mrb[14].mxu0  ;;  %v2255_v7 = vpop.f32.mrb[14].mxu1 }
 0x80d   :  { %v5381_v55 = vadd.f32 %v2184_v60, %v6166_v50  ;;  %v2186_v51 = vpop.f32.mrb[15].mxu0  ;;  %v2257_v36 = vpop.f32.mrb[15].mxu1  ;;  %v5397_v63 = vadd.f32 %v2255_v7, %v6176_v57 }
 0x80e   :  { %v5382_v8 = vadd.f32 %v2186_v51, %v6171_v53  ;;  %v5398_v19 = vadd.f32 %v2257_v36, %v6183_v11  ;;  %v2355_v11 = vld [vmem:[%s7045_s6] sm:$0xf] }
 0x80f   :  { %v2264_v4 = vmul.f32 0.5, %v5381_v55  ;;  %v6703_v55 = vrot.slane %v2355_v11, %v122_v49  ;;  %v6714_v49 = vrot.slane %v2355_v11, %v130_v61 }
 0x810   :  { %v2268_v47 = vmul.f32 0.5, %v5382_v8  ;;  %v2273_v39 = vmul.f32 0.5, %v5398_v19 }
 0x811   :  { %5574 = vtanh.f32 %v2264_v4  ;;  %v6708_v4 = vrot.slane %v2355_v11, %v126_v52 }
 0x812   :  { %5576 = vtanh.f32 %v2268_v47 }
 0x813   :  { %5578 = vtanh.f32 %v5397_v63 }
 0x814   :  { %5580 = vtanh.f32 %v2273_v39 }
 0x81b   :  { %v5575_v5 = vpop.eup %5574 }
 0x81c   :  { %v5577_v13 = vpop.eup %5576  ;;  %v2266_v29 = vmul.f32 0.5, %v5575_v5 }
 0x81d   :  { %v2270_v27 = vmul.f32 0.5, %v5577_v13  ;;  %v5579_v38 = vpop.eup %5578 }
 0x81e   :  { %v2267_v50 = vadd.f32 0.5, %v2266_v29  ;;  %v5581_v62 = vpop.eup %5580 }
 0x81f   :  { %v2271_v3 = vadd.f32 0.5, %v2270_v27  ;;  %v2275_v57 = vmul.f32 0.5, %v5581_v62 }
 0x820   :  { %v2278_v54 = vmul.f32 %v5579_v38, %v2267_v50 }
 0x821   :  { %v2277_v53 = vmul.f32 %v2271_v3, %v6516_v22  ;;  %v2276_v12 = vadd.f32 0.5, %v2275_v57  ;;  %v6699_v22 = vrot.slane %v2355_v11, %v118_v46 }
 0x823   :  { %v2279_v43 = vadd.f32 %v2278_v54, %v2277_v53 }
 0x825   :  { %5582 = vtanh.f32 %v2279_v43 }
 0x82f   :  { %v5583_v60 = vpop.eup %5582 }
 0x830   :  { %v2281_v7 = vmul.f32 %v5583_v60, %v2276_v12 }
 0x832   :  { %2484 = vmatmul.mubr.f32.gmra.mrb[30].mxu0 %v2281_v7  ;;  %2597 = vmatmul.mubr.f32.gmra.mrb[30].mxu1 %v2281_v7 }
 0x833   :  { %2767 = vmatprep.mubr.f32.mxu0 %v5763_v0  ;;  %2838 = vmatprep.mubr.f32.mxu1 %v5763_v0 }
 0x836   :  { %2768 = vmatmul.mubr.f32.vlgmr.msra.gmra.mrb[16].mxu0 %v5763_v0  ;;  %2839 = vmatmul.mubr.f32.vlgmr.msra.gmra.mrb[16].mxu1 %v5763_v0 }
 0x837   :  { %4898 = vmatpush1.bf16.msra.mxu0 %v6557_v42  ;;  %4930 = vmatpush1.bf16.msra.mxu1 %v6560_v44 }
 0x838   :  { %4900 = vmatprep.subr.bf16.mxu0 %v6565_v2  ;;  %4932 = vmatprep.subr.bf16.mxu1 %v6567_v33 }
 0x839   :  { %2935 = vmatprep.mubr.f32.mxu0 %v5763_v0  ;;  %3006 = vmatprep.mubr.f32.mxu1 %v5763_v0 }
 0x83b   :  { %4902 = vmatpush1.bf16.msra.mxu0 %v6569_v31  ;;  %4934 = vmatpush1.bf16.msra.mxu1 %v6572_v15 }
 0x83c   :  { %4904 = vmatprep.subr.bf16.mxu0 %v6577_v58  ;;  %4936 = vmatprep.subr.bf16.mxu1 %v6579_v25 }
 0x83f   :  { %4906 = vmatpush1.bf16.msra.mxu0 %v6581_v34  ;;  %4938 = vmatpush1.bf16.msra.mxu1 %v6584_v6 }
 0x840   :  { %4908 = vmatprep.subr.bf16.mxu0 %v6589_v48  ;;  %4940 = vmatprep.subr.bf16.mxu1 %v6591_v28 }
 0x843   :  { %4910 = vmatpush1.bf16.msra.mxu0 %v6593_v41  ;;  %4942 = vmatpush1.bf16.msra.mxu1 %v6596_v37 }
 0x844   :  { %4912 = vmatprep.subr.bf16.mxu0 %v6601_v30  ;;  %4944 = vmatprep.subr.bf16.mxu1 %v6603_v35 }
 0x847   :  { %4914 = vmatpush1.bf16.msra.mxu0 %v6605_v10  ;;  %4946 = vmatpush1.bf16.msra.mxu1 %v6608_v32 }
 0x848   :  { %4916 = vmatprep.subr.bf16.mxu0 %v6612_v16  ;;  %4948 = vmatprep.subr.bf16.mxu1 %v6614_v23 }
 0x84b   :  { %4918 = vmatpush1.bf16.msra.mxu0 %v6617_v9  ;;  %4950 = vmatpush1.bf16.msra.mxu1 %v6621_v17 }
 0x84c   :  { %4920 = vmatprep.subr.bf16.mxu0 %v6623_v21  ;;  %4952 = vmatprep.subr.bf16.mxu1 %v6625_v40 }
 0x84f   :  { %4922 = vmatpush1.bf16.msra.mxu0 %v6628_v18  ;;  %4954 = vmatpush1.bf16.msra.mxu1 %v6632_v59 }
 0x850   :  { %4924 = vmatprep.subr.bf16.mxu0 %v6637_v20  ;;  %4956 = vmatprep.subr.bf16.mxu1 %v6639_v14 }
 0x853   :  { %4926 = vmatpush1.bf16.msra.mxu0 %v6641_v1  ;;  %4958 = vmatpush1.bf16.msra.mxu1 %v6644_v56 }
 0x854   :  { %4960 = vmatprep.subr.bf16.mxu0 %v6553_v26  ;;  %4992 = vmatprep.subr.bf16.mxu1 %v6555_v24 }
 0x909   :  { %v2769_v51 = vpop.f32.mrb[16].mxu0  ;;  %v2840_v36 = vpop.f32.mrb[16].mxu1 }
 0x90a   :  { %v5399_v8 = vadd.f32 %v2769_v51, %v6699_v22  ;;  %v2771_v47 = vpop.f32.mrb[17].mxu0  ;;  %v2842_v63 = vpop.f32.mrb[17].mxu1  ;;  %v5415_v46 = vadd.f32 %v2840_v36, %v6708_v4 }
 0x90b   :  { %v5400_v19 = vadd.f32 %v2771_v47, %v6703_v55  ;;  %v5416_v13 = vadd.f32 %v2842_v63, %v6714_v49 }
 0x90c   :  { %v2849_v39 = vmul.f32 0.5, %v5399_v8 }
 0x90d   :  { %v2853_v5 = vmul.f32 0.5, %v5400_v19  ;;  %v2858_v29 = vmul.f32 0.5, %v5416_v13 }
 0x90e   :  { %5584 = vtanh.f32 %v2849_v39 }
 0x90f   :  { %5586 = vtanh.f32 %v2853_v5 }
 0x910   :  { %5588 = vtanh.f32 %v5415_v46 }
 0x911   :  { %5590 = vtanh.f32 %v2858_v29 }
 0x918   :  { %v5585_v52 = vpop.eup %5584 }
 0x919   :  { %v5587_v27 = vpop.eup %5586  ;;  %v2851_v50 = vmul.f32 0.5, %v5585_v52 }
 0x91a   :  { %v2855_v38 = vmul.f32 0.5, %v5587_v27  ;;  %v5589_v54 = vpop.eup %5588 }
 0x91b   :  { %v2852_v3 = vadd.f32 0.5, %v2851_v50  ;;  %v5591_v45 = vpop.eup %5590 }
 0x91c   :  { %v2856_v53 = vadd.f32 0.5, %v2855_v38  ;;  %v2860_v61 = vmul.f32 0.5, %v5591_v45 }
 0x91d   :  { %v2863_v43 = vmul.f32 %v5589_v54, %v2852_v3 }
 0x91e   :  { %v2862_v62 = vmul.f32 0.0, %v2856_v53  ;;  %v2861_v12 = vadd.f32 0.5, %v2860_v61 }
 0x920   :  { %v6717_v57 = vadd.f32 %v2863_v43, %v2862_v62 }
 0x922   :  { %5592 = vtanh.f32 %v6717_v57 }
 0x92c   :  { %v5593_v60 = vpop.eup %5592 }
 0x92d   :  { %v2866_v7 = vmul.f32 %v5593_v60, %v2861_v12 }
 0x92f   :  { %2936 = vmatmul.mubr.f32.vlgmr.msra.gmra.mrb[18].mxu0 %v2866_v7  ;;  %3007 = vmatmul.mubr.f32.vlgmr.msra.gmra.mrb[18].mxu1 %v2866_v7 }
 0x930   :  { %4962 = vmatpush1.bf16.msra.mxu0 %v6557_v42  ;;  %4994 = vmatpush1.bf16.msra.mxu1 %v6560_v44 }
 0x931   :  { %4964 = vmatprep.subr.bf16.mxu0 %v6565_v2  ;;  %4996 = vmatprep.subr.bf16.mxu1 %v6567_v33 }
 0x932   :  { %3103 = vmatprep.mubr.f32.mxu0 %v5763_v0  ;;  %3174 = vmatprep.mubr.f32.mxu1 %v5763_v0 }
 0x934   :  { %4966 = vmatpush1.bf16.msra.mxu0 %v6569_v31  ;;  %4998 = vmatpush1.bf16.msra.mxu1 %v6572_v15 }
 0x935   :  { %4968 = vmatprep.subr.bf16.mxu0 %v6577_v58  ;;  %5000 = vmatprep.subr.bf16.mxu1 %v6579_v25 }
 0x938   :  { %4970 = vmatpush1.bf16.msra.mxu0 %v6581_v34  ;;  %5002 = vmatpush1.bf16.msra.mxu1 %v6584_v6 }
 0x939   :  { %4972 = vmatprep.subr.bf16.mxu0 %v6589_v48  ;;  %5004 = vmatprep.subr.bf16.mxu1 %v6591_v28 }
 0x93c   :  { %4974 = vmatpush1.bf16.msra.mxu0 %v6593_v41  ;;  %5006 = vmatpush1.bf16.msra.mxu1 %v6596_v37 }
 0x93d   :  { %4976 = vmatprep.subr.bf16.mxu0 %v6601_v30  ;;  %5008 = vmatprep.subr.bf16.mxu1 %v6603_v35 }
 0x940   :  { %4978 = vmatpush1.bf16.msra.mxu0 %v6605_v10  ;;  %5010 = vmatpush1.bf16.msra.mxu1 %v6608_v32 }
 0x941   :  { %4980 = vmatprep.subr.bf16.mxu0 %v6612_v16  ;;  %5012 = vmatprep.subr.bf16.mxu1 %v6614_v23 }
 0x944   :  { %4982 = vmatpush1.bf16.msra.mxu0 %v6617_v9  ;;  %5014 = vmatpush1.bf16.msra.mxu1 %v6621_v17 }
 0x945   :  { %4984 = vmatprep.subr.bf16.mxu0 %v6623_v21  ;;  %5016 = vmatprep.subr.bf16.mxu1 %v6625_v40 }
 0x948   :  { %4986 = vmatpush1.bf16.msra.mxu0 %v6628_v18  ;;  %5018 = vmatpush1.bf16.msra.mxu1 %v6632_v59 }
 0x949   :  { %4988 = vmatprep.subr.bf16.mxu0 %v6637_v20  ;;  %5020 = vmatprep.subr.bf16.mxu1 %v6639_v14 }
 0x94c   :  { %4990 = vmatpush1.bf16.msra.mxu0 %v6641_v1  ;;  %5022 = vmatpush1.bf16.msra.mxu1 %v6644_v56 }
 0x94d   :  { %5024 = vmatprep.subr.bf16.mxu0 %v6553_v26  ;;  %5056 = vmatprep.subr.bf16.mxu1 %v6555_v24 }
 0xa02   :  { %v2937_v11 = vpop.f32.mrb[18].mxu0  ;;  %v3008_v51 = vpop.f32.mrb[18].mxu1 }
 0xa03   :  { %v5401_v36 = vadd.f32 %v2937_v11, %v6699_v22  ;;  %v2939_v8 = vpop.f32.mrb[19].mxu0  ;;  %v3010_v47 = vpop.f32.mrb[19].mxu1  ;;  %v5417_v5 = vadd.f32 %v3008_v51, %v6708_v4 }
 0xa04   :  { %v5402_v63 = vadd.f32 %v2939_v8, %v6703_v55  ;;  %v5418_v46 = vadd.f32 %v3010_v47, %v6714_v49 }
 0xa05   :  { %v3017_v19 = vmul.f32 0.5, %v5401_v36 }
 0xa06   :  { %v3021_v39 = vmul.f32 0.5, %v5402_v63  ;;  %v3026_v13 = vmul.f32 0.5, %v5418_v46 }
 0xa07   :  { %5594 = vtanh.f32 %v3017_v19 }
 0xa08   :  { %5596 = vtanh.f32 %v3021_v39 }
 0xa09   :  { %5598 = vtanh.f32 %v5417_v5 }
 0xa0a   :  { %5600 = vtanh.f32 %v3026_v13 }
 0xa11   :  { %v5595_v29 = vpop.eup %5594 }
 0xa12   :  { %v5597_v52 = vpop.eup %5596  ;;  %v3019_v27 = vmul.f32 0.5, %v5595_v29 }
 0xa13   :  { %v3023_v50 = vmul.f32 0.5, %v5597_v52  ;;  %v5599_v3 = vpop.eup %5598 }
 0xa14   :  { %v3020_v38 = vadd.f32 0.5, %v3019_v27  ;;  %v5601_v45 = vpop.eup %5600 }
 0xa15   :  { %v3024_v54 = vadd.f32 0.5, %v3023_v50  ;;  %v3028_v61 = vmul.f32 0.5, %v5601_v45 }
 0xa16   :  { %v3031_v53 = vmul.f32 %v5599_v3, %v3020_v38 }
 0xa17   :  { %v3030_v43 = vmul.f32 %v3024_v54, %v6717_v57  ;;  %v3029_v12 = vadd.f32 0.5, %v3028_v61 }
 0xa19   :  { %v6759_v62 = vadd.f32 %v3031_v53, %v3030_v43 }
 0xa1b   :  { %5602 = vtanh.f32 %v6759_v62 }
 0xa25   :  { %v5603_v60 = vpop.eup %5602 }
 0xa26   :  { %v3034_v7 = vmul.f32 %v5603_v60, %v3029_v12 }
 0xa28   :  { %3104 = vmatmul.mubr.f32.vlgmr.msra.gmra.mrb[20].mxu0 %v3034_v7  ;;  %3175 = vmatmul.mubr.f32.vlgmr.msra.gmra.mrb[20].mxu1 %v3034_v7 }
 0xa29   :  { %5026 = vmatpush1.bf16.msra.mxu0 %v6557_v42  ;;  %5058 = vmatpush1.bf16.msra.mxu1 %v6560_v44 }
 0xa2a   :  { %5028 = vmatprep.subr.bf16.mxu0 %v6565_v2  ;;  %5060 = vmatprep.subr.bf16.mxu1 %v6567_v33 }
 0xa2b   :  { %3271 = vmatprep.mubr.f32.mxu0 %v5763_v0  ;;  %3342 = vmatprep.mubr.f32.mxu1 %v5763_v0 }
 0xa2d   :  { %5030 = vmatpush1.bf16.msra.mxu0 %v6569_v31  ;;  %5062 = vmatpush1.bf16.msra.mxu1 %v6572_v15 }
 0xa2e   :  { %5032 = vmatprep.subr.bf16.mxu0 %v6577_v58  ;;  %5064 = vmatprep.subr.bf16.mxu1 %v6579_v25 }
 0xa31   :  { %5034 = vmatpush1.bf16.msra.mxu0 %v6581_v34  ;;  %5066 = vmatpush1.bf16.msra.mxu1 %v6584_v6 }
 0xa32   :  { %5036 = vmatprep.subr.bf16.mxu0 %v6589_v48  ;;  %5068 = vmatprep.subr.bf16.mxu1 %v6591_v28 }
 0xa35   :  { %5038 = vmatpush1.bf16.msra.mxu0 %v6593_v41  ;;  %5070 = vmatpush1.bf16.msra.mxu1 %v6596_v37 }
 0xa36   :  { %5040 = vmatprep.subr.bf16.mxu0 %v6601_v30  ;;  %5072 = vmatprep.subr.bf16.mxu1 %v6603_v35 }
 0xa39   :  { %5042 = vmatpush1.bf16.msra.mxu0 %v6605_v10  ;;  %5074 = vmatpush1.bf16.msra.mxu1 %v6608_v32 }
 0xa3a   :  { %5044 = vmatprep.subr.bf16.mxu0 %v6612_v16  ;;  %5076 = vmatprep.subr.bf16.mxu1 %v6614_v23 }
 0xa3d   :  { %5046 = vmatpush1.bf16.msra.mxu0 %v6617_v9  ;;  %5078 = vmatpush1.bf16.msra.mxu1 %v6621_v17 }
 0xa3e   :  { %5048 = vmatprep.subr.bf16.mxu0 %v6623_v21  ;;  %5080 = vmatprep.subr.bf16.mxu1 %v6625_v40 }
 0xa41   :  { %5050 = vmatpush1.bf16.msra.mxu0 %v6628_v18  ;;  %5082 = vmatpush1.bf16.msra.mxu1 %v6632_v59 }
 0xa42   :  { %5052 = vmatprep.subr.bf16.mxu0 %v6637_v20  ;;  %5084 = vmatprep.subr.bf16.mxu1 %v6639_v14 }
 0xa45   :  { %5054 = vmatpush1.bf16.msra.mxu0 %v6641_v1  ;;  %5086 = vmatpush1.bf16.msra.mxu1 %v6644_v56 }
 0xa46   :  { %5088 = vmatprep.subr.bf16.mxu0 %v6553_v26  ;;  %5120 = vmatprep.subr.bf16.mxu1 %v6555_v24 }
 0xafb   :  { %v3105_v57 = vpop.f32.mrb[20].mxu0  ;;  %v3176_v11 = vpop.f32.mrb[20].mxu1 }
 0xafc   :  { %v5403_v51 = vadd.f32 %v3105_v57, %v6699_v22  ;;  %v3107_v36 = vpop.f32.mrb[21].mxu0  ;;  %v3178_v8 = vpop.f32.mrb[21].mxu1  ;;  %v5419_v39 = vadd.f32 %v3176_v11, %v6708_v4 }
 0xafd   :  { %v5404_v47 = vadd.f32 %v3107_v36, %v6703_v55  ;;  %v5420_v5 = vadd.f32 %v3178_v8, %v6714_v49 }
 0xafe   :  { %v3185_v63 = vmul.f32 0.5, %v5403_v51 }
 0xaff   :  { %v3189_v19 = vmul.f32 0.5, %v5404_v47  ;;  %v3194_v46 = vmul.f32 0.5, %v5420_v5 }
 0xb00   :  { %5604 = vtanh.f32 %v3185_v63 }
 0xb01   :  { %5606 = vtanh.f32 %v3189_v19 }
 0xb02   :  { %5608 = vtanh.f32 %v5419_v39 }
 0xb03   :  { %5610 = vtanh.f32 %v3194_v46 }
 0xb0a   :  { %v5605_v13 = vpop.eup %5604 }
 0xb0b   :  { %v5607_v29 = vpop.eup %5606  ;;  %v3187_v52 = vmul.f32 0.5, %v5605_v13 }
 0xb0c   :  { %v3191_v27 = vmul.f32 0.5, %v5607_v29  ;;  %v5609_v38 = vpop.eup %5608 }
 0xb0d   :  { %v3188_v50 = vadd.f32 0.5, %v3187_v52  ;;  %v5611_v45 = vpop.eup %5610 }
 0xb0e   :  { %v3192_v3 = vadd.f32 0.5, %v3191_v27  ;;  %v3196_v61 = vmul.f32 0.5, %v5611_v45 }
 0xb0f   :  { %v3199_v54 = vmul.f32 %v5609_v38, %v3188_v50 }
 0xb10   :  { %v3198_v53 = vmul.f32 %v3192_v3, %v6759_v62  ;;  %v3197_v12 = vadd.f32 0.5, %v3196_v61 }
 0xb12   :  { %v6801_v43 = vadd.f32 %v3199_v54, %v3198_v53 }
 0xb14   :  { %5612 = vtanh.f32 %v6801_v43 }
 0xb1e   :  { %v5613_v60 = vpop.eup %5612 }
 0xb1f   :  { %v3202_v7 = vmul.f32 %v5613_v60, %v3197_v12 }
 0xb21   :  { %3272 = vmatmul.mubr.f32.vlgmr.msra.gmra.mrb[22].mxu0 %v3202_v7  ;;  %3343 = vmatmul.mubr.f32.vlgmr.msra.gmra.mrb[22].mxu1 %v3202_v7 }
 0xb22   :  { %5090 = vmatpush1.bf16.msra.mxu0 %v6557_v42  ;;  %5122 = vmatpush1.bf16.msra.mxu1 %v6560_v44 }
 0xb23   :  { %5092 = vmatprep.subr.bf16.mxu0 %v6565_v2  ;;  %5124 = vmatprep.subr.bf16.mxu1 %v6567_v33 }
 0xb24   :  { %3439 = vmatprep.mubr.f32.mxu0 %v5763_v0  ;;  %3510 = vmatprep.mubr.f32.mxu1 %v5763_v0 }
 0xb26   :  { %5094 = vmatpush1.bf16.msra.mxu0 %v6569_v31  ;;  %5126 = vmatpush1.bf16.msra.mxu1 %v6572_v15 }
 0xb27   :  { %5096 = vmatprep.subr.bf16.mxu0 %v6577_v58  ;;  %5128 = vmatprep.subr.bf16.mxu1 %v6579_v25 }
 0xb2a   :  { %5098 = vmatpush1.bf16.msra.mxu0 %v6581_v34  ;;  %5130 = vmatpush1.bf16.msra.mxu1 %v6584_v6 }
 0xb2b   :  { %5100 = vmatprep.subr.bf16.mxu0 %v6589_v48  ;;  %5132 = vmatprep.subr.bf16.mxu1 %v6591_v28 }
 0xb2e   :  { %5102 = vmatpush1.bf16.msra.mxu0 %v6593_v41  ;;  %5134 = vmatpush1.bf16.msra.mxu1 %v6596_v37 }
 0xb2f   :  { %5104 = vmatprep.subr.bf16.mxu0 %v6601_v30  ;;  %5136 = vmatprep.subr.bf16.mxu1 %v6603_v35 }
 0xb32   :  { %5106 = vmatpush1.bf16.msra.mxu0 %v6605_v10  ;;  %5138 = vmatpush1.bf16.msra.mxu1 %v6608_v32 }
 0xb33   :  { %5108 = vmatprep.subr.bf16.mxu0 %v6612_v16  ;;  %5140 = vmatprep.subr.bf16.mxu1 %v6614_v23 }
 0xb36   :  { %5110 = vmatpush1.bf16.msra.mxu0 %v6617_v9  ;;  %5142 = vmatpush1.bf16.msra.mxu1 %v6621_v17 }
 0xb37   :  { %5112 = vmatprep.subr.bf16.mxu0 %v6623_v21  ;;  %5144 = vmatprep.subr.bf16.mxu1 %v6625_v40 }
 0xb3a   :  { %5114 = vmatpush1.bf16.msra.mxu0 %v6628_v18  ;;  %5146 = vmatpush1.bf16.msra.mxu1 %v6632_v59 }
 0xb3b   :  { %5116 = vmatprep.subr.bf16.mxu0 %v6637_v20  ;;  %5148 = vmatprep.subr.bf16.mxu1 %v6639_v14 }
 0xb3e   :  { %5118 = vmatpush1.bf16.msra.mxu0 %v6641_v1  ;;  %5150 = vmatpush1.bf16.msra.mxu1 %v6644_v56 }
 0xb3f   :  { %5152 = vmatprep.subr.bf16.mxu0 %v6553_v26  ;;  %5184 = vmatprep.subr.bf16.mxu1 %v6555_v24 }
 0xbf4   :  { %v3273_v62 = vpop.f32.mrb[22].mxu0  ;;  %v3344_v57 = vpop.f32.mrb[22].mxu1 }
 0xbf5   :  { %v5405_v11 = vadd.f32 %v3273_v62, %v6699_v22  ;;  %v3275_v51 = vpop.f32.mrb[23].mxu0  ;;  %v3346_v36 = vpop.f32.mrb[23].mxu1  ;;  %v5421_v19 = vadd.f32 %v3344_v57, %v6708_v4 }
 0xbf6   :  { %v5406_v8 = vadd.f32 %v3275_v51, %v6703_v55  ;;  %v5422_v39 = vadd.f32 %v3346_v36, %v6714_v49 }
 0xbf7   :  { %v3353_v47 = vmul.f32 0.5, %v5405_v11 }
 0xbf8   :  { %v3357_v63 = vmul.f32 0.5, %v5406_v8  ;;  %v3362_v5 = vmul.f32 0.5, %v5422_v39 }
 0xbf9   :  { %5614 = vtanh.f32 %v3353_v47 }
 0xbfa   :  { %5616 = vtanh.f32 %v3357_v63 }
 0xbfb   :  { %5618 = vtanh.f32 %v5421_v19 }
 0xbfc   :  { %5620 = vtanh.f32 %v3362_v5 }
 0xc03   :  { %v5615_v46 = vpop.eup %5614 }
 0xc04   :  { %v5617_v13 = vpop.eup %5616  ;;  %v3355_v29 = vmul.f32 0.5, %v5615_v46 }
 0xc05   :  { %v3359_v52 = vmul.f32 0.5, %v5617_v13  ;;  %v5619_v50 = vpop.eup %5618 }
 0xc06   :  { %v3356_v27 = vadd.f32 0.5, %v3355_v29  ;;  %v5621_v45 = vpop.eup %5620 }
 0xc07   :  { %v3360_v38 = vadd.f32 0.5, %v3359_v52  ;;  %v3364_v61 = vmul.f32 0.5, %v5621_v45 }
 0xc08   :  { %v3367_v3 = vmul.f32 %v5619_v50, %v3356_v27 }
 0xc09   :  { %v3366_v54 = vmul.f32 %v3360_v38, %v6801_v43  ;;  %v3365_v12 = vadd.f32 0.5, %v3364_v61 }
 0xc0b   :  { %v6843_v53 = vadd.f32 %v3367_v3, %v3366_v54 }
 0xc0d   :  { %5622 = vtanh.f32 %v6843_v53 }
 0xc17   :  { %v5623_v60 = vpop.eup %5622 }
 0xc18   :  { %v3370_v7 = vmul.f32 %v5623_v60, %v3365_v12 }
 0xc1a   :  { %3440 = vmatmul.mubr.f32.vlgmr.msra.gmra.mrb[24].mxu0 %v3370_v7  ;;  %3511 = vmatmul.mubr.f32.vlgmr.msra.gmra.mrb[24].mxu1 %v3370_v7 }
 0xc1b   :  { %5154 = vmatpush1.bf16.msra.mxu0 %v6557_v42  ;;  %5186 = vmatpush1.bf16.msra.mxu1 %v6560_v44 }
 0xc1c   :  { %5156 = vmatprep.subr.bf16.mxu0 %v6565_v2  ;;  %5188 = vmatprep.subr.bf16.mxu1 %v6567_v33 }
 0xc1d   :  { %3607 = vmatprep.mubr.f32.mxu0 %v5763_v0  ;;  %3678 = vmatprep.mubr.f32.mxu1 %v5763_v0 }
 0xc1f   :  { %5158 = vmatpush1.bf16.msra.mxu0 %v6569_v31  ;;  %5190 = vmatpush1.bf16.msra.mxu1 %v6572_v15 }
 0xc20   :  { %5160 = vmatprep.subr.bf16.mxu0 %v6577_v58  ;;  %5192 = vmatprep.subr.bf16.mxu1 %v6579_v25 }
 0xc23   :  { %5162 = vmatpush1.bf16.msra.mxu0 %v6581_v34  ;;  %5194 = vmatpush1.bf16.msra.mxu1 %v6584_v6 }
 0xc24   :  { %5164 = vmatprep.subr.bf16.mxu0 %v6589_v48  ;;  %5196 = vmatprep.subr.bf16.mxu1 %v6591_v28 }
 0xc27   :  { %5166 = vmatpush1.bf16.msra.mxu0 %v6593_v41  ;;  %5198 = vmatpush1.bf16.msra.mxu1 %v6596_v37 }
 0xc28   :  { %5168 = vmatprep.subr.bf16.mxu0 %v6601_v30  ;;  %5200 = vmatprep.subr.bf16.mxu1 %v6603_v35 }
 0xc2b   :  { %5170 = vmatpush1.bf16.msra.mxu0 %v6605_v10  ;;  %5202 = vmatpush1.bf16.msra.mxu1 %v6608_v32 }
 0xc2c   :  { %5172 = vmatprep.subr.bf16.mxu0 %v6612_v16  ;;  %5204 = vmatprep.subr.bf16.mxu1 %v6614_v23 }
 0xc2f   :  { %5174 = vmatpush1.bf16.msra.mxu0 %v6617_v9  ;;  %5206 = vmatpush1.bf16.msra.mxu1 %v6621_v17 }
 0xc30   :  { %5176 = vmatprep.subr.bf16.mxu0 %v6623_v21  ;;  %5208 = vmatprep.subr.bf16.mxu1 %v6625_v40 }
 0xc33   :  { %5178 = vmatpush1.bf16.msra.mxu0 %v6628_v18  ;;  %5210 = vmatpush1.bf16.msra.mxu1 %v6632_v59 }
 0xc34   :  { %5180 = vmatprep.subr.bf16.mxu0 %v6637_v20  ;;  %5212 = vmatprep.subr.bf16.mxu1 %v6639_v14 }
 0xc37   :  { %5182 = vmatpush1.bf16.msra.mxu0 %v6641_v1  ;;  %5214 = vmatpush1.bf16.msra.mxu1 %v6644_v56 }
 0xc38   :  { %5216 = vmatprep.subr.bf16.mxu0 %v6553_v26  ;;  %5248 = vmatprep.subr.bf16.mxu1 %v6555_v24 }
 0xced   :  { %v3441_v43 = vpop.f32.mrb[24].mxu0  ;;  %v3512_v62 = vpop.f32.mrb[24].mxu1 }
 0xcee   :  { %v5407_v57 = vadd.f32 %v3441_v43, %v6699_v22  ;;  %v3443_v11 = vpop.f32.mrb[25].mxu0  ;;  %v3514_v51 = vpop.f32.mrb[25].mxu1  ;;  %v5423_v63 = vadd.f32 %v3512_v62, %v6708_v4 }
 0xcef   :  { %v5408_v36 = vadd.f32 %v3443_v11, %v6703_v55  ;;  %v5424_v19 = vadd.f32 %v3514_v51, %v6714_v49 }
 0xcf0   :  { %v3521_v8 = vmul.f32 0.5, %v5407_v57 }
 0xcf1   :  { %v3525_v47 = vmul.f32 0.5, %v5408_v36  ;;  %v3530_v39 = vmul.f32 0.5, %v5424_v19 }
 0xcf2   :  { %5624 = vtanh.f32 %v3521_v8 }
 0xcf3   :  { %5626 = vtanh.f32 %v3525_v47 }
 0xcf4   :  { %5628 = vtanh.f32 %v5423_v63 }
 0xcf5   :  { %5630 = vtanh.f32 %v3530_v39 }
 0xcfc   :  { %v5625_v5 = vpop.eup %5624 }
 0xcfd   :  { %v5627_v46 = vpop.eup %5626  ;;  %v3523_v13 = vmul.f32 0.5, %v5625_v5 }
 0xcfe   :  { %v3527_v29 = vmul.f32 0.5, %v5627_v46  ;;  %v5629_v27 = vpop.eup %5628 }
 0xcff   :  { %v3524_v52 = vadd.f32 0.5, %v3523_v13  ;;  %v5631_v45 = vpop.eup %5630 }
 0xd00   :  { %v3528_v50 = vadd.f32 0.5, %v3527_v29  ;;  %v3532_v61 = vmul.f32 0.5, %v5631_v45 }
 0xd01   :  { %v3535_v38 = vmul.f32 %v5629_v27, %v3524_v52 }
 0xd02   :  { %v3534_v3 = vmul.f32 %v3528_v50, %v6843_v53  ;;  %v3533_v12 = vadd.f32 0.5, %v3532_v61 }
 0xd04   :  { %v6885_v54 = vadd.f32 %v3535_v38, %v3534_v3 }
 0xd06   :  { %5632 = vtanh.f32 %v6885_v54 }
 0xd10   :  { %v5633_v60 = vpop.eup %5632 }
 0xd11   :  { %v3538_v7 = vmul.f32 %v5633_v60, %v3533_v12  ;;  %v4046_v60 = vld [vmem:[%s7046_s7 + $0x18] sm:$0xff] }
 0xd13   :  { %3608 = vmatmul.mubr.f32.vlgmr.msra.gmra.mrb[26].mxu0 %v3538_v7  ;;  %3679 = vmatmul.mubr.f32.vlgmr.msra.gmra.mrb[26].mxu1 %v3538_v7 }
 0xd14   :  { %5218 = vmatpush1.bf16.msra.mxu0 %v6557_v42  ;;  %5250 = vmatpush1.bf16.msra.mxu1 %v6560_v44 }
 0xd15   :  { %5220 = vmatprep.subr.bf16.mxu0 %v6565_v2  ;;  %5252 = vmatprep.subr.bf16.mxu1 %v6567_v33 }
 0xd16   :  { %3775 = vmatprep.mubr.f32.mxu0 %v5763_v0  ;;  %3846 = vmatprep.mubr.f32.mxu1 %v5763_v0 }
 0xd18   :  { %5222 = vmatpush1.bf16.msra.mxu0 %v6569_v31  ;;  %5254 = vmatpush1.bf16.msra.mxu1 %v6572_v15 }
 0xd19   :  { %5224 = vmatprep.subr.bf16.mxu0 %v6577_v58  ;;  %5256 = vmatprep.subr.bf16.mxu1 %v6579_v25 }
 0xd1c   :  { %5226 = vmatpush1.bf16.msra.mxu0 %v6581_v34  ;;  %5258 = vmatpush1.bf16.msra.mxu1 %v6584_v6 }
 0xd1d   :  { %5228 = vmatprep.subr.bf16.mxu0 %v6589_v48  ;;  %5260 = vmatprep.subr.bf16.mxu1 %v6591_v28 }
 0xd20   :  { %5230 = vmatpush1.bf16.msra.mxu0 %v6593_v41  ;;  %5262 = vmatpush1.bf16.msra.mxu1 %v6596_v37 }
 0xd21   :  { %5232 = vmatprep.subr.bf16.mxu0 %v6601_v30  ;;  %5264 = vmatprep.subr.bf16.mxu1 %v6603_v35 }
 0xd24   :  { %5234 = vmatpush1.bf16.msra.mxu0 %v6605_v10  ;;  %5266 = vmatpush1.bf16.msra.mxu1 %v6608_v32 }
 0xd25   :  { %5236 = vmatprep.subr.bf16.mxu0 %v6612_v16  ;;  %5268 = vmatprep.subr.bf16.mxu1 %v6614_v23 }
 0xd28   :  { %5238 = vmatpush1.bf16.msra.mxu0 %v6617_v9  ;;  %5270 = vmatpush1.bf16.msra.mxu1 %v6621_v17 }
 0xd29   :  { %5240 = vmatprep.subr.bf16.mxu0 %v6623_v21  ;;  %5272 = vmatprep.subr.bf16.mxu1 %v6625_v40 }
 0xd2c   :  { %5242 = vmatpush1.bf16.msra.mxu0 %v6628_v18  ;;  %5274 = vmatpush1.bf16.msra.mxu1 %v6632_v59 }
 0xd2d   :  { %5244 = vmatprep.subr.bf16.mxu0 %v6637_v20  ;;  %5276 = vmatprep.subr.bf16.mxu1 %v6639_v14 }
 0xd30   :  { %5246 = vmatpush1.bf16.msra.mxu0 %v6641_v1  ;;  %5278 = vmatpush1.bf16.msra.mxu1 %v6644_v56 }
 0xd31   :  { %5280 = vmatprep.subr.bf16.mxu0 %v6553_v26  ;;  %5312 = vmatprep.subr.bf16.mxu1 %v6555_v24 }
 0xde6   :  { %v3609_v53 = vpop.f32.mrb[26].mxu0  ;;  %v3680_v43 = vpop.f32.mrb[26].mxu1 }
 0xde7   :  { %v5409_v62 = vadd.f32 %v3609_v53, %v6699_v22  ;;  %v3611_v57 = vpop.f32.mrb[27].mxu0  ;;  %v3682_v11 = vpop.f32.mrb[27].mxu1  ;;  %v5425_v47 = vadd.f32 %v3680_v43, %v6708_v4  ;;  %v4047_v53 = vld [vmem:[%s7046_s7 + $0x20] sm:$0xff]  ;;  %v4048_v43 = vld [vmem:[%s7046_s7 + $0x28] sm:$0xff] }
 0xde8   :  { %v5410_v51 = vadd.f32 %v3611_v57, %v6703_v55  ;;  %v5426_v63 = vadd.f32 %v3682_v11, %v6714_v49  ;;  %v4049_v57 = vld [vmem:[%s7046_s7 + $0x30] sm:$0xff]  ;;  %v4050_v11 = vld [vmem:[%s7046_s7 + $0x38] sm:$0xff] }
 0xde9   :  { %v3689_v36 = vmul.f32 0.5, %v5409_v62  ;;  %v5350_v62 = vpack.c.bf16 %v4048_v43, %v4047_v53 }
 0xdea   :  { %v3693_v8 = vmul.f32 0.5, %v5410_v51  ;;  %v3698_v26 = vmul.f32 0.5, %v5426_v63  ;;  %v5353_v51 = vpack.c.bf16 %v4050_v11, %v4049_v57  ;;  %v4053_v63 = vld [vmem:[%s7046_s7 + $0x50] sm:$0xff] }
 0xdeb   :  { %5634 = vtanh.f32 %v3689_v36  ;;  %v4051_v36 = vld [vmem:[%s7046_s7 + $0x40] sm:$0xff] }
 0xdec   :  { %5636 = vtanh.f32 %v3693_v8  ;;  %v4052_v8 = vld [vmem:[%s7046_s7 + $0x48] sm:$0xff] }
 0xded   :  { %5638 = vtanh.f32 %v5425_v47  ;;  %v5356_v47 = vpack.c.bf16 %v4052_v8, %v4051_v36 }
 0xdee   :  { %5640 = vtanh.f32 %v3698_v26  ;;  %v4054_v26 = vld [vmem:[%s7046_s7 + $0x58] sm:$0xff] }
 0xdf5   :  { %v5635_v19 = vpop.eup %5634 }
 0xdf6   :  { %v5637_v24 = vpop.eup %5636  ;;  %v3691_v39 = vmul.f32 0.5, %v5635_v19  ;;  %v5359_v19 = vpack.c.bf16 %v4054_v26, %v4053_v63 }
 0xdf7   :  { %v3695_v5 = vmul.f32 0.5, %v5637_v24  ;;  %v5639_v13 = vpop.eup %5638  ;;  %v4055_v24 = vld [vmem:[%s7046_s7 + $0x60] sm:$0xff] }
 0xdf8   :  { %v3692_v46 = vadd.f32 0.5, %v3691_v39  ;;  %v5641_v38 = vpop.eup %5640  ;;  %v4056_v39 = vld [vmem:[%s7046_s7 + $0x68] sm:$0xff] }
 0xdf9   :  { %v3696_v29 = vadd.f32 0.5, %v3695_v5  ;;  %v3700_v3 = vmul.f32 0.5, %v5641_v38  ;;  %v5362_v5 = vpack.c.bf16 %v4056_v39, %v4055_v24 }
 0xdfa   :  { %v3703_v52 = vmul.f32 %v5639_v13, %v3692_v46  ;;  %v4057_v46 = vld [vmem:[%s7046_s7 + $0x70] sm:$0xff]  ;;  %v4058_v13 = vld [vmem:[%s7046_s7 + $0x78] sm:$0xff] }
 0xdfb   :  { %v3702_v27 = vmul.f32 %v3696_v29, %v6885_v54  ;;  %v3701_v45 = vadd.f32 0.5, %v3700_v3  ;;  %v4045_v54 = vld [vmem:[%s7046_s7 + $0x10] sm:$0xff]  ;;  %v5365_v29 = vpack.c.bf16 %v4058_v13, %v4057_v46 }
 0xdfc   :  { %v5347_v7 = vpack.c.bf16 %v4046_v60, %v4045_v54 }
 0xdfd   :  { %v6927_v50 = vadd.f32 %v3703_v52, %v3702_v27 }
 0xdff   :  { %5642 = vtanh.f32 %v6927_v50 }
 0xe09   :  { %v5643_v61 = vpop.eup %5642 }
 0xe0a   :  { %v3706_v12 = vmul.f32 %v5643_v61, %v3701_v45 }
 0xe0c   :  { %3776 = vmatmul.mubr.f32.vlgmr.msra.gmra.mrb[28].mxu0 %v3706_v12  ;;  %3847 = vmatmul.mubr.f32.vlgmr.msra.gmra.mrb[28].mxu1 %v3706_v12 }
 0xe0d   :  { %5282 = vmatpush1.bf16.msra.mxu0 %v6557_v42  ;;  %5314 = vmatpush1.bf16.msra.mxu1 %v6560_v44 }
 0xe0e   :  { %5284 = vmatprep.subr.bf16.mxu0 %v6565_v2  ;;  %5316 = vmatprep.subr.bf16.mxu1 %v6567_v33 }
 0xe0f   :  { %3943 = vmatprep.mubr.f32.mxu0 %v5763_v0  ;;  %4014 = vmatprep.mubr.f32.mxu1 %v5763_v0 }
 0xe11   :  { %5286 = vmatpush1.bf16.msra.mxu0 %v6569_v31  ;;  %5318 = vmatpush1.bf16.msra.mxu1 %v6572_v15 }
 0xe12   :  { %5288 = vmatprep.subr.bf16.mxu0 %v6577_v58  ;;  %5320 = vmatprep.subr.bf16.mxu1 %v6579_v25 }
 0xe15   :  { %5290 = vmatpush1.bf16.msra.mxu0 %v6581_v34  ;;  %5322 = vmatpush1.bf16.msra.mxu1 %v6584_v6 }
 0xe16   :  { %5292 = vmatprep.subr.bf16.mxu0 %v6589_v48  ;;  %5324 = vmatprep.subr.bf16.mxu1 %v6591_v28 }
 0xe19   :  { %5294 = vmatpush1.bf16.msra.mxu0 %v6593_v41  ;;  %5326 = vmatpush1.bf16.msra.mxu1 %v6596_v37 }
 0xe1a   :  { %5296 = vmatprep.subr.bf16.mxu0 %v6601_v30  ;;  %5328 = vmatprep.subr.bf16.mxu1 %v6603_v35 }
 0xe1d   :  { %5298 = vmatpush1.bf16.msra.mxu0 %v6605_v10  ;;  %5330 = vmatpush1.bf16.msra.mxu1 %v6608_v32 }
 0xe1e   :  { %5300 = vmatprep.subr.bf16.mxu0 %v6612_v16  ;;  %5332 = vmatprep.subr.bf16.mxu1 %v6614_v23 }
 0xe21   :  { %5302 = vmatpush1.bf16.msra.mxu0 %v6617_v9  ;;  %5334 = vmatpush1.bf16.msra.mxu1 %v6621_v17 }
 0xe22   :  { %5304 = vmatprep.subr.bf16.mxu0 %v6623_v21  ;;  %5336 = vmatprep.subr.bf16.mxu1 %v6625_v40 }
 0xe25   :  { %5306 = vmatpush1.bf16.msra.mxu0 %v6628_v18  ;;  %5338 = vmatpush1.bf16.msra.mxu1 %v6632_v59 }
 0xe26   :  { %5308 = vmatprep.subr.bf16.mxu0 %v6637_v20  ;;  %5340 = vmatprep.subr.bf16.mxu1 %v6639_v14  ;;  %v4043_v20 = vld [vmem:[%s7046_s7] sm:$0xff]  ;;  %v4044_v14 = vld [vmem:[%s7046_s7 + $0x8] sm:$0xff] }
 0xe29   :  { %5310 = vmatpush1.bf16.msra.mxu0 %v6641_v1  ;;  %5342 = vmatpush1.bf16.msra.mxu1 %v6644_v56  ;;  %v5344_v1 = vpack.c.bf16 %v4044_v14, %v4043_v20  ;;  %v5764_v56 = vmov 0.0|0.0  }
 0xe2a   :  { %5343 = vmatprep.subr.bf16.mxu0 %v5764_v56 }
 0xedf   :  { %v3777_v42 = vpop.f32.mrb[28].mxu0  ;;  %v3848_v44 = vpop.f32.mrb[28].mxu1 }
 0xee0   :  { %v5411_v2 = vadd.f32 %v3777_v42, %v6699_v22  ;;  %v3779_v33 = vpop.f32.mrb[29].mxu0  ;;  %v3850_v31 = vpop.f32.mrb[29].mxu1  ;;  %v5427_v34 = vadd.f32 %v3848_v44, %v6708_v4 }
 0xee1   :  { %v5412_v15 = vadd.f32 %v3779_v33, %v6703_v55  ;;  %v5428_v6 = vadd.f32 %v3850_v31, %v6714_v49 }
 0xee2   :  { %v3857_v58 = vmul.f32 0.5, %v5411_v2 }
 0xee3   :  { %v3861_v25 = vmul.f32 0.5, %v5412_v15  ;;  %v3866_v48 = vmul.f32 0.5, %v5428_v6 }
 0xee4   :  { %5644 = vtanh.f32 %v3857_v58 }
 0xee5   :  { %5646 = vtanh.f32 %v3861_v25 }
 0xee6   :  { %5648 = vtanh.f32 %v5427_v34 }
 0xee7   :  { %5650 = vtanh.f32 %v3866_v48 }
 0xeee   :  { %v5645_v28 = vpop.eup %5644 }
 0xeef   :  { %v5647_v41 = vpop.eup %5646  ;;  %v3859_v37 = vmul.f32 0.5, %v5645_v28 }
 0xef0   :  { %v3863_v30 = vmul.f32 0.5, %v5647_v41  ;;  %v5649_v10 = vpop.eup %5648 }
 0xef1   :  { %v3860_v35 = vadd.f32 0.5, %v3859_v37  ;;  %v5651_v17 = vpop.eup %5650 }
 0xef2   :  { %v3864_v32 = vadd.f32 0.5, %v3863_v30  ;;  %v3868_v21 = vmul.f32 0.5, %v5651_v17 }
 0xef3   :  { %v3871_v16 = vmul.f32 %v5649_v10, %v3860_v35 }
 0xef4   :  { %v3870_v23 = vmul.f32 %v3864_v32, %v6927_v50  ;;  %v3869_v40 = vadd.f32 0.5, %v3868_v21 }
 0xef6   :  { %v6967_v9 = vadd.f32 %v3871_v16, %v3870_v23 }
 0xef8   :  { %5652 = vtanh.f32 %v6967_v9 }
 0xf02   :  { %v5653_v18 = vpop.eup %5652 }
 0xf03   :  { %v3874_v59 = vmul.f32 %v5653_v18, %v3869_v40 }
 0xf05   :  { %3944 = vmatmul.mubr.f32.vlgmr.msra.gmra.mrb[30].mxu0 %v3874_v59  ;;  %4015 = vmatmul.mubr.f32.vlgmr.msra.gmra.mrb[30].mxu1 %v3874_v59 }
 0xf06   :  { %5345 = vmatpush3.bf16.msra.mxu0 %v5344_v1  ;;  %4220 = vmatprep.mubr.msk.f32.mxu0 %vm5765_vm1, %v5763_v0 }
 0xf07   :  { %5346 = vmatprep.subr.bf16.mxu0 %v5764_v56 }
 0xf0a   :  { %5348 = vmatpush3.bf16.msra.mxu0 %v5347_v7 }
 0xf0b   :  { %5349 = vmatprep.subr.bf16.mxu0 %v5764_v56 }
 0xf0e   :  { %5351 = vmatpush3.bf16.msra.mxu0 %v5350_v62 }
 0xf0f   :  { %5352 = vmatprep.subr.bf16.mxu0 %v5764_v56 }
 0xf12   :  { %5354 = vmatpush3.bf16.msra.mxu0 %v5353_v51 }
 0xf13   :  { %5355 = vmatprep.subr.bf16.mxu0 %v5764_v56 }
 0xf16   :  { %5357 = vmatpush3.bf16.msra.mxu0 %v5356_v47 }
 0xf17   :  { %5358 = vmatprep.subr.bf16.mxu0 %v5764_v56 }
 0xf1a   :  { %5360 = vmatpush3.bf16.msra.mxu0 %v5359_v19 }
 0xf1b   :  { %5361 = vmatprep.subr.bf16.mxu0 %v5764_v56 }
 0xf1e   :  { %5363 = vmatpush3.bf16.msra.mxu0 %v5362_v5 }
 0xf1f   :  { %5364 = vmatprep.subr.bf16.mxu0 %v5764_v56 }
 0xf22   :  { %5366 = vmatpush3.bf16.msra.mxu0 %v5365_v29 }
 0xfd8   :  { %v3945_v52 = vpop.f32.mrb[30].mxu0  ;;  %v4016_v27 = vpop.f32.mrb[30].mxu1 }
 0xfd9   :  { %v5413_v50 = vadd.f32 %v3945_v52, %v6699_v22  ;;  %v3947_v38 = vpop.f32.mrb[31].mxu0  ;;  %v4018_v3 = vpop.f32.mrb[31].mxu1  ;;  %v5429_v42 = vadd.f32 %v4016_v27, %v6708_v4 }
 0xfda   :  { %v5414_v45 = vadd.f32 %v3947_v38, %v6703_v55  ;;  %v5430_v44 = vadd.f32 %v4018_v3, %v6714_v49  ;;  %v4170_v49 = vld [vmem:[%s7047_s8] ss:$0 sm:$0xff] }
 0xfdb   :  { %v4025_v61 = vmul.f32 0.5, %v5413_v50 }
 0xfdc   :  { %v4029_v12 = vmul.f32 0.5, %v5414_v45  ;;  %v4034_v2 = vmul.f32 0.5, %v5430_v44 }
 0xfdd   :  { %5654 = vtanh.f32 %v4025_v61 }
 0xfde   :  { %5656 = vtanh.f32 %v4029_v12 }
 0xfdf   :  { %5658 = vtanh.f32 %v5429_v42 }
 0xfe0   :  { %5660 = vtanh.f32 %v4034_v2 }
 0xfe7   :  { %v5655_v33 = vpop.eup %5654 }
 0xfe8   :  { %v5657_v0 = vpop.eup %5656  ;;  %v4027_v31 = vmul.f32 0.5, %v5655_v33 }
 0xfe9   :  { %v4031_v15 = vmul.f32 0.5, %v5657_v0  ;;  %v5659_v58 = vpop.eup %5658 }
 0xfea   :  { %v4028_v22 = vadd.f32 0.5, %v4027_v31  ;;  %v5661_v48 = vpop.eup %5660 }
 0xfeb   :  { %v4032_v25 = vadd.f32 0.5, %v4031_v15  ;;  %v4036_v4 = vmul.f32 0.5, %v5661_v48 }
 0xfec   :  { %v4039_v34 = vmul.f32 %v5659_v58, %v4028_v22 }
 0xfed   :  { %v4038_v55 = vmul.f32 %v4032_v25, %v6967_v9  ;;  %v4037_v28 = vadd.f32 0.5, %v4036_v4 }
 0xfef   :  { %v4040_v6 = vadd.f32 %v4039_v34, %v4038_v55 }
 0xff1   :  { %5662 = vtanh.f32 %v4040_v6 }
 0xffb   :  { %v5663_v41 = vpop.eup %5662 }
 0xffc   :  { %v4042_v37 = vmul.f32 %v5663_v41, %v4037_v28 }
 0xffe   :  { %4221 = vmatmul.mubr.f32.vlgmr.msra.gmra.mrb[32].mxu0 %v4042_v37 }
0x10d1   :  { %v4132_v30 = vpop.f32.mrb[32].mxu0 }
0x10d2   :  { %v4133_v35 = vadd.f32 %v4170_v49, %v4132_v30  ;;  %v4222_v10 = vpop.f32.mrb[33].mxu0 }
0x10d4   :  { %4137 = vst.msk [vmem:[#allocation10] sm:$0xff] %vm4136_vm2, %v4133_v35 }
0x10d5   :  { %5741 = shalt.err (!%p5738_p0)
}
0x10d6   :  { %s5742_s19 = scalar_lea.hbm %s7048_s9, 128 }
0x10d7   :  { %p5743_p1 = scmp.ne.s32.totalorder %s7048_s9, %s5742_s19  ;;  %p5746_p2 = scmp.lt.u32.totalorder %s5742_s19, %s7048_s9 }
0x10d9   :  { %p5748_p3 = pnand %p5746_p2, %p5743_p1 }
0x10db   :  { %5751 = shalt.err (!%p5748_p3)
}
0x10dc   :  { %4147 = dma.vmem_to_hbm [thread:$0]  %s4145_s16, 128, %s7048_s9, [#allocation6]  }
0x10dd   :  { %5756 = dma.done.wait [#allocation6], 128  }
0x10de   :  { %5757 = vsyncadd [#allocation6], 4294967168 }
0x10df   :  { %4151 = vsyncpa [#allocation5], 1 }
0x10e0   :  { %4152 = vsyncpa [#allocation8], 1 }
0x10e1   :  { %4153 = vsyncpa [#allocation6], 1 }

</bundles_post_ra>
